<compile_context>
chip_gen: v5e
topology: v5e:2x2
jax: 0.10.0
libtpu: 0.0.40
codegen_flags: <defaults>
</compile_context>

<pallas_src>
import jax
import jax.numpy as jnp
from jax import lax
from jax.experimental import pallas as pl
from jax.experimental.pallas import tpu as pltpu


# ------------------------------ fused Pallas kernel -----------------------------

def _pg_fused_kernel(pt_ref, pk_ref, wlin_hbm, o_ref,
                     y1s_ref, flat_ref, wlin_ref, lin_sem):
    """Single-kernel forward.

    pt_ref  : [20, 20, 64]  combined receptive-field patches:
              pt[r, c, ho*8+wo] = x[0, 0, 8*ho + r, 8*wo + c]
    pk_ref  : [48, 256]     packed conv params:
              [0:16 , :]      conv2 weight, even out-channels, cols = tap*16 + c_in
              [16:32, :]      conv2 weight, odd  out-channels
              [32:48, 0:64]   conv1 weight, cols = kh*8 + kw
              [32:48, 64:65]  conv1 bias
              [32:48, 65:66]  conv2 bias (even channels)
              [32:48, 66:67]  conv2 bias (odd channels)
    wlin_hbm: [2192, 128]   packed linear params, left in HBM (manual DMA):
              [0:2048, :] lin1_w^T, [2048, :] lin1_b,
              [2056:2184, 0:6] lin2_w^T, [2184, 0:6] lin2_b
    o_ref   : [1, 6]        action probabilities
    y1s_ref : [256, 64]     scratch: relu(conv1) staged as (tap*16 + c_in, pos)
    flat_ref: [8, 2048]     scratch: PyTorch NCHW flatten (all rows identical)
    wlin_ref: [2192, 128]   VMEM landing buffer for wlin_hbm
    lin_sem : DMA semaphore for the wlin copy
    """
    f32 = jnp.float32

    # Kick off the linear-weight DMA first so the ~1 MiB copy overlaps the convs.
    lin_cp = pltpu.make_async_copy(wlin_hbm, wlin_ref, lin_sem)
    lin_cp.start()

    w1 = pk_ref[32:48, 0:64]        # [16, 64]
    b1 = pk_ref[32:48, 64:65]       # [16, 1]
    w2e = pk_ref[0:16, :]           # [16, 256]
    w2o = pk_ref[16:32, :]          # [16, 256]
    b2e = pk_ref[32:48, 65:66]      # [16, 1]
    b2o = pk_ref[32:48, 66:67]      # [16, 1]

    # ---- conv1 + ReLU, evaluated per conv2 tap (di, dj) and written directly
    #      into the (tap*16 + c_in, position) staging layout conv2 consumes.
    for di in range(4):                                         # static unroll
        for dj in range(4):
            t = 4 * di + dj
            rows = [pt_ref[4 * di + kh, 4 * dj:4 * dj + 8, :] for kh in range(8)]
            p_t = jnp.concatenate(rows, axis=0)                 # [64, 64], row = kh*8+kw
            y1 = jnp.dot(w1, p_t, preferred_element_type=f32)   # [16, 64]
            y1s_ref[t * 16:(t + 1) * 16, :] = jnp.maximum(y1 + b1, 0.0)

    # ---- conv2 + ReLU: two K=256 MXU matmuls (even / odd output channels).
    y1s = y1s_ref[...]                                          # [256, 64]
    ye = jnp.maximum(jnp.dot(w2e, y1s, preferred_element_type=f32) + b2e, 0.0)
    yo = jnp.maximum(jnp.dot(w2o, y1s, preferred_element_type=f32) + b2o, 0.0)
    # Row r of ypair = [channel 2r | channel 2r+1] -> 128 lanes per row.
    ypair = jnp.concatenate([ye, yo], axis=1)                   # [16, 128]

    # ---- PyTorch NCHW flatten (flat index c*64 + pos): 16 lane-aligned,
    #      full-width vreg stores (all 8 sublanes written, nothing uninitialized).
    for r in range(16):                                         # static unroll
        flat_ref[:, r * 128:(r + 1) * 128] = jnp.broadcast_to(
            ypair[r:r + 1, :], (8, 128))

    # Linear weights must be resident from here on.
    lin_cp.wait()

    # ---- linear1 + ReLU: one K=2048 MXU matmul (rows 1..7 are duplicates).
    h = jnp.dot(flat_ref[...], wlin_ref[0:2048, :],
                preferred_element_type=f32) + wlin_ref[2048:2049, :]
    h = jnp.maximum(h, 0.0)                                     # [8, 128]

    # ---- linear2 + softmax (only the real row; exact division).
    logits = jnp.dot(h, wlin_ref[2056:2184, 0:6],
                     preferred_element_type=f32) + wlin_ref[2184:2185, 0:6]
    row = logits[0:1, :]                                        # [1, 6]
    e = jnp.exp(row - jnp.max(row, axis=-1, keepdims=True))
    o_ref[...] = (e / jnp.sum(e, axis=-1, keepdims=True)).astype(o_ref.dtype)


# ----------------------------------- wrapper ------------------------------------

def init_params(key):
    """Deterministic PyTorch-style uniform(+-1/sqrt(fan_in)) init, PyTorch shapes."""
    ks = jax.random.split(key, 8)

    def u(k, shape, fan_in):
        bound = 1.0 / jnp.sqrt(fan_in)
        return jax.random.uniform(k, shape, jnp.float32, -bound, bound)

    return {
        "conv1_w": u(ks[0], (16, 1, 8, 8), 1 * 8 * 8),
        "conv1_b": u(ks[1], (16,), 1 * 8 * 8),
        "conv2_w": u(ks[2], (32, 16, 4, 4), 16 * 4 * 4),
        "conv2_b": u(ks[3], (32,), 16 * 4 * 4),
        "lin1_w": u(ks[4], (128, 2048), 2048),
        "lin1_b": u(ks[5], (128,), 2048),
        "lin2_w": u(ks[6], (6, 128), 128),
        "lin2_b": u(ks[7], (6,), 128),
    }


def prepare_params(params):
    """Fold all weight re-layouts / packing once (outside the per-step forward)."""
    # conv2 weight with columns ordered (tap = kh2*4 + kw2, c_in)
    w2t = jnp.transpose(params["conv2_w"], (0, 2, 3, 1)).reshape(32, 256)

    pk = jnp.zeros((48, 256), jnp.float32)
    pk = pk.at[0:16, :].set(w2t[0::2, :])                         # even out-channels
    pk = pk.at[16:32, :].set(w2t[1::2, :])                        # odd out-channels
    pk = pk.at[32:48, 0:64].set(params["conv1_w"].reshape(16, 64))
    pk = pk.at[32:48, 64].set(params["conv1_b"])
    pk = pk.at[32:48, 65].set(params["conv2_b"][0::2])
    pk = pk.at[32:48, 66].set(params["conv2_b"][1::2])

    wlin = jnp.zeros((2192, 128), jnp.float32)
    wlin = wlin.at[0:2048, :].set(params["lin1_w"].T)             # [2048, 128]
    wlin = wlin.at[2048, :].set(params["lin1_b"])
    wlin = wlin.at[2056:2184, 0:6].set(params["lin2_w"].T)        # [128, 6]
    wlin = wlin.at[2184, 0:6].set(params["lin2_b"])

    return {"pk": pk, "wlin": wlin}


@jax.jit
def pg_model_forward(prep, x_nchw):
    """x_nchw: [1, 1, 80, 80] float32 -> action probabilities [1, 6]."""
    # Combined conv1+conv2 receptive field (20x20 window, stride 8): one pure
    # data-movement patches op, DEFAULT precision (exact).
    # pt[0, r*20 + c, ho, wo] = x[0, 0, 8*ho + r, 8*wo + c]
    pt = lax.conv_general_dilated_patches(
        x_nchw, filter_shape=(20, 20), window_strides=(8, 8), padding="VALID",
        dimension_numbers=("NCHW", "OIHW", "NCHW"))               # [1, 400, 8, 8]
    pt = pt.reshape(20, 20, 64)                                   # [r, c, ho*8+wo]

    vmem = pl.BlockSpec(memory_space=pltpu.MemorySpace.VMEM)
    return pl.pallas_call(
        _pg_fused_kernel,
        out_shape=jax.ShapeDtypeStruct((1, 6), jnp.float32),
        in_specs=[vmem, vmem, pl.BlockSpec(memory_space=pl.ANY)],
        out_specs=vmem,
        scratch_shapes=[
            pltpu.VMEM((256, 64), jnp.float32),     # y1s staging
            pltpu.VMEM((8, 2048), jnp.float32),     # NCHW flatten
            pltpu.VMEM((2192, 128), jnp.float32),   # linear weights landing buffer
            pltpu.SemaphoreType.DMA(()),            # wlin copy semaphore
        ],
    )(pt, prep["pk"], prep["wlin"])


# ------------------------------ pure-JAX reference ------------------------------

def pg_model_reference(params, x):
    y = lax.conv_general_dilated(x, params["conv1_w"], (4, 4), "VALID",
                                 dimension_numbers=("NCHW", "OIHW", "NCHW"))
    y = jnp.maximum(y + params["conv1_b"][None, :, None, None], 0.0)
    y = lax.conv_general_dilated(y, params["conv2_w"], (2, 2), "VALID",
                                 dimension_numbers=("NCHW", "OIHW", "NCHW"))
    y = jnp.maximum(y + params["conv2_b"][None, :, None, None], 0.0)
    flat = y.reshape(1, -1)
    h = jnp.maximum(flat @ params["lin1_w"].T + params["lin1_b"][None, :], 0.0)
    logits = h @ params["lin2_w"].T + params["lin2_b"][None, :]
    return jax.nn.softmax(logits, axis=-1)


# ------------------------------------- main --------------------------------------

if __name__ == "__main__":
    key = jax.random.PRNGKey(0)
    k_params, k_x = jax.random.split(key)

    params = init_params(k_params)
    prep = prepare_params(params)
    x = jax.random.uniform(k_x, (1, 1, 80, 80), jnp.float32)   # NCHW, like PyTorch

    probs = jax.block_until_ready(pg_model_forward(prep, x))
    ref = jax.block_until_ready(pg_model_reference(params, x))

    assert probs.shape == (1, 6)
    assert bool(jnp.isfinite(probs).all())
    # exact-division softmax -> tight probability-sum tolerance
    assert abs(float(probs.sum()) - 1.0) < 1e-4
    # match the straightforward XLA reference (MXU default-precision noise only)
    assert float(jnp.max(jnp.abs(probs - ref))) < 5e-3
    print("KERNEL_OK")
</pallas_src>

<mosaic_0001>
module attributes {stable_mosaic.version = 11 : i64} {
  func.func @_pg_fused_kernel(%arg0: memref<20x20x64xf32, #tpu.memory_space<vmem>>, %arg1: memref<48x256xf32, #tpu.memory_space<vmem>>, %arg2: memref<2192x128xf32, #tpu.memory_space<any>>, %arg3: memref<1x6xf32, #tpu.memory_space<vmem>>, %arg4: memref<256x64xf32, #tpu.memory_space<vmem>>, %arg5: memref<8x2048xf32, #tpu.memory_space<vmem>>, %arg6: memref<2192x128xf32, #tpu.memory_space<vmem>>, %arg7: memref<!tpu.dma_semaphore, #tpu.memory_space<semaphore_mem>>) attributes {dimension_semantics = [], scalar_prefetch = 0 : i64, scratch_operands = 4 : i64, tpu.core_type = #tpu.core_type<tc>} {
    tpu.enqueue_dma source(%arg2 : memref<2192x128xf32, #tpu.memory_space<any>>) target(%arg6 : memref<2192x128xf32, #tpu.memory_space<vmem>>) target_semaphore(%arg7 : memref<!tpu.dma_semaphore, #tpu.memory_space<semaphore_mem>>)
    %c32 = arith.constant 32 : index
    %c0 = arith.constant 0 : index
    %0 = vector.load %arg1[%c32, %c0] : memref<48x256xf32, #tpu.memory_space<vmem>>, vector<16x64xf32>
    %c32_0 = arith.constant 32 : index
    %c64 = arith.constant 64 : index
    %1 = vector.load %arg1[%c32_0, %c64] : memref<48x256xf32, #tpu.memory_space<vmem>>, vector<16x1xf32>
    %c0_1 = arith.constant 0 : index
    %c0_2 = arith.constant 0 : index
    %2 = vector.load %arg1[%c0_1, %c0_2] : memref<48x256xf32, #tpu.memory_space<vmem>>, vector<16x256xf32>
    %c16 = arith.constant 16 : index
    %c0_3 = arith.constant 0 : index
    %3 = vector.load %arg1[%c16, %c0_3] : memref<48x256xf32, #tpu.memory_space<vmem>>, vector<16x256xf32>
    %c32_4 = arith.constant 32 : index
    %c65 = arith.constant 65 : index
    %4 = vector.load %arg1[%c32_4, %c65] : memref<48x256xf32, #tpu.memory_space<vmem>>, vector<16x1xf32>
    %c32_5 = arith.constant 32 : index
    %c66 = arith.constant 66 : index
    %5 = vector.load %arg1[%c32_5, %c66] : memref<48x256xf32, #tpu.memory_space<vmem>>, vector<16x1xf32>
    %c0_6 = arith.constant 0 : index
    %c0_7 = arith.constant 0 : index
    %c0_8 = arith.constant 0 : index
    %6 = vector.load %arg0[%c0_6, %c0_7, %c0_8] : memref<20x20x64xf32, #tpu.memory_space<vmem>>, vector<1x8x64xf32>
    %7 = vector.shape_cast %6 : vector<1x8x64xf32> to vector<8x64xf32>
    %c1 = arith.constant 1 : index
    %c0_9 = arith.constant 0 : index
    %c0_10 = arith.constant 0 : index
    %8 = vector.load %arg0[%c1, %c0_9, %c0_10] : memref<20x20x64xf32, #tpu.memory_space<vmem>>, vector<1x8x64xf32>
    %9 = vector.shape_cast %8 : vector<1x8x64xf32> to vector<8x64xf32>
    %c2 = arith.constant 2 : index
    %c0_11 = arith.constant 0 : index
    %c0_12 = arith.constant 0 : index
    %10 = vector.load %arg0[%c2, %c0_11, %c0_12] : memref<20x20x64xf32, #tpu.memory_space<vmem>>, vector<1x8x64xf32>
    %11 = vector.shape_cast %10 : vector<1x8x64xf32> to vector<8x64xf32>
    %c3 = arith.constant 3 : index
    %c0_13 = arith.constant 0 : index
    %c0_14 = arith.constant 0 : index
    %12 = vector.load %arg0[%c3, %c0_13, %c0_14] : memref<20x20x64xf32, #tpu.memory_space<vmem>>, vector<1x8x64xf32>
    %13 = vector.shape_cast %12 : vector<1x8x64xf32> to vector<8x64xf32>
    %c4 = arith.constant 4 : index
    %c0_15 = arith.constant 0 : index
    %c0_16 = arith.constant 0 : index
    %14 = vector.load %arg0[%c4, %c0_15, %c0_16] : memref<20x20x64xf32, #tpu.memory_space<vmem>>, vector<1x8x64xf32>
    %15 = vector.shape_cast %14 : vector<1x8x64xf32> to vector<8x64xf32>
    %c5 = arith.constant 5 : index
    %c0_17 = arith.constant 0 : index
    %c0_18 = arith.constant 0 : index
    %16 = vector.load %arg0[%c5, %c0_17, %c0_18] : memref<20x20x64xf32, #tpu.memory_space<vmem>>, vector<1x8x64xf32>
    %17 = vector.shape_cast %16 : vector<1x8x64xf32> to vector<8x64xf32>
    %c6 = arith.constant 6 : index
    %c0_19 = arith.constant 0 : index
    %c0_20 = arith.constant 0 : index
    %18 = vector.load %arg0[%c6, %c0_19, %c0_20] : memref<20x20x64xf32, #tpu.memory_space<vmem>>, vector<1x8x64xf32>
    %19 = vector.shape_cast %18 : vector<1x8x64xf32> to vector<8x64xf32>
    %c7 = arith.constant 7 : index
    %c0_21 = arith.constant 0 : index
    %c0_22 = arith.constant 0 : index
    %20 = vector.load %arg0[%c7, %c0_21, %c0_22] : memref<20x20x64xf32, #tpu.memory_space<vmem>>, vector<1x8x64xf32>
    %21 = vector.shape_cast %20 : vector<1x8x64xf32> to vector<8x64xf32>
    %22 = tpu.concatenate %7, %9, %11, %13, %15, %17, %19, %21 in 0 : vector<8x64xf32>, vector<8x64xf32>, vector<8x64xf32>, vector<8x64xf32>, vector<8x64xf32>, vector<8x64xf32>, vector<8x64xf32>, vector<8x64xf32> -> vector<64x64xf32>
    %cst = arith.constant dense<0.000000e+00> : vector<16x64xf32>
    %23 = tpu.matmul %0, %22, %cst {dimension_numbers = #tpu.dot_dimension_numbers<[1], [0], [0], [1], [0, 0, 1, 1], [], []>} : vector<16x64xf32>, vector<64x64xf32>, vector<16x64xf32> -> vector<16x64xf32>
    %24 = vector.broadcast %1 : vector<16x1xf32> to vector<16x64xf32>
    %25 = arith.addf %23, %24 : vector<16x64xf32>
    %cst_23 = arith.constant 0.000000e+00 : f32
    %26 = vector.broadcast %cst_23 : f32 to vector<16x64xf32>
    %27 = arith.maximumf %25, %26 : vector<16x64xf32>
    %c0_24 = arith.constant 0 : index
    %c0_25 = arith.constant 0 : index
    %28 = vector.load %arg4[%c0_24, %c0_25] : memref<256x64xf32, #tpu.memory_space<vmem>>, vector<16x64xf32>
    tpu.vector_store %arg4[%c0_24, %c0_25], %27 {strides = array<i32>} : memref<256x64xf32, #tpu.memory_space<vmem>>, vector<16x64xf32>,
    %c0_26 = arith.constant 0 : index
    %c4_27 = arith.constant 4 : index
    %c0_28 = arith.constant 0 : index
    %29 = vector.load %arg0[%c0_26, %c4_27, %c0_28] : memref<20x20x64xf32, #tpu.memory_space<vmem>>, vector<1x8x64xf32>
    %30 = vector.shape_cast %29 : vector<1x8x64xf32> to vector<8x64xf32>
    %c1_29 = arith.constant 1 : index
    %c4_30 = arith.constant 4 : index
    %c0_31 = arith.constant 0 : index
    %31 = vector.load %arg0[%c1_29, %c4_30, %c0_31] : memref<20x20x64xf32, #tpu.memory_space<vmem>>, vector<1x8x64xf32>
    %32 = vector.shape_cast %31 : vector<1x8x64xf32> to vector<8x64xf32>
    %c2_32 = arith.constant 2 : index
    %c4_33 = arith.constant 4 : index
    %c0_34 = arith.constant 0 : index
    %33 = vector.load %arg0[%c2_32, %c4_33, %c0_34] : memref<20x20x64xf32, #tpu.memory_space<vmem>>, vector<1x8x64xf32>
    %34 = vector.shape_cast %33 : vector<1x8x64xf32> to vector<8x64xf32>
    %c3_35 = arith.constant 3 : index
    %c4_36 = arith.constant 4 : index
    %c0_37 = arith.constant 0 : index
    %35 = vector.load %arg0[%c3_35, %c4_36, %c0_37] : memref<20x20x64xf32, #tpu.memory_space<vmem>>, vector<1x8x64xf32>
    %36 = vector.shape_cast %35 : vector<1x8x64xf32> to vector<8x64xf32>
    %c4_38 = arith.constant 4 : index
    %c4_39 = arith.constant 4 : index
    %c0_40 = arith.constant 0 : index
    %37 = vector.load %arg0[%c4_38, %c4_39, %c0_40] : memref<20x20x64xf32, #tpu.memory_space<vmem>>, vector<1x8x64xf32>
    %38 = vector.shape_cast %37 : vector<1x8x64xf32> to vector<8x64xf32>
    %c5_41 = arith.constant 5 : index
    %c4_42 = arith.constant 4 : index
    %c0_43 = arith.constant 0 : index
    %39 = vector.load %arg0[%c5_41, %c4_42, %c0_43] : memref<20x20x64xf32, #tpu.memory_space<vmem>>, vector<1x8x64xf32>
    %40 = vector.shape_cast %39 : vector<1x8x64xf32> to vector<8x64xf32>
    %c6_44 = arith.constant 6 : index
    %c4_45 = arith.constant 4 : index
    %c0_46 = arith.constant 0 : index
    %41 = vector.load %arg0[%c6_44, %c4_45, %c0_46] : memref<20x20x64xf32, #tpu.memory_space<vmem>>, vector<1x8x64xf32>
    %42 = vector.shape_cast %41 : vector<1x8x64xf32> to vector<8x64xf32>
    %c7_47 = arith.constant 7 : index
    %c4_48 = arith.constant 4 : index
    %c0_49 = arith.constant 0 : index
    %43 = vector.load %arg0[%c7_47, %c4_48, %c0_49] : memref<20x20x64xf32, #tpu.memory_space<vmem>>, vector<1x8x64xf32>
    %44 = vector.shape_cast %43 : vector<1x8x64xf32> to vector<8x64xf32>
    %45 = tpu.concatenate %30, %32, %34, %36, %38, %40, %42, %44 in 0 : vector<8x64xf32>, vector<8x64xf32>, vector<8x64xf32>, vector<8x64xf32>, vector<8x64xf32>, vector<8x64xf32>, vector<8x64xf32>, vector<8x64xf32> -> vector<64x64xf32>
    %cst_50 = arith.constant dense<0.000000e+00> : vector<16x64xf32>
    %46 = tpu.matmul %0, %45, %cst_50 {dimension_numbers = #tpu.dot_dimension_numbers<[1], [0], [0], [1], [0, 0, 1, 1], [], []>} : vector<16x64xf32>, vector<64x64xf32>, vector<16x64xf32> -> vector<16x64xf32>
    %47 = vector.broadcast %1 : vector<16x1xf32> to vector<16x64xf32>
    %48 = arith.addf %46, %47 : vector<16x64xf32>
    %cst_51 = arith.constant 0.000000e+00 : f32
    %49 = vector.broadcast %cst_51 : f32 to vector<16x64xf32>
    %50 = arith.maximumf %48, %49 : vector<16x64xf32>
    %c16_52 = arith.constant 16 : index
    %c0_53 = arith.constant 0 : index
    %51 = vector.load %arg4[%c16_52, %c0_53] : memref<256x64xf32, #tpu.memory_space<vmem>>, vector<16x64xf32>
    tpu.vector_store %arg4[%c16_52, %c0_53], %50 {strides = array<i32>} : memref<256x64xf32, #tpu.memory_space<vmem>>, vector<16x64xf32>,
    %c0_54 = arith.constant 0 : index
    %c8 = arith.constant 8 : index
    %c0_55 = arith.constant 0 : index
    %52 = vector.load %arg0[%c0_54, %c8, %c0_55] : memref<20x20x64xf32, #tpu.memory_space<vmem>>, vector<1x8x64xf32>
    %53 = vector.shape_cast %52 : vector<1x8x64xf32> to vector<8x64xf32>
    %c1_56 = arith.constant 1 : index
    %c8_57 = arith.constant 8 : index
    %c0_58 = arith.constant 0 : index
    %54 = vector.load %arg0[%c1_56, %c8_57, %c0_58] : memref<20x20x64xf32, #tpu.memory_space<vmem>>, vector<1x8x64xf32>
    %55 = vector.shape_cast %54 : vector<1x8x64xf32> to vector<8x64xf32>
    %c2_59 = arith.constant 2 : index
    %c8_60 = arith.constant 8 : index
    %c0_61 = arith.constant 0 : index
    %56 = vector.load %arg0[%c2_59, %c8_60, %c0_61] : memref<20x20x64xf32, #tpu.memory_space<vmem>>, vector<1x8x64xf32>
    %57 = vector.shape_cast %56 : vector<1x8x64xf32> to vector<8x64xf32>
    %c3_62 = arith.constant 3 : index
    %c8_63 = arith.constant 8 : index
    %c0_64 = arith.constant 0 : index
    %58 = vector.load %arg0[%c3_62, %c8_63, %c0_64] : memref<20x20x64xf32, #tpu.memory_space<vmem>>, vector<1x8x64xf32>
    %59 = vector.shape_cast %58 : vector<1x8x64xf32> to vector<8x64xf32>
    %c4_65 = arith.constant 4 : index
    %c8_66 = arith.constant 8 : index
    %c0_67 = arith.constant 0 : index
    %60 = vector.load %arg0[%c4_65, %c8_66, %c0_67] : memref<20x20x64xf32, #tpu.memory_space<vmem>>, vector<1x8x64xf32>
    %61 = vector.shape_cast %60 : vector<1x8x64xf32> to vector<8x64xf32>
    %c5_68 = arith.constant 5 : index
    %c8_69 = arith.constant 8 : index
    %c0_70 = arith.constant 0 : index
    %62 = vector.load %arg0[%c5_68, %c8_69, %c0_70] : memref<20x20x64xf32, #tpu.memory_space<vmem>>, vector<1x8x64xf32>
    %63 = vector.shape_cast %62 : vector<1x8x64xf32> to vector<8x64xf32>
    %c6_71 = arith.constant 6 : index
    %c8_72 = arith.constant 8 : index
    %c0_73 = arith.constant 0 : index
    %64 = vector.load %arg0[%c6_71, %c8_72, %c0_73] : memref<20x20x64xf32, #tpu.memory_space<vmem>>, vector<1x8x64xf32>
    %65 = vector.shape_cast %64 : vector<1x8x64xf32> to vector<8x64xf32>
    %c7_74 = arith.constant 7 : index
    %c8_75 = arith.constant 8 : index
    %c0_76 = arith.constant 0 : index
    %66 = vector.load %arg0[%c7_74, %c8_75, %c0_76] : memref<20x20x64xf32, #tpu.memory_space<vmem>>, vector<1x8x64xf32>
    %67 = vector.shape_cast %66 : vector<1x8x64xf32> to vector<8x64xf32>
    %68 = tpu.concatenate %53, %55, %57, %59, %61, %63, %65, %67 in 0 : vector<8x64xf32>, vector<8x64xf32>, vector<8x64xf32>, vector<8x64xf32>, vector<8x64xf32>, vector<8x64xf32>, vector<8x64xf32>, vector<8x64xf32> -> vector<64x64xf32>
    %cst_77 = arith.constant dense<0.000000e+00> : vector<16x64xf32>
    %69 = tpu.matmul %0, %68, %cst_77 {dimension_numbers = #tpu.dot_dimension_numbers<[1], [0], [0], [1], [0, 0, 1, 1], [], []>} : vector<16x64xf32>, vector<64x64xf32>, vector<16x64xf32> -> vector<16x64xf32>
    %70 = vector.broadcast %1 : vector<16x1xf32> to vector<16x64xf32>
    %71 = arith.addf %69, %70 : vector<16x64xf32>
    %cst_78 = arith.constant 0.000000e+00 : f32
    %72 = vector.broadcast %cst_78 : f32 to vector<16x64xf32>
    %73 = arith.maximumf %71, %72 : vector<16x64xf32>
    %c32_79 = arith.constant 32 : index
    %c0_80 = arith.constant 0 : index
    %74 = vector.load %arg4[%c32_79, %c0_80] : memref<256x64xf32, #tpu.memory_space<vmem>>, vector<16x64xf32>
    tpu.vector_store %arg4[%c32_79, %c0_80], %73 {strides = array<i32>} : memref<256x64xf32, #tpu.memory_space<vmem>>, vector<16x64xf32>,
    %c0_81 = arith.constant 0 : index
    %c12 = arith.constant 12 : index
    %c0_82 = arith.constant 0 : index
    %75 = vector.load %arg0[%c0_81, %c12, %c0_82] : memref<20x20x64xf32, #tpu.memory_space<vmem>>, vector<1x8x64xf32>
    %76 = vector.shape_cast %75 : vector<1x8x64xf32> to vector<8x64xf32>
    %c1_83 = arith.constant 1 : index
    %c12_84 = arith.constant 12 : index
    %c0_85 = arith.constant 0 : index
    %77 = vector.load %arg0[%c1_83, %c12_84, %c0_85] : memref<20x20x64xf32, #tpu.memory_space<vmem>>, vector<1x8x64xf32>
    %78 = vector.shape_cast %77 : vector<1x8x64xf32> to vector<8x64xf32>
    %c2_86 = arith.constant 2 : index
    %c12_87 = arith.constant 12 : index
    %c0_88 = arith.constant 0 : index
    %79 = vector.load %arg0[%c2_86, %c12_87, %c0_88] : memref<20x20x64xf32, #tpu.memory_space<vmem>>, vector<1x8x64xf32>
    %80 = vector.shape_cast %79 : vector<1x8x64xf32> to vector<8x64xf32>
    %c3_89 = arith.constant 3 : index
    %c12_90 = arith.constant 12 : index
    %c0_91 = arith.constant 0 : index
    %81 = vector.load %arg0[%c3_89, %c12_90, %c0_91] : memref<20x20x64xf32, #tpu.memory_space<vmem>>, vector<1x8x64xf32>
    %82 = vector.shape_cast %81 : vector<1x8x64xf32> to vector<8x64xf32>
    %c4_92 = arith.constant 4 : index
    %c12_93 = arith.constant 12 : index
    %c0_94 = arith.constant 0 : index
    %83 = vector.load %arg0[%c4_92, %c12_93, %c0_94] : memref<20x20x64xf32, #tpu.memory_space<vmem>>, vector<1x8x64xf32>
    %84 = vector.shape_cast %83 : vector<1x8x64xf32> to vector<8x64xf32>
    %c5_95 = arith.constant 5 : index
    %c12_96 = arith.constant 12 : index
    %c0_97 = arith.constant 0 : index
    %85 = vector.load %arg0[%c5_95, %c12_96, %c0_97] : memref<20x20x64xf32, #tpu.memory_space<vmem>>, vector<1x8x64xf32>
    %86 = vector.shape_cast %85 : vector<1x8x64xf32> to vector<8x64xf32>
    %c6_98 = arith.constant 6 : index
    %c12_99 = arith.constant 12 : index
    %c0_100 = arith.constant 0 : index
    %87 = vector.load %arg0[%c6_98, %c12_99, %c0_100] : memref<20x20x64xf32, #tpu.memory_space<vmem>>, vector<1x8x64xf32>
    %88 = vector.shape_cast %87 : vector<1x8x64xf32> to vector<8x64xf32>
    %c7_101 = arith.constant 7 : index
    %c12_102 = arith.constant 12 : index
    %c0_103 = arith.constant 0 : index
    %89 = vector.load %arg0[%c7_101, %c12_102, %c0_103] : memref<20x20x64xf32, #tpu.memory_space<vmem>>, vector<1x8x64xf32>
    %90 = vector.shape_cast %89 : vector<1x8x64xf32> to vector<8x64xf32>
    %91 = tpu.concatenate %76, %78, %80, %82, %84, %86, %88, %90 in 0 : vector<8x64xf32>, vector<8x64xf32>, vector<8x64xf32>, vector<8x64xf32>, vector<8x64xf32>, vector<8x64xf32>, vector<8x64xf32>, vector<8x64xf32> -> vector<64x64xf32>
    %cst_104 = arith.constant dense<0.000000e+00> : vector<16x64xf32>
    %92 = tpu.matmul %0, %91, %cst_104 {dimension_numbers = #tpu.dot_dimension_numbers<[1], [0], [0], [1], [0, 0, 1, 1], [], []>} : vector<16x64xf32>, vector<64x64xf32>, vector<16x64xf32> -> vector<16x64xf32>
    %93 = vector.broadcast %1 : vector<16x1xf32> to vector<16x64xf32>
    %94 = arith.addf %92, %93 : vector<16x64xf32>
    %cst_105 = arith.constant 0.000000e+00 : f32
    %95 = vector.broadcast %cst_105 : f32 to vector<16x64xf32>
    %96 = arith.maximumf %94, %95 : vector<16x64xf32>
    %c48 = arith.constant 48 : index
    %c0_106 = arith.constant 0 : index
    %97 = vector.load %arg4[%c48, %c0_106] : memref<256x64xf32, #tpu.memory_space<vmem>>, vector<16x64xf32>
    tpu.vector_store %arg4[%c48, %c0_106], %96 {strides = array<i32>} : memref<256x64xf32, #tpu.memory_space<vmem>>, vector<16x64xf32>,
    %c4_107 = arith.constant 4 : index
    %c0_108 = arith.constant 0 : index
    %c0_109 = arith.constant 0 : index
    %98 = vector.load %arg0[%c4_107, %c0_108, %c0_109] : memref<20x20x64xf32, #tpu.memory_space<vmem>>, vector<1x8x64xf32>
    %99 = vector.shape_cast %98 : vector<1x8x64xf32> to vector<8x64xf32>
    %c5_110 = arith.constant 5 : index
    %c0_111 = arith.constant 0 : index
    %c0_112 = arith.constant 0 : index
    %100 = vector.load %arg0[%c5_110, %c0_111, %c0_112] : memref<20x20x64xf32, #tpu.memory_space<vmem>>, vector<1x8x64xf32>
    %101 = vector.shape_cast %100 : vector<1x8x64xf32> to vector<8x64xf32>
    %c6_113 = arith.constant 6 : index
    %c0_114 = arith.constant 0 : index
    %c0_115 = arith.constant 0 : index
    %102 = vector.load %arg0[%c6_113, %c0_114, %c0_115] : memref<20x20x64xf32, #tpu.memory_space<vmem>>, vector<1x8x64xf32>
    %103 = vector.shape_cast %102 : vector<1x8x64xf32> to vector<8x64xf32>
    %c7_116 = arith.constant 7 : index
    %c0_117 = arith.constant 0 : index
    %c0_118 = arith.constant 0 : index
    %104 = vector.load %arg0[%c7_116, %c0_117, %c0_118] : memref<20x20x64xf32, #tpu.memory_space<vmem>>, vector<1x8x64xf32>
    %105 = vector.shape_cast %104 : vector<1x8x64xf32> to vector<8x64xf32>
    %c8_119 = arith.constant 8 : index
    %c0_120 = arith.constant 0 : index
    %c0_121 = arith.constant 0 : index
    %106 = vector.load %arg0[%c8_119, %c0_120, %c0_121] : memref<20x20x64xf32, #tpu.memory_space<vmem>>, vector<1x8x64xf32>
    %107 = vector.shape_cast %106 : vector<1x8x64xf32> to vector<8x64xf32>
    %c9 = arith.constant 9 : index
    %c0_122 = arith.constant 0 : index
    %c0_123 = arith.constant 0 : index
    %108 = vector.load %arg0[%c9, %c0_122, %c0_123] : memref<20x20x64xf32, #tpu.memory_space<vmem>>, vector<1x8x64xf32>
    %109 = vector.shape_cast %108 : vector<1x8x64xf32> to vector<8x64xf32>
    %c10 = arith.constant 10 : index
    %c0_124 = arith.constant 0 : index
    %c0_125 = arith.constant 0 : index
    %110 = vector.load %arg0[%c10, %c0_124, %c0_125] : memref<20x20x64xf32, #tpu.memory_space<vmem>>, vector<1x8x64xf32>
    %111 = vector.shape_cast %110 : vector<1x8x64xf32> to vector<8x64xf32>
    %c11 = arith.constant 11 : index
    %c0_126 = arith.constant 0 : index
    %c0_127 = arith.constant 0 : index
    %112 = vector.load %arg0[%c11, %c0_126, %c0_127] : memref<20x20x64xf32, #tpu.memory_space<vmem>>, vector<1x8x64xf32>
    %113 = vector.shape_cast %112 : vector<1x8x64xf32> to vector<8x64xf32>
    %114 = tpu.concatenate %99, %101, %103, %105, %107, %109, %111, %113 in 0 : vector<8x64xf32>, vector<8x64xf32>, vector<8x64xf32>, vector<8x64xf32>, vector<8x64xf32>, vector<8x64xf32>, vector<8x64xf32>, vector<8x64xf32> -> vector<64x64xf32>
    %cst_128 = arith.constant dense<0.000000e+00> : vector<16x64xf32>
    %115 = tpu.matmul %0, %114, %cst_128 {dimension_numbers = #tpu.dot_dimension_numbers<[1], [0], [0], [1], [0, 0, 1, 1], [], []>} : vector<16x64xf32>, vector<64x64xf32>, vector<16x64xf32> -> vector<16x64xf32>
    %116 = vector.broadcast %1 : vector<16x1xf32> to vector<16x64xf32>
    %117 = arith.addf %115, %116 : vector<16x64xf32>
    %cst_129 = arith.constant 0.000000e+00 : f32
    %118 = vector.broadcast %cst_129 : f32 to vector<16x64xf32>
    %119 = arith.maximumf %117, %118 : vector<16x64xf32>
    %c64_130 = arith.constant 64 : index
    %c0_131 = arith.constant 0 : index
    %120 = vector.load %arg4[%c64_130, %c0_131] : memref<256x64xf32, #tpu.memory_space<vmem>>, vector<16x64xf32>
    tpu.vector_store %arg4[%c64_130, %c0_131], %119 {strides = array<i32>} : memref<256x64xf32, #tpu.memory_space<vmem>>, vector<16x64xf32>,
    %c4_132 = arith.constant 4 : index
    %c4_133 = arith.constant 4 : index
    %c0_134 = arith.constant 0 : index
    %121 = vector.load %arg0[%c4_132, %c4_133, %c0_134] : memref<20x20x64xf32, #tpu.memory_space<vmem>>, vector<1x8x64xf32>
    %122 = vector.shape_cast %121 : vector<1x8x64xf32> to vector<8x64xf32>
    %c5_135 = arith.constant 5 : index
    %c4_136 = arith.constant 4 : index
    %c0_137 = arith.constant 0 : index
    %123 = vector.load %arg0[%c5_135, %c4_136, %c0_137] : memref<20x20x64xf32, #tpu.memory_space<vmem>>, vector<1x8x64xf32>
    %124 = vector.shape_cast %123 : vector<1x8x64xf32> to vector<8x64xf32>
    %c6_138 = arith.constant 6 : index
    %c4_139 = arith.constant 4 : index
    %c0_140 = arith.constant 0 : index
    %125 = vector.load %arg0[%c6_138, %c4_139, %c0_140] : memref<20x20x64xf32, #tpu.memory_space<vmem>>, vector<1x8x64xf32>
    %126 = vector.shape_cast %125 : vector<1x8x64xf32> to vector<8x64xf32>
    %c7_141 = arith.constant 7 : index
    %c4_142 = arith.constant 4 : index
    %c0_143 = arith.constant 0 : index
    %127 = vector.load %arg0[%c7_141, %c4_142, %c0_143] : memref<20x20x64xf32, #tpu.memory_space<vmem>>, vector<1x8x64xf32>
    %128 = vector.shape_cast %127 : vector<1x8x64xf32> to vector<8x64xf32>
    %c8_144 = arith.constant 8 : index
    %c4_145 = arith.constant 4 : index
    %c0_146 = arith.constant 0 : index
    %129 = vector.load %arg0[%c8_144, %c4_145, %c0_146] : memref<20x20x64xf32, #tpu.memory_space<vmem>>, vector<1x8x64xf32>
    %130 = vector.shape_cast %129 : vector<1x8x64xf32> to vector<8x64xf32>
    %c9_147 = arith.constant 9 : index
    %c4_148 = arith.constant 4 : index
    %c0_149 = arith.constant 0 : index
    %131 = vector.load %arg0[%c9_147, %c4_148, %c0_149] : memref<20x20x64xf32, #tpu.memory_space<vmem>>, vector<1x8x64xf32>
    %132 = vector.shape_cast %131 : vector<1x8x64xf32> to vector<8x64xf32>
    %c10_150 = arith.constant 10 : index
    %c4_151 = arith.constant 4 : index
    %c0_152 = arith.constant 0 : index
    %133 = vector.load %arg0[%c10_150, %c4_151, %c0_152] : memref<20x20x64xf32, #tpu.memory_space<vmem>>, vector<1x8x64xf32>
    %134 = vector.shape_cast %133 : vector<1x8x64xf32> to vector<8x64xf32>
    %c11_153 = arith.constant 11 : index
    %c4_154 = arith.constant 4 : index
    %c0_155 = arith.constant 0 : index
    %135 = vector.load %arg0[%c11_153, %c4_154, %c0_155] : memref<20x20x64xf32, #tpu.memory_space<vmem>>, vector<1x8x64xf32>
    %136 = vector.shape_cast %135 : vector<1x8x64xf32> to vector<8x64xf32>
    %137 = tpu.concatenate %122, %124, %126, %128, %130, %132, %134, %136 in 0 : vector<8x64xf32>, vector<8x64xf32>, vector<8x64xf32>, vector<8x64xf32>, vector<8x64xf32>, vector<8x64xf32>, vector<8x64xf32>, vector<8x64xf32> -> vector<64x64xf32>
    %cst_156 = arith.constant dense<0.000000e+00> : vector<16x64xf32>
    %138 = tpu.matmul %0, %137, %cst_156 {dimension_numbers = #tpu.dot_dimension_numbers<[1], [0], [0], [1], [0, 0, 1, 1], [], []>} : vector<16x64xf32>, vector<64x64xf32>, vector<16x64xf32> -> vector<16x64xf32>
    %139 = vector.broadcast %1 : vector<16x1xf32> to vector<16x64xf32>
    %140 = arith.addf %138, %139 : vector<16x64xf32>
    %cst_157 = arith.constant 0.000000e+00 : f32
    %141 = vector.broadcast %cst_157 : f32 to vector<16x64xf32>
    %142 = arith.maximumf %140, %141 : vector<16x64xf32>
    %c80 = arith.constant 80 : index
    %c0_158 = arith.constant 0 : index
    %143 = vector.load %arg4[%c80, %c0_158] : memref<256x64xf32, #tpu.memory_space<vmem>>, vector<16x64xf32>
    tpu.vector_store %arg4[%c80, %c0_158], %142 {strides = array<i32>} : memref<256x64xf32, #tpu.memory_space<vmem>>, vector<16x64xf32>,
    %c4_159 = arith.constant 4 : index
    %c8_160 = arith.constant 8 : index
    %c0_161 = arith.constant 0 : index
    %144 = vector.load %arg0[%c4_159, %c8_160, %c0_161] : memref<20x20x64xf32, #tpu.memory_space<vmem>>, vector<1x8x64xf32>
    %145 = vector.shape_cast %144 : vector<1x8x64xf32> to vector<8x64xf32>
    %c5_162 = arith.constant 5 : index
    %c8_163 = arith.constant 8 : index
    %c0_164 = arith.constant 0 : index
    %146 = vector.load %arg0[%c5_162, %c8_163, %c0_164] : memref<20x20x64xf32, #tpu.memory_space<vmem>>, vector<1x8x64xf32>
    %147 = vector.shape_cast %146 : vector<1x8x64xf32> to vector<8x64xf32>
    %c6_165 = arith.constant 6 : index
    %c8_166 = arith.constant 8 : index
    %c0_167 = arith.constant 0 : index
    %148 = vector.load %arg0[%c6_165, %c8_166, %c0_167] : memref<20x20x64xf32, #tpu.memory_space<vmem>>, vector<1x8x64xf32>
    %149 = vector.shape_cast %148 : vector<1x8x64xf32> to vector<8x64xf32>
    %c7_168 = arith.constant 7 : index
    %c8_169 = arith.constant 8 : index
    %c0_170 = arith.constant 0 : index
    %150 = vector.load %arg0[%c7_168, %c8_169, %c0_170] : memref<20x20x64xf32, #tpu.memory_space<vmem>>, vector<1x8x64xf32>
    %151 = vector.shape_cast %150 : vector<1x8x64xf32> to vector<8x64xf32>
    %c8_171 = arith.constant 8 : index
    %c8_172 = arith.constant 8 : index
    %c0_173 = arith.constant 0 : index
    %152 = vector.load %arg0[%c8_171, %c8_172, %c0_173] : memref<20x20x64xf32, #tpu.memory_space<vmem>>, vector<1x8x64xf32>
    %153 = vector.shape_cast %152 : vector<1x8x64xf32> to vector<8x64xf32>
    %c9_174 = arith.constant 9 : index
    %c8_175 = arith.constant 8 : index
    %c0_176 = arith.constant 0 : index
    %154 = vector.load %arg0[%c9_174, %c8_175, %c0_176] : memref<20x20x64xf32, #tpu.memory_space<vmem>>, vector<1x8x64xf32>
    %155 = vector.shape_cast %154 : vector<1x8x64xf32> to vector<8x64xf32>
    %c10_177 = arith.constant 10 : index
    %c8_178 = arith.constant 8 : index
    %c0_179 = arith.constant 0 : index
    %156 = vector.load %arg0[%c10_177, %c8_178, %c0_179] : memref<20x20x64xf32, #tpu.memory_space<vmem>>, vector<1x8x64xf32>
    %157 = vector.shape_cast %156 : vector<1x8x64xf32> to vector<8x64xf32>
    %c11_180 = arith.constant 11 : index
    %c8_181 = arith.constant 8 : index
    %c0_182 = arith.constant 0 : index
    %158 = vector.load %arg0[%c11_180, %c8_181, %c0_182] : memref<20x20x64xf32, #tpu.memory_space<vmem>>, vector<1x8x64xf32>
    %159 = vector.shape_cast %158 : vector<1x8x64xf32> to vector<8x64xf32>
    %160 = tpu.concatenate %145, %147, %149, %151, %153, %155, %157, %159 in 0 : vector<8x64xf32>, vector<8x64xf32>, vector<8x64xf32>, vector<8x64xf32>, vector<8x64xf32>, vector<8x64xf32>, vector<8x64xf32>, vector<8x64xf32> -> vector<64x64xf32>
    %cst_183 = arith.constant dense<0.000000e+00> : vector<16x64xf32>
    %161 = tpu.matmul %0, %160, %cst_183 {dimension_numbers = #tpu.dot_dimension_numbers<[1], [0], [0], [1], [0, 0, 1, 1], [], []>} : vector<16x64xf32>, vector<64x64xf32>, vector<16x64xf32> -> vector<16x64xf32>
    %162 = vector.broadcast %1 : vector<16x1xf32> to vector<16x64xf32>
    %163 = arith.addf %161, %162 : vector<16x64xf32>
    %cst_184 = arith.constant 0.000000e+00 : f32
    %164 = vector.broadcast %cst_184 : f32 to vector<16x64xf32>
    %165 = arith.maximumf %163, %164 : vector<16x64xf32>
    %c96 = arith.constant 96 : index
    %c0_185 = arith.constant 0 : index
    %166 = vector.load %arg4[%c96, %c0_185] : memref<256x64xf32, #tpu.memory_space<vmem>>, vector<16x64xf32>
    tpu.vector_store %arg4[%c96, %c0_185], %165 {strides = array<i32>} : memref<256x64xf32, #tpu.memory_space<vmem>>, vector<16x64xf32>,
    %c4_186 = arith.constant 4 : index
    %c12_187 = arith.constant 12 : index
    %c0_188 = arith.constant 0 : index
    %167 = vector.load %arg0[%c4_186, %c12_187, %c0_188] : memref<20x20x64xf32, #tpu.memory_space<vmem>>, vector<1x8x64xf32>
    %168 = vector.shape_cast %167 : vector<1x8x64xf32> to vector<8x64xf32>
    %c5_189 = arith.constant 5 : index
    %c12_190 = arith.constant 12 : index
    %c0_191 = arith.constant 0 : index
    %169 = vector.load %arg0[%c5_189, %c12_190, %c0_191] : memref<20x20x64xf32, #tpu.memory_space<vmem>>, vector<1x8x64xf32>
    %170 = vector.shape_cast %169 : vector<1x8x64xf32> to vector<8x64xf32>
    %c6_192 = arith.constant 6 : index
    %c12_193 = arith.constant 12 : index
    %c0_194 = arith.constant 0 : index
    %171 = vector.load %arg0[%c6_192, %c12_193, %c0_194] : memref<20x20x64xf32, #tpu.memory_space<vmem>>, vector<1x8x64xf32>
    %172 = vector.shape_cast %171 : vector<1x8x64xf32> to vector<8x64xf32>
    %c7_195 = arith.constant 7 : index
    %c12_196 = arith.constant 12 : index
    %c0_197 = arith.constant 0 : index
    %173 = vector.load %arg0[%c7_195, %c12_196, %c0_197] : memref<20x20x64xf32, #tpu.memory_space<vmem>>, vector<1x8x64xf32>
    %174 = vector.shape_cast %173 : vector<1x8x64xf32> to vector<8x64xf32>
    %c8_198 = arith.constant 8 : index
    %c12_199 = arith.constant 12 : index
    %c0_200 = arith.constant 0 : index
    %175 = vector.load %arg0[%c8_198, %c12_199, %c0_200] : memref<20x20x64xf32, #tpu.memory_space<vmem>>, vector<1x8x64xf32>
    %176 = vector.shape_cast %175 : vector<1x8x64xf32> to vector<8x64xf32>
    %c9_201 = arith.constant 9 : index
    %c12_202 = arith.constant 12 : index
    %c0_203 = arith.constant 0 : index
    %177 = vector.load %arg0[%c9_201, %c12_202, %c0_203] : memref<20x20x64xf32, #tpu.memory_space<vmem>>, vector<1x8x64xf32>
    %178 = vector.shape_cast %177 : vector<1x8x64xf32> to vector<8x64xf32>
    %c10_204 = arith.constant 10 : index
    %c12_205 = arith.constant 12 : index
    %c0_206 = arith.constant 0 : index
    %179 = vector.load %arg0[%c10_204, %c12_205, %c0_206] : memref<20x20x64xf32, #tpu.memory_space<vmem>>, vector<1x8x64xf32>
    %180 = vector.shape_cast %179 : vector<1x8x64xf32> to vector<8x64xf32>
    %c11_207 = arith.constant 11 : index
    %c12_208 = arith.constant 12 : index
    %c0_209 = arith.constant 0 : index
    %181 = vector.load %arg0[%c11_207, %c12_208, %c0_209] : memref<20x20x64xf32, #tpu.memory_space<vmem>>, vector<1x8x64xf32>
    %182 = vector.shape_cast %181 : vector<1x8x64xf32> to vector<8x64xf32>
    %183 = tpu.concatenate %168, %170, %172, %174, %176, %178, %180, %182 in 0 : vector<8x64xf32>, vector<8x64xf32>, vector<8x64xf32>, vector<8x64xf32>, vector<8x64xf32>, vector<8x64xf32>, vector<8x64xf32>, vector<8x64xf32> -> vector<64x64xf32>
    %cst_210 = arith.constant dense<0.000000e+00> : vector<16x64xf32>
    %184 = tpu.matmul %0, %183, %cst_210 {dimension_numbers = #tpu.dot_dimension_numbers<[1], [0], [0], [1], [0, 0, 1, 1], [], []>} : vector<16x64xf32>, vector<64x64xf32>, vector<16x64xf32> -> vector<16x64xf32>
    %185 = vector.broadcast %1 : vector<16x1xf32> to vector<16x64xf32>
    %186 = arith.addf %184, %185 : vector<16x64xf32>
    %cst_211 = arith.constant 0.000000e+00 : f32
    %187 = vector.broadcast %cst_211 : f32 to vector<16x64xf32>
    %188 = arith.maximumf %186, %187 : vector<16x64xf32>
    %c112 = arith.constant 112 : index
    %c0_212 = arith.constant 0 : index
    %189 = vector.load %arg4[%c112, %c0_212] : memref<256x64xf32, #tpu.memory_space<vmem>>, vector<16x64xf32>
    tpu.vector_store %arg4[%c112, %c0_212], %188 {strides = array<i32>} : memref<256x64xf32, #tpu.memory_space<vmem>>, vector<16x64xf32>,
    %c8_213 = arith.constant 8 : index
    %c0_214 = arith.constant 0 : index
    %c0_215 = arith.constant 0 : index
    %190 = vector.load %arg0[%c8_213, %c0_214, %c0_215] : memref<20x20x64xf32, #tpu.memory_space<vmem>>, vector<1x8x64xf32>
    %191 = vector.shape_cast %190 : vector<1x8x64xf32> to vector<8x64xf32>
    %c9_216 = arith.constant 9 : index
    %c0_217 = arith.constant 0 : index
    %c0_218 = arith.constant 0 : index
    %192 = vector.load %arg0[%c9_216, %c0_217, %c0_218] : memref<20x20x64xf32, #tpu.memory_space<vmem>>, vector<1x8x64xf32>
    %193 = vector.shape_cast %192 : vector<1x8x64xf32> to vector<8x64xf32>
    %c10_219 = arith.constant 10 : index
    %c0_220 = arith.constant 0 : index
    %c0_221 = arith.constant 0 : index
    %194 = vector.load %arg0[%c10_219, %c0_220, %c0_221] : memref<20x20x64xf32, #tpu.memory_space<vmem>>, vector<1x8x64xf32>
    %195 = vector.shape_cast %194 : vector<1x8x64xf32> to vector<8x64xf32>
    %c11_222 = arith.constant 11 : index
    %c0_223 = arith.constant 0 : index
    %c0_224 = arith.constant 0 : index
    %196 = vector.load %arg0[%c11_222, %c0_223, %c0_224] : memref<20x20x64xf32, #tpu.memory_space<vmem>>, vector<1x8x64xf32>
    %197 = vector.shape_cast %196 : vector<1x8x64xf32> to vector<8x64xf32>
    %c12_225 = arith.constant 12 : index
    %c0_226 = arith.constant 0 : index
    %c0_227 = arith.constant 0 : index
    %198 = vector.load %arg0[%c12_225, %c0_226, %c0_227] : memref<20x20x64xf32, #tpu.memory_space<vmem>>, vector<1x8x64xf32>
    %199 = vector.shape_cast %198 : vector<1x8x64xf32> to vector<8x64xf32>
    %c13 = arith.constant 13 : index
    %c0_228 = arith.constant 0 : index
    %c0_229 = arith.constant 0 : index
    %200 = vector.load %arg0[%c13, %c0_228, %c0_229] : memref<20x20x64xf32, #tpu.memory_space<vmem>>, vector<1x8x64xf32>
    %201 = vector.shape_cast %200 : vector<1x8x64xf32> to vector<8x64xf32>
    %c14 = arith.constant 14 : index
    %c0_230 = arith.constant 0 : index
    %c0_231 = arith.constant 0 : index
    %202 = vector.load %arg0[%c14, %c0_230, %c0_231] : memref<20x20x64xf32, #tpu.memory_space<vmem>>, vector<1x8x64xf32>
    %203 = vector.shape_cast %202 : vector<1x8x64xf32> to vector<8x64xf32>
    %c15 = arith.constant 15 : index
    %c0_232 = arith.constant 0 : index
    %c0_233 = arith.constant 0 : index
    %204 = vector.load %arg0[%c15, %c0_232, %c0_233] : memref<20x20x64xf32, #tpu.memory_space<vmem>>, vector<1x8x64xf32>
    %205 = vector.shape_cast %204 : vector<1x8x64xf32> to vector<8x64xf32>
    %206 = tpu.concatenate %191, %193, %195, %197, %199, %201, %203, %205 in 0 : vector<8x64xf32>, vector<8x64xf32>, vector<8x64xf32>, vector<8x64xf32>, vector<8x64xf32>, vector<8x64xf32>, vector<8x64xf32>, vector<8x64xf32> -> vector<64x64xf32>
    %cst_234 = arith.constant dense<0.000000e+00> : vector<16x64xf32>
    %207 = tpu.matmul %0, %206, %cst_234 {dimension_numbers = #tpu.dot_dimension_numbers<[1], [0], [0], [1], [0, 0, 1, 1], [], []>} : vector<16x64xf32>, vector<64x64xf32>, vector<16x64xf32> -> vector<16x64xf32>
    %208 = vector.broadcast %1 : vector<16x1xf32> to vector<16x64xf32>
    %209 = arith.addf %207, %208 : vector<16x64xf32>
    %cst_235 = arith.constant 0.000000e+00 : f32
    %210 = vector.broadcast %cst_235 : f32 to vector<16x64xf32>
    %211 = arith.maximumf %209, %210 : vector<16x64xf32>
    %c128 = arith.constant 128 : index
    %c0_236 = arith.constant 0 : index
    %212 = vector.load %arg4[%c128, %c0_236] : memref<256x64xf32, #tpu.memory_space<vmem>>, vector<16x64xf32>
    tpu.vector_store %arg4[%c128, %c0_236], %211 {strides = array<i32>} : memref<256x64xf32, #tpu.memory_space<vmem>>, vector<16x64xf32>,
    %c8_237 = arith.constant 8 : index
    %c4_238 = arith.constant 4 : index
    %c0_239 = arith.constant 0 : index
    %213 = vector.load %arg0[%c8_237, %c4_238, %c0_239] : memref<20x20x64xf32, #tpu.memory_space<vmem>>, vector<1x8x64xf32>
    %214 = vector.shape_cast %213 : vector<1x8x64xf32> to vector<8x64xf32>
    %c9_240 = arith.constant 9 : index
    %c4_241 = arith.constant 4 : index
    %c0_242 = arith.constant 0 : index
    %215 = vector.load %arg0[%c9_240, %c4_241, %c0_242] : memref<20x20x64xf32, #tpu.memory_space<vmem>>, vector<1x8x64xf32>
    %216 = vector.shape_cast %215 : vector<1x8x64xf32> to vector<8x64xf32>
    %c10_243 = arith.constant 10 : index
    %c4_244 = arith.constant 4 : index
    %c0_245 = arith.constant 0 : index
    %217 = vector.load %arg0[%c10_243, %c4_244, %c0_245] : memref<20x20x64xf32, #tpu.memory_space<vmem>>, vector<1x8x64xf32>
    %218 = vector.shape_cast %217 : vector<1x8x64xf32> to vector<8x64xf32>
    %c11_246 = arith.constant 11 : index
    %c4_247 = arith.constant 4 : index
    %c0_248 = arith.constant 0 : index
    %219 = vector.load %arg0[%c11_246, %c4_247, %c0_248] : memref<20x20x64xf32, #tpu.memory_space<vmem>>, vector<1x8x64xf32>
    %220 = vector.shape_cast %219 : vector<1x8x64xf32> to vector<8x64xf32>
    %c12_249 = arith.constant 12 : index
    %c4_250 = arith.constant 4 : index
    %c0_251 = arith.constant 0 : index
    %221 = vector.load %arg0[%c12_249, %c4_250, %c0_251] : memref<20x20x64xf32, #tpu.memory_space<vmem>>, vector<1x8x64xf32>
    %222 = vector.shape_cast %221 : vector<1x8x64xf32> to vector<8x64xf32>
    %c13_252 = arith.constant 13 : index
    %c4_253 = arith.constant 4 : index
    %c0_254 = arith.constant 0 : index
    %223 = vector.load %arg0[%c13_252, %c4_253, %c0_254] : memref<20x20x64xf32, #tpu.memory_space<vmem>>, vector<1x8x64xf32>
    %224 = vector.shape_cast %223 : vector<1x8x64xf32> to vector<8x64xf32>
    %c14_255 = arith.constant 14 : index
    %c4_256 = arith.constant 4 : index
    %c0_257 = arith.constant 0 : index
    %225 = vector.load %arg0[%c14_255, %c4_256, %c0_257] : memref<20x20x64xf32, #tpu.memory_space<vmem>>, vector<1x8x64xf32>
    %226 = vector.shape_cast %225 : vector<1x8x64xf32> to vector<8x64xf32>
    %c15_258 = arith.constant 15 : index
    %c4_259 = arith.constant 4 : index
    %c0_260 = arith.constant 0 : index
    %227 = vector.load %arg0[%c15_258, %c4_259, %c0_260] : memref<20x20x64xf32, #tpu.memory_space<vmem>>, vector<1x8x64xf32>
    %228 = vector.shape_cast %227 : vector<1x8x64xf32> to vector<8x64xf32>
    %229 = tpu.concatenate %214, %216, %218, %220, %222, %224, %226, %228 in 0 : vector<8x64xf32>, vector<8x64xf32>, vector<8x64xf32>, vector<8x64xf32>, vector<8x64xf32>, vector<8x64xf32>, vector<8x64xf32>, vector<8x64xf32> -> vector<64x64xf32>
    %cst_261 = arith.constant dense<0.000000e+00> : vector<16x64xf32>
    %230 = tpu.matmul %0, %229, %cst_261 {dimension_numbers = #tpu.dot_dimension_numbers<[1], [0], [0], [1], [0, 0, 1, 1], [], []>} : vector<16x64xf32>, vector<64x64xf32>, vector<16x64xf32> -> vector<16x64xf32>
    %231 = vector.broadcast %1 : vector<16x1xf32> to vector<16x64xf32>
    %232 = arith.addf %230, %231 : vector<16x64xf32>
    %cst_262 = arith.constant 0.000000e+00 : f32
    %233 = vector.broadcast %cst_262 : f32 to vector<16x64xf32>
    %234 = arith.maximumf %232, %233 : vector<16x64xf32>
    %c144 = arith.constant 144 : index
    %c0_263 = arith.constant 0 : index
    %235 = vector.load %arg4[%c144, %c0_263] : memref<256x64xf32, #tpu.memory_space<vmem>>, vector<16x64xf32>
    tpu.vector_store %arg4[%c144, %c0_263], %234 {strides = array<i32>} : memref<256x64xf32, #tpu.memory_space<vmem>>, vector<16x64xf32>,
    %c8_264 = arith.constant 8 : index
    %c8_265 = arith.constant 8 : index
    %c0_266 = arith.constant 0 : index
    %236 = vector.load %arg0[%c8_264, %c8_265, %c0_266] : memref<20x20x64xf32, #tpu.memory_space<vmem>>, vector<1x8x64xf32>
    %237 = vector.shape_cast %236 : vector<1x8x64xf32> to vector<8x64xf32>
    %c9_267 = arith.constant 9 : index
    %c8_268 = arith.constant 8 : index
    %c0_269 = arith.constant 0 : index
    %238 = vector.load %arg0[%c9_267, %c8_268, %c0_269] : memref<20x20x64xf32, #tpu.memory_space<vmem>>, vector<1x8x64xf32>
    %239 = vector.shape_cast %238 : vector<1x8x64xf32> to vector<8x64xf32>
    %c10_270 = arith.constant 10 : index
    %c8_271 = arith.constant 8 : index
    %c0_272 = arith.constant 0 : index
    %240 = vector.load %arg0[%c10_270, %c8_271, %c0_272] : memref<20x20x64xf32, #tpu.memory_space<vmem>>, vector<1x8x64xf32>
    %241 = vector.shape_cast %240 : vector<1x8x64xf32> to vector<8x64xf32>
    %c11_273 = arith.constant 11 : index
    %c8_274 = arith.constant 8 : index
    %c0_275 = arith.constant 0 : index
    %242 = vector.load %arg0[%c11_273, %c8_274, %c0_275] : memref<20x20x64xf32, #tpu.memory_space<vmem>>, vector<1x8x64xf32>
    %243 = vector.shape_cast %242 : vector<1x8x64xf32> to vector<8x64xf32>
    %c12_276 = arith.constant 12 : index
    %c8_277 = arith.constant 8 : index
    %c0_278 = arith.constant 0 : index
    %244 = vector.load %arg0[%c12_276, %c8_277, %c0_278] : memref<20x20x64xf32, #tpu.memory_space<vmem>>, vector<1x8x64xf32>
    %245 = vector.shape_cast %244 : vector<1x8x64xf32> to vector<8x64xf32>
    %c13_279 = arith.constant 13 : index
    %c8_280 = arith.constant 8 : index
    %c0_281 = arith.constant 0 : index
    %246 = vector.load %arg0[%c13_279, %c8_280, %c0_281] : memref<20x20x64xf32, #tpu.memory_space<vmem>>, vector<1x8x64xf32>
    %247 = vector.shape_cast %246 : vector<1x8x64xf32> to vector<8x64xf32>
    %c14_282 = arith.constant 14 : index
    %c8_283 = arith.constant 8 : index
    %c0_284 = arith.constant 0 : index
    %248 = vector.load %arg0[%c14_282, %c8_283, %c0_284] : memref<20x20x64xf32, #tpu.memory_space<vmem>>, vector<1x8x64xf32>
    %249 = vector.shape_cast %248 : vector<1x8x64xf32> to vector<8x64xf32>
    %c15_285 = arith.constant 15 : index
    %c8_286 = arith.constant 8 : index
    %c0_287 = arith.constant 0 : index
    %250 = vector.load %arg0[%c15_285, %c8_286, %c0_287] : memref<20x20x64xf32, #tpu.memory_space<vmem>>, vector<1x8x64xf32>
    %251 = vector.shape_cast %250 : vector<1x8x64xf32> to vector<8x64xf32>
    %252 = tpu.concatenate %237, %239, %241, %243, %245, %247, %249, %251 in 0 : vector<8x64xf32>, vector<8x64xf32>, vector<8x64xf32>, vector<8x64xf32>, vector<8x64xf32>, vector<8x64xf32>, vector<8x64xf32>, vector<8x64xf32> -> vector<64x64xf32>
    %cst_288 = arith.constant dense<0.000000e+00> : vector<16x64xf32>
    %253 = tpu.matmul %0, %252, %cst_288 {dimension_numbers = #tpu.dot_dimension_numbers<[1], [0], [0], [1], [0, 0, 1, 1], [], []>} : vector<16x64xf32>, vector<64x64xf32>, vector<16x64xf32> -> vector<16x64xf32>
    %254 = vector.broadcast %1 : vector<16x1xf32> to vector<16x64xf32>
    %255 = arith.addf %253, %254 : vector<16x64xf32>
    %cst_289 = arith.constant 0.000000e+00 : f32
    %256 = vector.broadcast %cst_289 : f32 to vector<16x64xf32>
    %257 = arith.maximumf %255, %256 : vector<16x64xf32>
    %c160 = arith.constant 160 : index
    %c0_290 = arith.constant 0 : index
    %258 = vector.load %arg4[%c160, %c0_290] : memref<256x64xf32, #tpu.memory_space<vmem>>, vector<16x64xf32>
    tpu.vector_store %arg4[%c160, %c0_290], %257 {strides = array<i32>} : memref<256x64xf32, #tpu.memory_space<vmem>>, vector<16x64xf32>,
    %c8_291 = arith.constant 8 : index
    %c12_292 = arith.constant 12 : index
    %c0_293 = arith.constant 0 : index
    %259 = vector.load %arg0[%c8_291, %c12_292, %c0_293] : memref<20x20x64xf32, #tpu.memory_space<vmem>>, vector<1x8x64xf32>
    %260 = vector.shape_cast %259 : vector<1x8x64xf32> to vector<8x64xf32>
    %c9_294 = arith.constant 9 : index
    %c12_295 = arith.constant 12 : index
    %c0_296 = arith.constant 0 : index
    %261 = vector.load %arg0[%c9_294, %c12_295, %c0_296] : memref<20x20x64xf32, #tpu.memory_space<vmem>>, vector<1x8x64xf32>
    %262 = vector.shape_cast %261 : vector<1x8x64xf32> to vector<8x64xf32>
    %c10_297 = arith.constant 10 : index
    %c12_298 = arith.constant 12 : index
    %c0_299 = arith.constant 0 : index
    %263 = vector.load %arg0[%c10_297, %c12_298, %c0_299] : memref<20x20x64xf32, #tpu.memory_space<vmem>>, vector<1x8x64xf32>
    %264 = vector.shape_cast %263 : vector<1x8x64xf32> to vector<8x64xf32>
    %c11_300 = arith.constant 11 : index
    %c12_301 = arith.constant 12 : index
    %c0_302 = arith.constant 0 : index
    %265 = vector.load %arg0[%c11_300, %c12_301, %c0_302] : memref<20x20x64xf32, #tpu.memory_space<vmem>>, vector<1x8x64xf32>
    %266 = vector.shape_cast %265 : vector<1x8x64xf32> to vector<8x64xf32>
    %c12_303 = arith.constant 12 : index
    %c12_304 = arith.constant 12 : index
    %c0_305 = arith.constant 0 : index
    %267 = vector.load %arg0[%c12_303, %c12_304, %c0_305] : memref<20x20x64xf32, #tpu.memory_space<vmem>>, vector<1x8x64xf32>
    %268 = vector.shape_cast %267 : vector<1x8x64xf32> to vector<8x64xf32>
    %c13_306 = arith.constant 13 : index
    %c12_307 = arith.constant 12 : index
    %c0_308 = arith.constant 0 : index
    %269 = vector.load %arg0[%c13_306, %c12_307, %c0_308] : memref<20x20x64xf32, #tpu.memory_space<vmem>>, vector<1x8x64xf32>
    %270 = vector.shape_cast %269 : vector<1x8x64xf32> to vector<8x64xf32>
    %c14_309 = arith.constant 14 : index
    %c12_310 = arith.constant 12 : index
    %c0_311 = arith.constant 0 : index
    %271 = vector.load %arg0[%c14_309, %c12_310, %c0_311] : memref<20x20x64xf32, #tpu.memory_space<vmem>>, vector<1x8x64xf32>
    %272 = vector.shape_cast %271 : vector<1x8x64xf32> to vector<8x64xf32>
    %c15_312 = arith.constant 15 : index
    %c12_313 = arith.constant 12 : index
    %c0_314 = arith.constant 0 : index
    %273 = vector.load %arg0[%c15_312, %c12_313, %c0_314] : memref<20x20x64xf32, #tpu.memory_space<vmem>>, vector<1x8x64xf32>
    %274 = vector.shape_cast %273 : vector<1x8x64xf32> to vector<8x64xf32>
    %275 = tpu.concatenate %260, %262, %264, %266, %268, %270, %272, %274 in 0 : vector<8x64xf32>, vector<8x64xf32>, vector<8x64xf32>, vector<8x64xf32>, vector<8x64xf32>, vector<8x64xf32>, vector<8x64xf32>, vector<8x64xf32> -> vector<64x64xf32>
    %cst_315 = arith.constant dense<0.000000e+00> : vector<16x64xf32>
    %276 = tpu.matmul %0, %275, %cst_315 {dimension_numbers = #tpu.dot_dimension_numbers<[1], [0], [0], [1], [0, 0, 1, 1], [], []>} : vector<16x64xf32>, vector<64x64xf32>, vector<16x64xf32> -> vector<16x64xf32>
    %277 = vector.broadcast %1 : vector<16x1xf32> to vector<16x64xf32>
    %278 = arith.addf %276, %277 : vector<16x64xf32>
    %cst_316 = arith.constant 0.000000e+00 : f32
    %279 = vector.broadcast %cst_316 : f32 to vector<16x64xf32>
    %280 = arith.maximumf %278, %279 : vector<16x64xf32>
    %c176 = arith.constant 176 : index
    %c0_317 = arith.constant 0 : index
    %281 = vector.load %arg4[%c176, %c0_317] : memref<256x64xf32, #tpu.memory_space<vmem>>, vector<16x64xf32>
    tpu.vector_store %arg4[%c176, %c0_317], %280 {strides = array<i32>} : memref<256x64xf32, #tpu.memory_space<vmem>>, vector<16x64xf32>,
    %c12_318 = arith.constant 12 : index
    %c0_319 = arith.constant 0 : index
    %c0_320 = arith.constant 0 : index
    %282 = vector.load %arg0[%c12_318, %c0_319, %c0_320] : memref<20x20x64xf32, #tpu.memory_space<vmem>>, vector<1x8x64xf32>
    %283 = vector.shape_cast %282 : vector<1x8x64xf32> to vector<8x64xf32>
    %c13_321 = arith.constant 13 : index
    %c0_322 = arith.constant 0 : index
    %c0_323 = arith.constant 0 : index
    %284 = vector.load %arg0[%c13_321, %c0_322, %c0_323] : memref<20x20x64xf32, #tpu.memory_space<vmem>>, vector<1x8x64xf32>
    %285 = vector.shape_cast %284 : vector<1x8x64xf32> to vector<8x64xf32>
    %c14_324 = arith.constant 14 : index
    %c0_325 = arith.constant 0 : index
    %c0_326 = arith.constant 0 : index
    %286 = vector.load %arg0[%c14_324, %c0_325, %c0_326] : memref<20x20x64xf32, #tpu.memory_space<vmem>>, vector<1x8x64xf32>
    %287 = vector.shape_cast %286 : vector<1x8x64xf32> to vector<8x64xf32>
    %c15_327 = arith.constant 15 : index
    %c0_328 = arith.constant 0 : index
    %c0_329 = arith.constant 0 : index
    %288 = vector.load %arg0[%c15_327, %c0_328, %c0_329] : memref<20x20x64xf32, #tpu.memory_space<vmem>>, vector<1x8x64xf32>
    %289 = vector.shape_cast %288 : vector<1x8x64xf32> to vector<8x64xf32>
    %c16_330 = arith.constant 16 : index
    %c0_331 = arith.constant 0 : index
    %c0_332 = arith.constant 0 : index
    %290 = vector.load %arg0[%c16_330, %c0_331, %c0_332] : memref<20x20x64xf32, #tpu.memory_space<vmem>>, vector<1x8x64xf32>
    %291 = vector.shape_cast %290 : vector<1x8x64xf32> to vector<8x64xf32>
    %c17 = arith.constant 17 : index
    %c0_333 = arith.constant 0 : index
    %c0_334 = arith.constant 0 : index
    %292 = vector.load %arg0[%c17, %c0_333, %c0_334] : memref<20x20x64xf32, #tpu.memory_space<vmem>>, vector<1x8x64xf32>
    %293 = vector.shape_cast %292 : vector<1x8x64xf32> to vector<8x64xf32>
    %c18 = arith.constant 18 : index
    %c0_335 = arith.constant 0 : index
    %c0_336 = arith.constant 0 : index
    %294 = vector.load %arg0[%c18, %c0_335, %c0_336] : memref<20x20x64xf32, #tpu.memory_space<vmem>>, vector<1x8x64xf32>
    %295 = vector.shape_cast %294 : vector<1x8x64xf32> to vector<8x64xf32>
    %c19 = arith.constant 19 : index
    %c0_337 = arith.constant 0 : index
    %c0_338 = arith.constant 0 : index
    %296 = vector.load %arg0[%c19, %c0_337, %c0_338] : memref<20x20x64xf32, #tpu.memory_space<vmem>>, vector<1x8x64xf32>
    %297 = vector.shape_cast %296 : vector<1x8x64xf32> to vector<8x64xf32>
    %298 = tpu.concatenate %283, %285, %287, %289, %291, %293, %295, %297 in 0 : vector<8x64xf32>, vector<8x64xf32>, vector<8x64xf32>, vector<8x64xf32>, vector<8x64xf32>, vector<8x64xf32>, vector<8x64xf32>, vector<8x64xf32> -> vector<64x64xf32>
    %cst_339 = arith.constant dense<0.000000e+00> : vector<16x64xf32>
    %299 = tpu.matmul %0, %298, %cst_339 {dimension_numbers = #tpu.dot_dimension_numbers<[1], [0], [0], [1], [0, 0, 1, 1], [], []>} : vector<16x64xf32>, vector<64x64xf32>, vector<16x64xf32> -> vector<16x64xf32>
    %300 = vector.broadcast %1 : vector<16x1xf32> to vector<16x64xf32>
    %301 = arith.addf %299, %300 : vector<16x64xf32>
    %cst_340 = arith.constant 0.000000e+00 : f32
    %302 = vector.broadcast %cst_340 : f32 to vector<16x64xf32>
    %303 = arith.maximumf %301, %302 : vector<16x64xf32>
    %c192 = arith.constant 192 : index
    %c0_341 = arith.constant 0 : index
    %304 = vector.load %arg4[%c192, %c0_341] : memref<256x64xf32, #tpu.memory_space<vmem>>, vector<16x64xf32>
    tpu.vector_store %arg4[%c192, %c0_341], %303 {strides = array<i32>} : memref<256x64xf32, #tpu.memory_space<vmem>>, vector<16x64xf32>,
    %c12_342 = arith.constant 12 : index
    %c4_343 = arith.constant 4 : index
    %c0_344 = arith.constant 0 : index
    %305 = vector.load %arg0[%c12_342, %c4_343, %c0_344] : memref<20x20x64xf32, #tpu.memory_space<vmem>>, vector<1x8x64xf32>
    %306 = vector.shape_cast %305 : vector<1x8x64xf32> to vector<8x64xf32>
    %c13_345 = arith.constant 13 : index
    %c4_346 = arith.constant 4 : index
    %c0_347 = arith.constant 0 : index
    %307 = vector.load %arg0[%c13_345, %c4_346, %c0_347] : memref<20x20x64xf32, #tpu.memory_space<vmem>>, vector<1x8x64xf32>
    %308 = vector.shape_cast %307 : vector<1x8x64xf32> to vector<8x64xf32>
    %c14_348 = arith.constant 14 : index
    %c4_349 = arith.constant 4 : index
    %c0_350 = arith.constant 0 : index
    %309 = vector.load %arg0[%c14_348, %c4_349, %c0_350] : memref<20x20x64xf32, #tpu.memory_space<vmem>>, vector<1x8x64xf32>
    %310 = vector.shape_cast %309 : vector<1x8x64xf32> to vector<8x64xf32>
    %c15_351 = arith.constant 15 : index
    %c4_352 = arith.constant 4 : index
    %c0_353 = arith.constant 0 : index
    %311 = vector.load %arg0[%c15_351, %c4_352, %c0_353] : memref<20x20x64xf32, #tpu.memory_space<vmem>>, vector<1x8x64xf32>
    %312 = vector.shape_cast %311 : vector<1x8x64xf32> to vector<8x64xf32>
    %c16_354 = arith.constant 16 : index
    %c4_355 = arith.constant 4 : index
    %c0_356 = arith.constant 0 : index
    %313 = vector.load %arg0[%c16_354, %c4_355, %c0_356] : memref<20x20x64xf32, #tpu.memory_space<vmem>>, vector<1x8x64xf32>
    %314 = vector.shape_cast %313 : vector<1x8x64xf32> to vector<8x64xf32>
    %c17_357 = arith.constant 17 : index
    %c4_358 = arith.constant 4 : index
    %c0_359 = arith.constant 0 : index
    %315 = vector.load %arg0[%c17_357, %c4_358, %c0_359] : memref<20x20x64xf32, #tpu.memory_space<vmem>>, vector<1x8x64xf32>
    %316 = vector.shape_cast %315 : vector<1x8x64xf32> to vector<8x64xf32>
    %c18_360 = arith.constant 18 : index
    %c4_361 = arith.constant 4 : index
    %c0_362 = arith.constant 0 : index
    %317 = vector.load %arg0[%c18_360, %c4_361, %c0_362] : memref<20x20x64xf32, #tpu.memory_space<vmem>>, vector<1x8x64xf32>
    %318 = vector.shape_cast %317 : vector<1x8x64xf32> to vector<8x64xf32>
    %c19_363 = arith.constant 19 : index
    %c4_364 = arith.constant 4 : index
    %c0_365 = arith.constant 0 : index
    %319 = vector.load %arg0[%c19_363, %c4_364, %c0_365] : memref<20x20x64xf32, #tpu.memory_space<vmem>>, vector<1x8x64xf32>
    %320 = vector.shape_cast %319 : vector<1x8x64xf32> to vector<8x64xf32>
    %321 = tpu.concatenate %306, %308, %310, %312, %314, %316, %318, %320 in 0 : vector<8x64xf32>, vector<8x64xf32>, vector<8x64xf32>, vector<8x64xf32>, vector<8x64xf32>, vector<8x64xf32>, vector<8x64xf32>, vector<8x64xf32> -> vector<64x64xf32>
    %cst_366 = arith.constant dense<0.000000e+00> : vector<16x64xf32>
    %322 = tpu.matmul %0, %321, %cst_366 {dimension_numbers = #tpu.dot_dimension_numbers<[1], [0], [0], [1], [0, 0, 1, 1], [], []>} : vector<16x64xf32>, vector<64x64xf32>, vector<16x64xf32> -> vector<16x64xf32>
    %323 = vector.broadcast %1 : vector<16x1xf32> to vector<16x64xf32>
    %324 = arith.addf %322, %323 : vector<16x64xf32>
    %cst_367 = arith.constant 0.000000e+00 : f32
    %325 = vector.broadcast %cst_367 : f32 to vector<16x64xf32>
    %326 = arith.maximumf %324, %325 : vector<16x64xf32>
    %c208 = arith.constant 208 : index
    %c0_368 = arith.constant 0 : index
    %327 = vector.load %arg4[%c208, %c0_368] : memref<256x64xf32, #tpu.memory_space<vmem>>, vector<16x64xf32>
    tpu.vector_store %arg4[%c208, %c0_368], %326 {strides = array<i32>} : memref<256x64xf32, #tpu.memory_space<vmem>>, vector<16x64xf32>,
    %c12_369 = arith.constant 12 : index
    %c8_370 = arith.constant 8 : index
    %c0_371 = arith.constant 0 : index
    %328 = vector.load %arg0[%c12_369, %c8_370, %c0_371] : memref<20x20x64xf32, #tpu.memory_space<vmem>>, vector<1x8x64xf32>
    %329 = vector.shape_cast %328 : vector<1x8x64xf32> to vector<8x64xf32>
    %c13_372 = arith.constant 13 : index
    %c8_373 = arith.constant 8 : index
    %c0_374 = arith.constant 0 : index
    %330 = vector.load %arg0[%c13_372, %c8_373, %c0_374] : memref<20x20x64xf32, #tpu.memory_space<vmem>>, vector<1x8x64xf32>
    %331 = vector.shape_cast %330 : vector<1x8x64xf32> to vector<8x64xf32>
    %c14_375 = arith.constant 14 : index
    %c8_376 = arith.constant 8 : index
    %c0_377 = arith.constant 0 : index
    %332 = vector.load %arg0[%c14_375, %c8_376, %c0_377] : memref<20x20x64xf32, #tpu.memory_space<vmem>>, vector<1x8x64xf32>
    %333 = vector.shape_cast %332 : vector<1x8x64xf32> to vector<8x64xf32>
    %c15_378 = arith.constant 15 : index
    %c8_379 = arith.constant 8 : index
    %c0_380 = arith.constant 0 : index
    %334 = vector.load %arg0[%c15_378, %c8_379, %c0_380] : memref<20x20x64xf32, #tpu.memory_space<vmem>>, vector<1x8x64xf32>
    %335 = vector.shape_cast %334 : vector<1x8x64xf32> to vector<8x64xf32>
    %c16_381 = arith.constant 16 : index
    %c8_382 = arith.constant 8 : index
    %c0_383 = arith.constant 0 : index
    %336 = vector.load %arg0[%c16_381, %c8_382, %c0_383] : memref<20x20x64xf32, #tpu.memory_space<vmem>>, vector<1x8x64xf32>
    %337 = vector.shape_cast %336 : vector<1x8x64xf32> to vector<8x64xf32>
    %c17_384 = arith.constant 17 : index
    %c8_385 = arith.constant 8 : index
    %c0_386 = arith.constant 0 : index
    %338 = vector.load %arg0[%c17_384, %c8_385, %c0_386] : memref<20x20x64xf32, #tpu.memory_space<vmem>>, vector<1x8x64xf32>
    %339 = vector.shape_cast %338 : vector<1x8x64xf32> to vector<8x64xf32>
    %c18_387 = arith.constant 18 : index
    %c8_388 = arith.constant 8 : index
    %c0_389 = arith.constant 0 : index
    %340 = vector.load %arg0[%c18_387, %c8_388, %c0_389] : memref<20x20x64xf32, #tpu.memory_space<vmem>>, vector<1x8x64xf32>
    %341 = vector.shape_cast %340 : vector<1x8x64xf32> to vector<8x64xf32>
    %c19_390 = arith.constant 19 : index
    %c8_391 = arith.constant 8 : index
    %c0_392 = arith.constant 0 : index
    %342 = vector.load %arg0[%c19_390, %c8_391, %c0_392] : memref<20x20x64xf32, #tpu.memory_space<vmem>>, vector<1x8x64xf32>
    %343 = vector.shape_cast %342 : vector<1x8x64xf32> to vector<8x64xf32>
    %344 = tpu.concatenate %329, %331, %333, %335, %337, %339, %341, %343 in 0 : vector<8x64xf32>, vector<8x64xf32>, vector<8x64xf32>, vector<8x64xf32>, vector<8x64xf32>, vector<8x64xf32>, vector<8x64xf32>, vector<8x64xf32> -> vector<64x64xf32>
    %cst_393 = arith.constant dense<0.000000e+00> : vector<16x64xf32>
    %345 = tpu.matmul %0, %344, %cst_393 {dimension_numbers = #tpu.dot_dimension_numbers<[1], [0], [0], [1], [0, 0, 1, 1], [], []>} : vector<16x64xf32>, vector<64x64xf32>, vector<16x64xf32> -> vector<16x64xf32>
    %346 = vector.broadcast %1 : vector<16x1xf32> to vector<16x64xf32>
    %347 = arith.addf %345, %346 : vector<16x64xf32>
    %cst_394 = arith.constant 0.000000e+00 : f32
    %348 = vector.broadcast %cst_394 : f32 to vector<16x64xf32>
    %349 = arith.maximumf %347, %348 : vector<16x64xf32>
    %c224 = arith.constant 224 : index
    %c0_395 = arith.constant 0 : index
    %350 = vector.load %arg4[%c224, %c0_395] : memref<256x64xf32, #tpu.memory_space<vmem>>, vector<16x64xf32>
    tpu.vector_store %arg4[%c224, %c0_395], %349 {strides = array<i32>} : memref<256x64xf32, #tpu.memory_space<vmem>>, vector<16x64xf32>,
    %c12_396 = arith.constant 12 : index
    %c12_397 = arith.constant 12 : index
    %c0_398 = arith.constant 0 : index
    %351 = vector.load %arg0[%c12_396, %c12_397, %c0_398] : memref<20x20x64xf32, #tpu.memory_space<vmem>>, vector<1x8x64xf32>
    %352 = vector.shape_cast %351 : vector<1x8x64xf32> to vector<8x64xf32>
    %c13_399 = arith.constant 13 : index
    %c12_400 = arith.constant 12 : index
    %c0_401 = arith.constant 0 : index
    %353 = vector.load %arg0[%c13_399, %c12_400, %c0_401] : memref<20x20x64xf32, #tpu.memory_space<vmem>>, vector<1x8x64xf32>
    %354 = vector.shape_cast %353 : vector<1x8x64xf32> to vector<8x64xf32>
    %c14_402 = arith.constant 14 : index
    %c12_403 = arith.constant 12 : index
    %c0_404 = arith.constant 0 : index
    %355 = vector.load %arg0[%c14_402, %c12_403, %c0_404] : memref<20x20x64xf32, #tpu.memory_space<vmem>>, vector<1x8x64xf32>
    %356 = vector.shape_cast %355 : vector<1x8x64xf32> to vector<8x64xf32>
    %c15_405 = arith.constant 15 : index
    %c12_406 = arith.constant 12 : index
    %c0_407 = arith.constant 0 : index
    %357 = vector.load %arg0[%c15_405, %c12_406, %c0_407] : memref<20x20x64xf32, #tpu.memory_space<vmem>>, vector<1x8x64xf32>
    %358 = vector.shape_cast %357 : vector<1x8x64xf32> to vector<8x64xf32>
    %c16_408 = arith.constant 16 : index
    %c12_409 = arith.constant 12 : index
    %c0_410 = arith.constant 0 : index
    %359 = vector.load %arg0[%c16_408, %c12_409, %c0_410] : memref<20x20x64xf32, #tpu.memory_space<vmem>>, vector<1x8x64xf32>
    %360 = vector.shape_cast %359 : vector<1x8x64xf32> to vector<8x64xf32>
    %c17_411 = arith.constant 17 : index
    %c12_412 = arith.constant 12 : index
    %c0_413 = arith.constant 0 : index
    %361 = vector.load %arg0[%c17_411, %c12_412, %c0_413] : memref<20x20x64xf32, #tpu.memory_space<vmem>>, vector<1x8x64xf32>
    %362 = vector.shape_cast %361 : vector<1x8x64xf32> to vector<8x64xf32>
    %c18_414 = arith.constant 18 : index
    %c12_415 = arith.constant 12 : index
    %c0_416 = arith.constant 0 : index
    %363 = vector.load %arg0[%c18_414, %c12_415, %c0_416] : memref<20x20x64xf32, #tpu.memory_space<vmem>>, vector<1x8x64xf32>
    %364 = vector.shape_cast %363 : vector<1x8x64xf32> to vector<8x64xf32>
    %c19_417 = arith.constant 19 : index
    %c12_418 = arith.constant 12 : index
    %c0_419 = arith.constant 0 : index
    %365 = vector.load %arg0[%c19_417, %c12_418, %c0_419] : memref<20x20x64xf32, #tpu.memory_space<vmem>>, vector<1x8x64xf32>
    %366 = vector.shape_cast %365 : vector<1x8x64xf32> to vector<8x64xf32>
    %367 = tpu.concatenate %352, %354, %356, %358, %360, %362, %364, %366 in 0 : vector<8x64xf32>, vector<8x64xf32>, vector<8x64xf32>, vector<8x64xf32>, vector<8x64xf32>, vector<8x64xf32>, vector<8x64xf32>, vector<8x64xf32> -> vector<64x64xf32>
    %cst_420 = arith.constant dense<0.000000e+00> : vector<16x64xf32>
    %368 = tpu.matmul %0, %367, %cst_420 {dimension_numbers = #tpu.dot_dimension_numbers<[1], [0], [0], [1], [0, 0, 1, 1], [], []>} : vector<16x64xf32>, vector<64x64xf32>, vector<16x64xf32> -> vector<16x64xf32>
    %369 = vector.broadcast %1 : vector<16x1xf32> to vector<16x64xf32>
    %370 = arith.addf %368, %369 : vector<16x64xf32>
    %cst_421 = arith.constant 0.000000e+00 : f32
    %371 = vector.broadcast %cst_421 : f32 to vector<16x64xf32>
    %372 = arith.maximumf %370, %371 : vector<16x64xf32>
    %c240 = arith.constant 240 : index
    %c0_422 = arith.constant 0 : index
    %373 = vector.load %arg4[%c240, %c0_422] : memref<256x64xf32, #tpu.memory_space<vmem>>, vector<16x64xf32>
    tpu.vector_store %arg4[%c240, %c0_422], %372 {strides = array<i32>} : memref<256x64xf32, #tpu.memory_space<vmem>>, vector<16x64xf32>,
    %c0_423 = arith.constant 0 : index
    %c0_424 = arith.constant 0 : index
    %374 = vector.load %arg4[%c0_423, %c0_424] : memref<256x64xf32, #tpu.memory_space<vmem>>, vector<256x64xf32>
    %cst_425 = arith.constant dense<0.000000e+00> : vector<16x64xf32>
    %375 = tpu.matmul %2, %374, %cst_425 {dimension_numbers = #tpu.dot_dimension_numbers<[1], [0], [0], [1], [0, 0, 1, 1], [], []>} : vector<16x256xf32>, vector<256x64xf32>, vector<16x64xf32> -> vector<16x64xf32>
    %376 = vector.broadcast %4 : vector<16x1xf32> to vector<16x64xf32>
    %377 = arith.addf %375, %376 : vector<16x64xf32>
    %cst_426 = arith.constant 0.000000e+00 : f32
    %378 = vector.broadcast %cst_426 : f32 to vector<16x64xf32>
    %379 = arith.maximumf %377, %378 : vector<16x64xf32>
    %cst_427 = arith.constant dense<0.000000e+00> : vector<16x64xf32>
    %380 = tpu.matmul %3, %374, %cst_427 {dimension_numbers = #tpu.dot_dimension_numbers<[1], [0], [0], [1], [0, 0, 1, 1], [], []>} : vector<16x256xf32>, vector<256x64xf32>, vector<16x64xf32> -> vector<16x64xf32>
    %381 = vector.broadcast %5 : vector<16x1xf32> to vector<16x64xf32>
    %382 = arith.addf %380, %381 : vector<16x64xf32>
    %cst_428 = arith.constant 0.000000e+00 : f32
    %383 = vector.broadcast %cst_428 : f32 to vector<16x64xf32>
    %384 = arith.maximumf %382, %383 : vector<16x64xf32>
    %385 = tpu.concatenate %379, %384 in 1 : vector<16x64xf32>, vector<16x64xf32> -> vector<16x128xf32>
    %386 = vector.extract_strided_slice %385 {offsets = [0, 0], sizes = [1, 128], strides = [1, 1]} : vector<16x128xf32> to vector<1x128xf32>
    %387 = vector.shape_cast %386 : vector<1x128xf32> to vector<1x128xf32>
    %388 = vector.broadcast %387 : vector<1x128xf32> to vector<8x128xf32>
    %c0_429 = arith.constant 0 : index
    %c0_430 = arith.constant 0 : index
    %389 = vector.load %arg5[%c0_429, %c0_430] : memref<8x2048xf32, #tpu.memory_space<vmem>>, vector<8x128xf32>
    tpu.vector_store %arg5[%c0_429, %c0_430], %388 {strides = array<i32>} : memref<8x2048xf32, #tpu.memory_space<vmem>>, vector<8x128xf32>,
    %390 = vector.extract_strided_slice %385 {offsets = [1, 0], sizes = [1, 128], strides = [1, 1]} : vector<16x128xf32> to vector<1x128xf32>
    %391 = vector.shape_cast %390 : vector<1x128xf32> to vector<1x128xf32>
    %392 = vector.broadcast %391 : vector<1x128xf32> to vector<8x128xf32>
    %c0_431 = arith.constant 0 : index
    %c128_432 = arith.constant 128 : index
    %393 = vector.load %arg5[%c0_431, %c128_432] : memref<8x2048xf32, #tpu.memory_space<vmem>>, vector<8x128xf32>
    tpu.vector_store %arg5[%c0_431, %c128_432], %392 {strides = array<i32>} : memref<8x2048xf32, #tpu.memory_space<vmem>>, vector<8x128xf32>,
    %394 = vector.extract_strided_slice %385 {offsets = [2, 0], sizes = [1, 128], strides = [1, 1]} : vector<16x128xf32> to vector<1x128xf32>
    %395 = vector.shape_cast %394 : vector<1x128xf32> to vector<1x128xf32>
    %396 = vector.broadcast %395 : vector<1x128xf32> to vector<8x128xf32>
    %c0_433 = arith.constant 0 : index
    %c256 = arith.constant 256 : index
    %397 = vector.load %arg5[%c0_433, %c256] : memref<8x2048xf32, #tpu.memory_space<vmem>>, vector<8x128xf32>
    tpu.vector_store %arg5[%c0_433, %c256], %396 {strides = array<i32>} : memref<8x2048xf32, #tpu.memory_space<vmem>>, vector<8x128xf32>,
    %398 = vector.extract_strided_slice %385 {offsets = [3, 0], sizes = [1, 128], strides = [1, 1]} : vector<16x128xf32> to vector<1x128xf32>
    %399 = vector.shape_cast %398 : vector<1x128xf32> to vector<1x128xf32>
    %400 = vector.broadcast %399 : vector<1x128xf32> to vector<8x128xf32>
    %c0_434 = arith.constant 0 : index
    %c384 = arith.constant 384 : index
    %401 = vector.load %arg5[%c0_434, %c384] : memref<8x2048xf32, #tpu.memory_space<vmem>>, vector<8x128xf32>
    tpu.vector_store %arg5[%c0_434, %c384], %400 {strides = array<i32>} : memref<8x2048xf32, #tpu.memory_space<vmem>>, vector<8x128xf32>,
    %402 = vector.extract_strided_slice %385 {offsets = [4, 0], sizes = [1, 128], strides = [1, 1]} : vector<16x128xf32> to vector<1x128xf32>
    %403 = vector.shape_cast %402 : vector<1x128xf32> to vector<1x128xf32>
    %404 = vector.broadcast %403 : vector<1x128xf32> to vector<8x128xf32>
    %c0_435 = arith.constant 0 : index
    %c512 = arith.constant 512 : index
    %405 = vector.load %arg5[%c0_435, %c512] : memref<8x2048xf32, #tpu.memory_space<vmem>>, vector<8x128xf32>
    tpu.vector_store %arg5[%c0_435, %c512], %404 {strides = array<i32>} : memref<8x2048xf32, #tpu.memory_space<vmem>>, vector<8x128xf32>,
    %406 = vector.extract_strided_slice %385 {offsets = [5, 0], sizes = [1, 128], strides = [1, 1]} : vector<16x128xf32> to vector<1x128xf32>
    %407 = vector.shape_cast %406 : vector<1x128xf32> to vector<1x128xf32>
    %408 = vector.broadcast %407 : vector<1x128xf32> to vector<8x128xf32>
    %c0_436 = arith.constant 0 : index
    %c640 = arith.constant 640 : index
    %409 = vector.load %arg5[%c0_436, %c640] : memref<8x2048xf32, #tpu.memory_space<vmem>>, vector<8x128xf32>
    tpu.vector_store %arg5[%c0_436, %c640], %408 {strides = array<i32>} : memref<8x2048xf32, #tpu.memory_space<vmem>>, vector<8x128xf32>,
    %410 = vector.extract_strided_slice %385 {offsets = [6, 0], sizes = [1, 128], strides = [1, 1]} : vector<16x128xf32> to vector<1x128xf32>
    %411 = vector.shape_cast %410 : vector<1x128xf32> to vector<1x128xf32>
    %412 = vector.broadcast %411 : vector<1x128xf32> to vector<8x128xf32>
    %c0_437 = arith.constant 0 : index
    %c768 = arith.constant 768 : index
    %413 = vector.load %arg5[%c0_437, %c768] : memref<8x2048xf32, #tpu.memory_space<vmem>>, vector<8x128xf32>
    tpu.vector_store %arg5[%c0_437, %c768], %412 {strides = array<i32>} : memref<8x2048xf32, #tpu.memory_space<vmem>>, vector<8x128xf32>,
    %414 = vector.extract_strided_slice %385 {offsets = [7, 0], sizes = [1, 128], strides = [1, 1]} : vector<16x128xf32> to vector<1x128xf32>
    %415 = vector.shape_cast %414 : vector<1x128xf32> to vector<1x128xf32>
    %416 = vector.broadcast %415 : vector<1x128xf32> to vector<8x128xf32>
    %c0_438 = arith.constant 0 : index
    %c896 = arith.constant 896 : index
    %417 = vector.load %arg5[%c0_438, %c896] : memref<8x2048xf32, #tpu.memory_space<vmem>>, vector<8x128xf32>
    tpu.vector_store %arg5[%c0_438, %c896], %416 {strides = array<i32>} : memref<8x2048xf32, #tpu.memory_space<vmem>>, vector<8x128xf32>,
    %418 = vector.extract_strided_slice %385 {offsets = [8, 0], sizes = [1, 128], strides = [1, 1]} : vector<16x128xf32> to vector<1x128xf32>
    %419 = vector.shape_cast %418 : vector<1x128xf32> to vector<1x128xf32>
    %420 = vector.broadcast %419 : vector<1x128xf32> to vector<8x128xf32>
    %c0_439 = arith.constant 0 : index
    %c1024 = arith.constant 1024 : index
    %421 = vector.load %arg5[%c0_439, %c1024] : memref<8x2048xf32, #tpu.memory_space<vmem>>, vector<8x128xf32>
    tpu.vector_store %arg5[%c0_439, %c1024], %420 {strides = array<i32>} : memref<8x2048xf32, #tpu.memory_space<vmem>>, vector<8x128xf32>,
    %422 = vector.extract_strided_slice %385 {offsets = [9, 0], sizes = [1, 128], strides = [1, 1]} : vector<16x128xf32> to vector<1x128xf32>
    %423 = vector.shape_cast %422 : vector<1x128xf32> to vector<1x128xf32>
    %424 = vector.broadcast %423 : vector<1x128xf32> to vector<8x128xf32>
    %c0_440 = arith.constant 0 : index
    %c1152 = arith.constant 1152 : index
    %425 = vector.load %arg5[%c0_440, %c1152] : memref<8x2048xf32, #tpu.memory_space<vmem>>, vector<8x128xf32>
    tpu.vector_store %arg5[%c0_440, %c1152], %424 {strides = array<i32>} : memref<8x2048xf32, #tpu.memory_space<vmem>>, vector<8x128xf32>,
    %426 = vector.extract_strided_slice %385 {offsets = [10, 0], sizes = [1, 128], strides = [1, 1]} : vector<16x128xf32> to vector<1x128xf32>
    %427 = vector.shape_cast %426 : vector<1x128xf32> to vector<1x128xf32>
    %428 = vector.broadcast %427 : vector<1x128xf32> to vector<8x128xf32>
    %c0_441 = arith.constant 0 : index
    %c1280 = arith.constant 1280 : index
    %429 = vector.load %arg5[%c0_441, %c1280] : memref<8x2048xf32, #tpu.memory_space<vmem>>, vector<8x128xf32>
    tpu.vector_store %arg5[%c0_441, %c1280], %428 {strides = array<i32>} : memref<8x2048xf32, #tpu.memory_space<vmem>>, vector<8x128xf32>,
    %430 = vector.extract_strided_slice %385 {offsets = [11, 0], sizes = [1, 128], strides = [1, 1]} : vector<16x128xf32> to vector<1x128xf32>
    %431 = vector.shape_cast %430 : vector<1x128xf32> to vector<1x128xf32>
    %432 = vector.broadcast %431 : vector<1x128xf32> to vector<8x128xf32>
    %c0_442 = arith.constant 0 : index
    %c1408 = arith.constant 1408 : index
    %433 = vector.load %arg5[%c0_442, %c1408] : memref<8x2048xf32, #tpu.memory_space<vmem>>, vector<8x128xf32>
    tpu.vector_store %arg5[%c0_442, %c1408], %432 {strides = array<i32>} : memref<8x2048xf32, #tpu.memory_space<vmem>>, vector<8x128xf32>,
    %434 = vector.extract_strided_slice %385 {offsets = [12, 0], sizes = [1, 128], strides = [1, 1]} : vector<16x128xf32> to vector<1x128xf32>
    %435 = vector.shape_cast %434 : vector<1x128xf32> to vector<1x128xf32>
    %436 = vector.broadcast %435 : vector<1x128xf32> to vector<8x128xf32>
    %c0_443 = arith.constant 0 : index
    %c1536 = arith.constant 1536 : index
    %437 = vector.load %arg5[%c0_443, %c1536] : memref<8x2048xf32, #tpu.memory_space<vmem>>, vector<8x128xf32>
    tpu.vector_store %arg5[%c0_443, %c1536], %436 {strides = array<i32>} : memref<8x2048xf32, #tpu.memory_space<vmem>>, vector<8x128xf32>,
    %438 = vector.extract_strided_slice %385 {offsets = [13, 0], sizes = [1, 128], strides = [1, 1]} : vector<16x128xf32> to vector<1x128xf32>
    %439 = vector.shape_cast %438 : vector<1x128xf32> to vector<1x128xf32>
    %440 = vector.broadcast %439 : vector<1x128xf32> to vector<8x128xf32>
    %c0_444 = arith.constant 0 : index
    %c1664 = arith.constant 1664 : index
    %441 = vector.load %arg5[%c0_444, %c1664] : memref<8x2048xf32, #tpu.memory_space<vmem>>, vector<8x128xf32>
    tpu.vector_store %arg5[%c0_444, %c1664], %440 {strides = array<i32>} : memref<8x2048xf32, #tpu.memory_space<vmem>>, vector<8x128xf32>,
    %442 = vector.extract_strided_slice %385 {offsets = [14, 0], sizes = [1, 128], strides = [1, 1]} : vector<16x128xf32> to vector<1x128xf32>
    %443 = vector.shape_cast %442 : vector<1x128xf32> to vector<1x128xf32>
    %444 = vector.broadcast %443 : vector<1x128xf32> to vector<8x128xf32>
    %c0_445 = arith.constant 0 : index
    %c1792 = arith.constant 1792 : index
    %445 = vector.load %arg5[%c0_445, %c1792] : memref<8x2048xf32, #tpu.memory_space<vmem>>, vector<8x128xf32>
    tpu.vector_store %arg5[%c0_445, %c1792], %444 {strides = array<i32>} : memref<8x2048xf32, #tpu.memory_space<vmem>>, vector<8x128xf32>,
    %446 = vector.extract_strided_slice %385 {offsets = [15, 0], sizes = [1, 128], strides = [1, 1]} : vector<16x128xf32> to vector<1x128xf32>
    %447 = vector.shape_cast %446 : vector<1x128xf32> to vector<1x128xf32>
    %448 = vector.broadcast %447 : vector<1x128xf32> to vector<8x128xf32>
    %c0_446 = arith.constant 0 : index
    %c1920 = arith.constant 1920 : index
    %449 = vector.load %arg5[%c0_446, %c1920] : memref<8x2048xf32, #tpu.memory_space<vmem>>, vector<8x128xf32>
    tpu.vector_store %arg5[%c0_446, %c1920], %448 {strides = array<i32>} : memref<8x2048xf32, #tpu.memory_space<vmem>>, vector<8x128xf32>,
    tpu.wait_dma2 semaphore(%arg7 : memref<!tpu.dma_semaphore, #tpu.memory_space<semaphore_mem>>) src(%arg2 : memref<2192x128xf32, #tpu.memory_space<any>>) dst(%arg6 : memref<2192x128xf32, #tpu.memory_space<vmem>>)
    %c0_447 = arith.constant 0 : index
    %c0_448 = arith.constant 0 : index
    %450 = vector.load %arg5[%c0_447, %c0_448] : memref<8x2048xf32, #tpu.memory_space<vmem>>, vector<8x2048xf32>
    %c0_449 = arith.constant 0 : index
    %c0_450 = arith.constant 0 : index
    %451 = vector.load %arg6[%c0_449, %c0_450] : memref<2192x128xf32, #tpu.memory_space<vmem>>, vector<2048x128xf32>
    %cst_451 = arith.constant dense<0.000000e+00> : vector<8x128xf32>
    %452 = tpu.matmul %450, %451, %cst_451 {dimension_numbers = #tpu.dot_dimension_numbers<[1], [0], [0], [1], [0, 0, 1, 1], [], []>} : vector<8x2048xf32>, vector<2048x128xf32>, vector<8x128xf32> -> vector<8x128xf32>
    %c2048 = arith.constant 2048 : index
    %c0_452 = arith.constant 0 : index
    %453 = vector.load %arg6[%c2048, %c0_452] : memref<2192x128xf32, #tpu.memory_space<vmem>>, vector<1x128xf32>
    %454 = vector.broadcast %453 : vector<1x128xf32> to vector<8x128xf32>
    %455 = arith.addf %452, %454 : vector<8x128xf32>
    %cst_453 = arith.constant 0.000000e+00 : f32
    %456 = vector.broadcast %cst_453 : f32 to vector<8x128xf32>
    %457 = arith.maximumf %455, %456 : vector<8x128xf32>
    %c2056 = arith.constant 2056 : index
    %c0_454 = arith.constant 0 : index
    %458 = vector.load %arg6[%c2056, %c0_454] : memref<2192x128xf32, #tpu.memory_space<vmem>>, vector<128x6xf32>
    %cst_455 = arith.constant dense<0.000000e+00> : vector<8x6xf32>
    %459 = tpu.matmul %457, %458, %cst_455 {dimension_numbers = #tpu.dot_dimension_numbers<[1], [0], [0], [1], [0, 0, 1, 1], [], []>} : vector<8x128xf32>, vector<128x6xf32>, vector<8x6xf32> -> vector<8x6xf32>
    %c2184 = arith.constant 2184 : index
    %c0_456 = arith.constant 0 : index
    %460 = vector.load %arg6[%c2184, %c0_456] : memref<2192x128xf32, #tpu.memory_space<vmem>>, vector<1x6xf32>
    %461 = vector.broadcast %460 : vector<1x6xf32> to vector<8x6xf32>
    %462 = arith.addf %459, %461 : vector<8x6xf32>
    %463 = vector.extract_strided_slice %462 {offsets = [0, 0], sizes = [1, 6], strides = [1, 1]} : vector<8x6xf32> to vector<1x6xf32>
    %cst_457 = arith.constant dense<0xFF800000> : vector<1xf32>
    %464 = vector.multi_reduction <maximumf>, %463, %cst_457 [1] : vector<1x6xf32> to vector<1xf32>
    %465 = vector.shape_cast %464 : vector<1xf32> to vector<1x1xf32>
    %466 = vector.broadcast %465 : vector<1x1xf32> to vector<1x6xf32>
    %467 = arith.subf %463, %466 : vector<1x6xf32>
    %468 = math.exp %467 : vector<1x6xf32>
    %cst_458 = arith.constant dense<0.000000e+00> : vector<1xf32>
    %469 = vector.multi_reduction <add>, %468, %cst_458 [1] : vector<1x6xf32> to vector<1xf32>
    %470 = vector.shape_cast %469 : vector<1xf32> to vector<1x1xf32>
    %471 = vector.broadcast %470 : vector<1x1xf32> to vector<1x6xf32>
    %472 = arith.divf %468, %471 : vector<1x6xf32>
    %c0_459 = arith.constant 0 : index
    %c0_460 = arith.constant 0 : index
    %473 = vector.load %arg3[%c0_459, %c0_460] : memref<1x6xf32, #tpu.memory_space<vmem>>, vector<1x6xf32>
    tpu.vector_store %arg3[%c0_459, %c0_460], %472 {strides = array<i32>} : memref<1x6xf32, #tpu.memory_space<vmem>>, vector<1x6xf32>,
    return
  }
}

</mosaic_0001>

<bundles_post_ra>
// kernel: pg_model_forward.1
= control target key start
LH: loop header
LB: loop body
LE: loop exit
PB: predicated region body
PF: predicated region fallthrough
CT: control target
= control target key end

     0   :  { %8 = vsyncpa [#allocation7], 0  ;;  %s3763_s0 = inlined_call_operand.vmem [shape: f32[20,20,64], index: 0, kind: input, shape index: {}]   ;;  %s3764_s1 = inlined_call_operand.vmem [shape: f32[48,256], index: 1, kind: input, shape index: {}]   ;;  %s3765_s2 = inlined_call_operand.vmem [shape: f32[2192,128], index: 2, kind: input, shape index: {}]   ;;  %s3766_s3 = inlined_call_operand.hbm [shape: f32[1,6], index: 3, kind: output, shape index: {}]  }
   0x1   :  { %v23_v0 = vld [vmem:[%s3765_s2] sm:$0xff]  ;;  %v25_v1 = vld [vmem:[%s3765_s2 + $0x8] sm:$0xff]  ;;  %v27_v2 = vld [vmem:[%s3765_s2 + $0x10] sm:$0xff] }
   0x2   :  { %24 = vst [vmem:[#allocation4 + $0x4c8] sm:$0xff] %v23_v0  ;;  %v29_v3 = vld [vmem:[%s3765_s2 + $0x18] sm:$0xff]  ;;  %v31_v4 = vld [vmem:[%s3765_s2 + $0x20] sm:$0xff]  ;;  %v33_v5 = vld [vmem:[%s3765_s2 + $0x28] sm:$0xff] }
   0x3   :  { %26 = vst [vmem:[#allocation4 + $0x808] sm:$0xff] %v25_v1  ;;  %v35_v6 = vld [vmem:[%s3765_s2 + $0x30] sm:$0xff]  ;;  %v37_v7 = vld [vmem:[%s3765_s2 + $0x38] sm:$0xff]  ;;  %v39_v8 = vld [vmem:[%s3765_s2 + $0x40] sm:$0xff] }
   0x4   :  { %28 = vst [vmem:[#allocation4 + $0x7f8] sm:$0xff] %v27_v2  ;;  %v41_v9 = vld [vmem:[%s3765_s2 + $0x48] sm:$0xff]  ;;  %v43_v10 = vld [vmem:[%s3765_s2 + $0x50] sm:$0xff]  ;;  %v45_v11 = vld [vmem:[%s3765_s2 + $0x58] sm:$0xff] }
   0x5   :  { %30 = vst [vmem:[#allocation4 + $0x758] sm:$0xff] %v29_v3  ;;  %v47_v12 = vld [vmem:[%s3765_s2 + $0x60] sm:$0xff]  ;;  %v49_v13 = vld [vmem:[%s3765_s2 + $0x68] sm:$0xff]  ;;  %v51_v14 = vld [vmem:[%s3765_s2 + $0x70] sm:$0xff] }
   0x6   :  { %32 = vst [vmem:[#allocation4 + $0x320] sm:$0xff] %v31_v4  ;;  %v53_v15 = vld [vmem:[%s3765_s2 + $0x78] sm:$0xff]  ;;  %v55_v16 = vld [vmem:[%s3765_s2 + $0x80] sm:$0xff]  ;;  %v57_v17 = vld [vmem:[%s3765_s2 + $0x88] sm:$0xff] }
   0x7   :  { %34 = vst [vmem:[#allocation4 + $0x438] sm:$0xff] %v33_v5  ;;  %v59_v18 = vld [vmem:[%s3765_s2 + $0x90] sm:$0xff]  ;;  %v61_v19 = vld [vmem:[%s3765_s2 + $0x98] sm:$0xff]  ;;  %v63_v20 = vld [vmem:[%s3765_s2 + $0xa0] sm:$0xff] }
   0x8   :  { %36 = vst [vmem:[#allocation4] sm:$0xff] %v35_v6  ;;  %v65_v21 = vld [vmem:[%s3765_s2 + $0xa8] sm:$0xff]  ;;  %v67_v22 = vld [vmem:[%s3765_s2 + $0xb0] sm:$0xff]  ;;  %v69_v23 = vld [vmem:[%s3765_s2 + $0xb8] sm:$0xff] }
   0x9   :  { %38 = vst [vmem:[#allocation4 + $0x6e0] sm:$0xff] %v37_v7  ;;  %v71_v24 = vld [vmem:[%s3765_s2 + $0xc0] sm:$0xff]  ;;  %v73_v25 = vld [vmem:[%s3765_s2 + $0xc8] sm:$0xff]  ;;  %v75_v26 = vld [vmem:[%s3765_s2 + $0xd0] sm:$0xff] }
   0xa   :  { %40 = vst [vmem:[#allocation4 + $0x6a0] sm:$0xff] %v39_v8  ;;  %v77_v27 = vld [vmem:[%s3765_s2 + $0xd8] sm:$0xff]  ;;  %v79_v28 = vld [vmem:[%s3765_s2 + $0xe0] sm:$0xff]  ;;  %v81_v29 = vld [vmem:[%s3765_s2 + $0xe8] sm:$0xff] }
   0xb   :  { %42 = vst [vmem:[#allocation4 + $0x748] sm:$0xff] %v41_v9  ;;  %v83_v30 = vld [vmem:[%s3765_s2 + $0xf0] sm:$0xff]  ;;  %v85_v31 = vld [vmem:[%s3765_s2 + $0xf8] sm:$0xff]  ;;  %v87_v32 = vld [vmem:[%s3765_s2 + $0x100] sm:$0xff] }
   0xc   :  { %44 = vst [vmem:[#allocation4 + $0x2f8] sm:$0xff] %v43_v10  ;;  %v89_v33 = vld [vmem:[%s3765_s2 + $0x108] sm:$0xff]  ;;  %v91_v34 = vld [vmem:[%s3765_s2 + $0x110] sm:$0xff]  ;;  %v93_v35 = vld [vmem:[%s3765_s2 + $0x118] sm:$0xff] }
   0xd   :  { %46 = vst [vmem:[#allocation4 + $0x700] sm:$0xff] %v45_v11  ;;  %v95_v36 = vld [vmem:[%s3765_s2 + $0x120] sm:$0xff]  ;;  %v97_v37 = vld [vmem:[%s3765_s2 + $0x128] sm:$0xff]  ;;  %v99_v38 = vld [vmem:[%s3765_s2 + $0x130] sm:$0xff] }
   0xe   :  { %48 = vst [vmem:[#allocation4 + $0x7e8] sm:$0xff] %v47_v12  ;;  %v101_v39 = vld [vmem:[%s3765_s2 + $0x138] sm:$0xff]  ;;  %v103_v40 = vld [vmem:[%s3765_s2 + $0x140] sm:$0xff]  ;;  %v105_v41 = vld [vmem:[%s3765_s2 + $0x148] sm:$0xff] }
   0xf   :  { %50 = vst [vmem:[#allocation4 + $0x568] sm:$0xff] %v49_v13  ;;  %v107_v42 = vld [vmem:[%s3765_s2 + $0x150] sm:$0xff]  ;;  %v109_v43 = vld [vmem:[%s3765_s2 + $0x158] sm:$0xff]  ;;  %v111_v44 = vld [vmem:[%s3765_s2 + $0x160] sm:$0xff] }
  0x10   :  { %52 = vst [vmem:[#allocation4 + $0x578] sm:$0xff] %v51_v14  ;;  %v113_v45 = vld [vmem:[%s3765_s2 + $0x168] sm:$0xff]  ;;  %v115_v46 = vld [vmem:[%s3765_s2 + $0x170] sm:$0xff]  ;;  %v117_v47 = vld [vmem:[%s3765_s2 + $0x178] sm:$0xff] }
  0x11   :  { %54 = vst [vmem:[#allocation4 + $0x3a0] sm:$0xff] %v53_v15  ;;  %v119_v48 = vld [vmem:[%s3765_s2 + $0x180] sm:$0xff]  ;;  %v121_v49 = vld [vmem:[%s3765_s2 + $0x188] sm:$0xff]  ;;  %v123_v50 = vld [vmem:[%s3765_s2 + $0x190] sm:$0xff] }
  0x12   :  { %56 = vst [vmem:[#allocation4 + $0x880] sm:$0xff] %v55_v16  ;;  %v125_v51 = vld [vmem:[%s3765_s2 + $0x198] sm:$0xff]  ;;  %v127_v52 = vld [vmem:[%s3765_s2 + $0x1a0] sm:$0xff]  ;;  %v129_v53 = vld [vmem:[%s3765_s2 + $0x1a8] sm:$0xff] }
  0x13   :  { %58 = vst [vmem:[#allocation4 + $0x7c0] sm:$0xff] %v57_v17  ;;  %v131_v54 = vld [vmem:[%s3765_s2 + $0x1b0] sm:$0xff]  ;;  %v133_v55 = vld [vmem:[%s3765_s2 + $0x1b8] sm:$0xff]  ;;  %v135_v56 = vld [vmem:[%s3765_s2 + $0x1c0] sm:$0xff] }
  0x14   :  { %60 = vst [vmem:[#allocation4 + $0x588] sm:$0xff] %v59_v18  ;;  %v137_v57 = vld [vmem:[%s3765_s2 + $0x1c8] sm:$0xff]  ;;  %v139_v58 = vld [vmem:[%s3765_s2 + $0x1d0] sm:$0xff]  ;;  %v141_v59 = vld [vmem:[%s3765_s2 + $0x1d8] sm:$0xff] }
  0x15   :  { %62 = vst [vmem:[#allocation4 + $0x430] sm:$0xff] %v61_v19  ;;  %v143_v60 = vld [vmem:[%s3765_s2 + $0x1e0] sm:$0xff]  ;;  %v145_v61 = vld [vmem:[%s3765_s2 + $0x1e8] sm:$0xff]  ;;  %v147_v62 = vld [vmem:[%s3765_s2 + $0x1f0] sm:$0xff] }
  0x16   :  { %64 = vst [vmem:[#allocation4 + $0x800] sm:$0xff] %v63_v20  ;;  %v149_v63 = vld [vmem:[%s3765_s2 + $0x1f8] sm:$0xff]  ;;  %v151_v0 = vld [vmem:[%s3765_s2 + $0x200] sm:$0xff]  ;;  %v153_v1 = vld [vmem:[%s3765_s2 + $0x208] sm:$0xff] }
  0x17   :  { %66 = vst [vmem:[#allocation4 + $0x778] sm:$0xff] %v65_v21  ;;  %v155_v2 = vld [vmem:[%s3765_s2 + $0x210] sm:$0xff]  ;;  %v157_v3 = vld [vmem:[%s3765_s2 + $0x218] sm:$0xff]  ;;  %v159_v4 = vld [vmem:[%s3765_s2 + $0x220] sm:$0xff] }
  0x18   :  { %68 = vst [vmem:[#allocation4 + $0x488] sm:$0xff] %v67_v22  ;;  %v161_v5 = vld [vmem:[%s3765_s2 + $0x228] sm:$0xff]  ;;  %v163_v6 = vld [vmem:[%s3765_s2 + $0x230] sm:$0xff]  ;;  %v165_v7 = vld [vmem:[%s3765_s2 + $0x238] sm:$0xff] }
  0x19   :  { %70 = vst [vmem:[#allocation4 + $0x738] sm:$0xff] %v69_v23  ;;  %v167_v8 = vld [vmem:[%s3765_s2 + $0x240] sm:$0xff]  ;;  %v169_v9 = vld [vmem:[%s3765_s2 + $0x248] sm:$0xff]  ;;  %v171_v10 = vld [vmem:[%s3765_s2 + $0x250] sm:$0xff] }
  0x1a   :  { %72 = vst [vmem:[#allocation4 + $0x380] sm:$0xff] %v71_v24  ;;  %v173_v11 = vld [vmem:[%s3765_s2 + $0x258] sm:$0xff]  ;;  %v175_v12 = vld [vmem:[%s3765_s2 + $0x260] sm:$0xff]  ;;  %v177_v13 = vld [vmem:[%s3765_s2 + $0x268] sm:$0xff] }
  0x1b   :  { %74 = vst [vmem:[#allocation4 + $0x628] sm:$0xff] %v73_v25  ;;  %v179_v14 = vld [vmem:[%s3765_s2 + $0x270] sm:$0xff]  ;;  %v181_v15 = vld [vmem:[%s3765_s2 + $0x278] sm:$0xff]  ;;  %v183_v16 = vld [vmem:[%s3765_s2 + $0x280] sm:$0xff] }
  0x1c   :  { %76 = vst [vmem:[#allocation4 + $0x378] sm:$0xff] %v75_v26  ;;  %v185_v17 = vld [vmem:[%s3765_s2 + $0x288] sm:$0xff]  ;;  %v187_v18 = vld [vmem:[%s3765_s2 + $0x290] sm:$0xff]  ;;  %v189_v19 = vld [vmem:[%s3765_s2 + $0x298] sm:$0xff] }
  0x1d   :  { %78 = vst [vmem:[#allocation4 + $0x840] sm:$0xff] %v77_v27  ;;  %v191_v20 = vld [vmem:[%s3765_s2 + $0x2a0] sm:$0xff]  ;;  %v193_v21 = vld [vmem:[%s3765_s2 + $0x2a8] sm:$0xff]  ;;  %v195_v22 = vld [vmem:[%s3765_s2 + $0x2b0] sm:$0xff] }
  0x1e   :  { %80 = vst [vmem:[#allocation4 + $0x8] sm:$0xff] %v79_v28  ;;  %v197_v23 = vld [vmem:[%s3765_s2 + $0x2b8] sm:$0xff]  ;;  %v199_v24 = vld [vmem:[%s3765_s2 + $0x2c0] sm:$0xff]  ;;  %v201_v25 = vld [vmem:[%s3765_s2 + $0x2c8] sm:$0xff] }
  0x1f   :  { %82 = vst [vmem:[#allocation4 + $0x858] sm:$0xff] %v81_v29  ;;  %v203_v26 = vld [vmem:[%s3765_s2 + $0x2d0] sm:$0xff]  ;;  %v205_v27 = vld [vmem:[%s3765_s2 + $0x2d8] sm:$0xff]  ;;  %v207_v28 = vld [vmem:[%s3765_s2 + $0x2e0] sm:$0xff] }
  0x20   :  { %84 = vst [vmem:[#allocation4 + $0x280] sm:$0xff] %v83_v30  ;;  %v209_v29 = vld [vmem:[%s3765_s2 + $0x2e8] sm:$0xff]  ;;  %v211_v30 = vld [vmem:[%s3765_s2 + $0x2f0] sm:$0xff] }
  0x21   :  { %86 = vst [vmem:[#allocation4 + $0x660] sm:$0xff] %v85_v31  ;;  %v213_v31 = vld [vmem:[%s3765_s2 + $0x2f8] sm:$0xff] }
  0x22   :  { %88 = vst [vmem:[#allocation4 + $0x558] sm:$0xff] %v87_v32  ;;  %v215_v32 = vld [vmem:[%s3765_s2 + $0x300] sm:$0xff] }
  0x23   :  { %90 = vst [vmem:[#allocation4 + $0x580] sm:$0xff] %v89_v33  ;;  %v217_v33 = vld [vmem:[%s3765_s2 + $0x308] sm:$0xff] }
  0x24   :  { %92 = vst [vmem:[#allocation4 + $0x590] sm:$0xff] %v91_v34  ;;  %v219_v34 = vld [vmem:[%s3765_s2 + $0x310] sm:$0xff] }
  0x25   :  { %94 = vst [vmem:[#allocation4 + $0x708] sm:$0xff] %v93_v35  ;;  %v221_v35 = vld [vmem:[%s3765_s2 + $0x318] sm:$0xff] }
  0x26   :  { %96 = vst [vmem:[#allocation4 + $0x4b8] sm:$0xff] %v95_v36  ;;  %v223_v36 = vld [vmem:[%s3765_s2 + $0x320] sm:$0xff] }
  0x27   :  { %98 = vst [vmem:[#allocation4 + $0x5d8] sm:$0xff] %v97_v37  ;;  %v225_v37 = vld [vmem:[%s3765_s2 + $0x328] sm:$0xff] }
  0x28   :  { %100 = vst [vmem:[#allocation4 + $0x1e8] sm:$0xff] %v99_v38  ;;  %v227_v38 = vld [vmem:[%s3765_s2 + $0x330] sm:$0xff] }
  0x29   :  { %102 = vst [vmem:[#allocation4 + $0x2e0] sm:$0xff] %v101_v39  ;;  %v229_v39 = vld [vmem:[%s3765_s2 + $0x338] sm:$0xff] }
  0x2a   :  { %104 = vst [vmem:[#allocation4 + $0x3b8] sm:$0xff] %v103_v40  ;;  %v231_v40 = vld [vmem:[%s3765_s2 + $0x340] sm:$0xff] }
  0x2b   :  { %106 = vst [vmem:[#allocation4 + $0x838] sm:$0xff] %v105_v41  ;;  %v233_v41 = vld [vmem:[%s3765_s2 + $0x348] sm:$0xff] }
  0x2c   :  { %108 = vst [vmem:[#allocation4 + $0x18] sm:$0xff] %v107_v42  ;;  %v235_v42 = vld [vmem:[%s3765_s2 + $0x350] sm:$0xff] }
  0x2d   :  { %110 = vst [vmem:[#allocation4 + $0x5c0] sm:$0xff] %v109_v43  ;;  %v237_v43 = vld [vmem:[%s3765_s2 + $0x358] sm:$0xff] }
  0x2e   :  { %112 = vst [vmem:[#allocation4 + $0x648] sm:$0xff] %v111_v44  ;;  %v239_v44 = vld [vmem:[%s3765_s2 + $0x360] sm:$0xff] }
  0x2f   :  { %114 = vst [vmem:[#allocation4 + $0x340] sm:$0xff] %v113_v45  ;;  %v241_v45 = vld [vmem:[%s3765_s2 + $0x368] sm:$0xff] }
  0x30   :  { %116 = vst [vmem:[#allocation4 + $0xb0] sm:$0xff] %v115_v46  ;;  %v243_v46 = vld [vmem:[%s3765_s2 + $0x370] sm:$0xff] }
  0x31   :  { %118 = vst [vmem:[#allocation4 + $0xa0] sm:$0xff] %v117_v47  ;;  %v245_v47 = vld [vmem:[%s3765_s2 + $0x378] sm:$0xff] }
  0x32   :  { %120 = vst [vmem:[#allocation4 + $0x2b8] sm:$0xff] %v119_v48  ;;  %v247_v48 = vld [vmem:[%s3765_s2 + $0x380] sm:$0xff] }
  0x33   :  { %122 = vst [vmem:[#allocation4 + $0x3f0] sm:$0xff] %v121_v49  ;;  %v249_v49 = vld [vmem:[%s3765_s2 + $0x388] sm:$0xff] }
  0x34   :  { %124 = vst [vmem:[#allocation4 + $0x3e8] sm:$0xff] %v123_v50  ;;  %v251_v50 = vld [vmem:[%s3765_s2 + $0x390] sm:$0xff] }
  0x35   :  { %126 = vst [vmem:[#allocation4 + $0x4c0] sm:$0xff] %v125_v51  ;;  %v253_v51 = vld [vmem:[%s3765_s2 + $0x398] sm:$0xff] }
  0x36   :  { %128 = vst [vmem:[#allocation4 + $0x338] sm:$0xff] %v127_v52  ;;  %v255_v52 = vld [vmem:[%s3765_s2 + $0x3a0] sm:$0xff] }
  0x37   :  { %130 = vst [vmem:[#allocation4 + $0x4e0] sm:$0xff] %v129_v53  ;;  %v257_v53 = vld [vmem:[%s3765_s2 + $0x3a8] sm:$0xff] }
  0x38   :  { %132 = vst [vmem:[#allocation4 + $0x650] sm:$0xff] %v131_v54  ;;  %v259_v54 = vld [vmem:[%s3765_s2 + $0x3b0] sm:$0xff] }
  0x39   :  { %134 = vst [vmem:[#allocation4 + $0xb8] sm:$0xff] %v133_v55  ;;  %v261_v55 = vld [vmem:[%s3765_s2 + $0x3b8] sm:$0xff] }
  0x3a   :  { %136 = vst [vmem:[#allocation4 + $0xc8] sm:$0xff] %v135_v56  ;;  %v263_v56 = vld [vmem:[%s3765_s2 + $0x3c0] sm:$0xff] }
  0x3b   :  { %138 = vst [vmem:[#allocation4 + $0x510] sm:$0xff] %v137_v57  ;;  %v265_v57 = vld [vmem:[%s3765_s2 + $0x3c8] sm:$0xff] }
  0x3c   :  { %140 = vst [vmem:[#allocation4 + $0x158] sm:$0xff] %v139_v58  ;;  %v267_v58 = vld [vmem:[%s3765_s2 + $0x3d0] sm:$0xff] }
  0x3d   :  { %142 = vst [vmem:[#allocation4 + $0x638] sm:$0xff] %v141_v59  ;;  %v269_v59 = vld [vmem:[%s3765_s2 + $0x3d8] sm:$0xff] }
  0x3e   :  { %144 = vst [vmem:[#allocation4 + $0x328] sm:$0xff] %v143_v60  ;;  %v271_v60 = vld [vmem:[%s3765_s2 + $0x3e0] sm:$0xff] }
  0x3f   :  { %146 = vst [vmem:[#allocation4 + $0x698] sm:$0xff] %v145_v61  ;;  %v273_v61 = vld [vmem:[%s3765_s2 + $0x3e8] sm:$0xff] }
  0x40   :  { %148 = vst [vmem:[#allocation4 + $0x2a0] sm:$0xff] %v147_v62  ;;  %v275_v62 = vld [vmem:[%s3765_s2 + $0x3f0] sm:$0xff] }
  0x41   :  { %150 = vst [vmem:[#allocation4 + $0x58] sm:$0xff] %v149_v63  ;;  %v277_v63 = vld [vmem:[%s3765_s2 + $0x3f8] sm:$0xff] }
  0x42   :  { %152 = vst [vmem:[#allocation4 + $0xe0] sm:$0xff] %v151_v0  ;;  %v279_v0 = vld [vmem:[%s3765_s2 + $0x400] sm:$0xff] }
  0x43   :  { %154 = vst [vmem:[#allocation4 + $0x5a8] sm:$0xff] %v153_v1  ;;  %v281_v1 = vld [vmem:[%s3765_s2 + $0x408] sm:$0xff] }
  0x44   :  { %156 = vst [vmem:[#allocation4 + $0x6e8] sm:$0xff] %v155_v2  ;;  %v283_v2 = vld [vmem:[%s3765_s2 + $0x410] sm:$0xff] }
  0x45   :  { %158 = vst [vmem:[#allocation4 + $0x7e0] sm:$0xff] %v157_v3  ;;  %v285_v3 = vld [vmem:[%s3765_s2 + $0x418] sm:$0xff] }
  0x46   :  { %160 = vst [vmem:[#allocation4 + $0x550] sm:$0xff] %v159_v4  ;;  %v287_v4 = vld [vmem:[%s3765_s2 + $0x420] sm:$0xff] }
  0x47   :  { %162 = vst [vmem:[#allocation4 + $0xd8] sm:$0xff] %v161_v5  ;;  %v289_v5 = vld [vmem:[%s3765_s2 + $0x428] sm:$0xff] }
  0x48   :  { %164 = vst [vmem:[#allocation4 + $0x798] sm:$0xff] %v163_v6  ;;  %v291_v6 = vld [vmem:[%s3765_s2 + $0x430] sm:$0xff] }
  0x49   :  { %166 = vst [vmem:[#allocation4 + $0x130] sm:$0xff] %v165_v7  ;;  %v293_v7 = vld [vmem:[%s3765_s2 + $0x438] sm:$0xff] }
  0x4a   :  { %168 = vst [vmem:[#allocation4 + $0x228] sm:$0xff] %v167_v8  ;;  %v295_v8 = vld [vmem:[%s3765_s2 + $0x440] sm:$0xff] }
  0x4b   :  { %170 = vst [vmem:[#allocation4 + $0x360] sm:$0xff] %v169_v9  ;;  %v297_v9 = vld [vmem:[%s3765_s2 + $0x448] sm:$0xff] }
  0x4c   :  { %172 = vst [vmem:[#allocation4 + $0x190] sm:$0xff] %v171_v10  ;;  %v299_v10 = vld [vmem:[%s3765_s2 + $0x450] sm:$0xff] }
  0x4d   :  { %174 = vst [vmem:[#allocation4 + $0x7c8] sm:$0xff] %v173_v11  ;;  %v301_v11 = vld [vmem:[%s3765_s2 + $0x458] sm:$0xff] }
  0x4e   :  { %176 = vst [vmem:[#allocation4 + $0x848] sm:$0xff] %v175_v12  ;;  %v303_v12 = vld [vmem:[%s3765_s2 + $0x460] sm:$0xff] }
  0x4f   :  { %178 = vst [vmem:[#allocation4 + $0x670] sm:$0xff] %v177_v13  ;;  %v305_v13 = vld [vmem:[%s3765_s2 + $0x468] sm:$0xff] }
  0x50   :  { %180 = vst [vmem:[#allocation4 + $0x390] sm:$0xff] %v179_v14  ;;  %v307_v14 = vld [vmem:[%s3765_s2 + $0x470] sm:$0xff] }
  0x51   :  { %182 = vst [vmem:[#allocation4 + $0x5b0] sm:$0xff] %v181_v15  ;;  %v309_v15 = vld [vmem:[%s3765_s2 + $0x478] sm:$0xff] }
  0x52   :  { %184 = vst [vmem:[#allocation4 + $0x5e8] sm:$0xff] %v183_v16  ;;  %v311_v16 = vld [vmem:[%s3765_s2 + $0x480] sm:$0xff] }
  0x53   :  { %186 = vst [vmem:[#allocation4 + $0x658] sm:$0xff] %v185_v17  ;;  %v313_v17 = vld [vmem:[%s3765_s2 + $0x488] sm:$0xff] }
  0x54   :  { %188 = vst [vmem:[#allocation4 + $0x2e8] sm:$0xff] %v187_v18  ;;  %v315_v18 = vld [vmem:[%s3765_s2 + $0x490] sm:$0xff] }
  0x55   :  { %190 = vst [vmem:[#allocation4 + $0x600] sm:$0xff] %v189_v19  ;;  %v317_v19 = vld [vmem:[%s3765_s2 + $0x498] sm:$0xff] }
  0x56   :  { %192 = vst [vmem:[#allocation4 + $0x368] sm:$0xff] %v191_v20  ;;  %v319_v20 = vld [vmem:[%s3765_s2 + $0x4a0] sm:$0xff] }
  0x57   :  { %194 = vst [vmem:[#allocation4 + $0x248] sm:$0xff] %v193_v21  ;;  %v321_v21 = vld [vmem:[%s3765_s2 + $0x4a8] sm:$0xff] }
  0x58   :  { %196 = vst [vmem:[#allocation4 + $0x6b0] sm:$0xff] %v195_v22  ;;  %v323_v22 = vld [vmem:[%s3765_s2 + $0x4b0] sm:$0xff] }
  0x59   :  { %198 = vst [vmem:[#allocation4 + $0x200] sm:$0xff] %v197_v23  ;;  %v325_v23 = vld [vmem:[%s3765_s2 + $0x4b8] sm:$0xff] }
  0x5a   :  { %200 = vst [vmem:[#allocation4 + $0x458] sm:$0xff] %v199_v24  ;;  %v327_v24 = vld [vmem:[%s3765_s2 + $0x4c0] sm:$0xff] }
  0x5b   :  { %202 = vst [vmem:[#allocation4 + $0x608] sm:$0xff] %v201_v25  ;;  %v329_v25 = vld [vmem:[%s3765_s2 + $0x4c8] sm:$0xff] }
  0x5c   :  { %204 = vst [vmem:[#allocation4 + $0xc0] sm:$0xff] %v203_v26  ;;  %v331_v26 = vld [vmem:[%s3765_s2 + $0x4d0] sm:$0xff] }
  0x5d   :  { %206 = vst [vmem:[#allocation4 + $0x7a0] sm:$0xff] %v205_v27  ;;  %v333_v27 = vld [vmem:[%s3765_s2 + $0x4d8] sm:$0xff] }
  0x5e   :  { %208 = vst [vmem:[#allocation4 + $0x3f8] sm:$0xff] %v207_v28  ;;  %v335_v28 = vld [vmem:[%s3765_s2 + $0x4e0] sm:$0xff] }
  0x5f   :  { %210 = vst [vmem:[#allocation4 + $0x7d0] sm:$0xff] %v209_v29  ;;  %v337_v29 = vld [vmem:[%s3765_s2 + $0x4e8] sm:$0xff] }
  0x60   :  { %212 = vst [vmem:[#allocation4 + $0x490] sm:$0xff] %v211_v30  ;;  %v339_v30 = vld [vmem:[%s3765_s2 + $0x4f0] sm:$0xff] }
  0x61   :  { %214 = vst [vmem:[#allocation4 + $0x50] sm:$0xff] %v213_v31  ;;  %v341_v31 = vld [vmem:[%s3765_s2 + $0x4f8] sm:$0xff] }
  0x62   :  { %216 = vst [vmem:[#allocation4 + $0x318] sm:$0xff] %v215_v32  ;;  %v343_v32 = vld [vmem:[%s3765_s2 + $0x500] sm:$0xff] }
  0x63   :  { %218 = vst [vmem:[#allocation4 + $0x520] sm:$0xff] %v217_v33  ;;  %v345_v33 = vld [vmem:[%s3765_s2 + $0x508] sm:$0xff] }
  0x64   :  { %220 = vst [vmem:[#allocation4 + $0x888] sm:$0xff] %v219_v34  ;;  %v347_v34 = vld [vmem:[%s3765_s2 + $0x510] sm:$0xff] }
  0x65   :  { %222 = vst [vmem:[#allocation4 + $0x570] sm:$0xff] %v221_v35  ;;  %v349_v35 = vld [vmem:[%s3765_s2 + $0x518] sm:$0xff] }
  0x66   :  { %224 = vst [vmem:[#allocation4 + $0x630] sm:$0xff] %v223_v36  ;;  %v351_v36 = vld [vmem:[%s3765_s2 + $0x520] sm:$0xff] }
  0x67   :  { %226 = vst [vmem:[#allocation4 + $0x480] sm:$0xff] %v225_v37  ;;  %v353_v37 = vld [vmem:[%s3765_s2 + $0x528] sm:$0xff] }
  0x68   :  { %228 = vst [vmem:[#allocation4 + $0x820] sm:$0xff] %v227_v38  ;;  %v355_v38 = vld [vmem:[%s3765_s2 + $0x530] sm:$0xff] }
  0x69   :  { %230 = vst [vmem:[#allocation4 + $0x48] sm:$0xff] %v229_v39  ;;  %v357_v39 = vld [vmem:[%s3765_s2 + $0x538] sm:$0xff] }
  0x6a   :  { %232 = vst [vmem:[#allocation4 + $0x7f0] sm:$0xff] %v231_v40  ;;  %v359_v40 = vld [vmem:[%s3765_s2 + $0x540] sm:$0xff] }
  0x6b   :  { %234 = vst [vmem:[#allocation4 + $0x548] sm:$0xff] %v233_v41  ;;  %v361_v41 = vld [vmem:[%s3765_s2 + $0x548] sm:$0xff] }
  0x6c   :  { %236 = vst [vmem:[#allocation4 + $0x5f8] sm:$0xff] %v235_v42  ;;  %v363_v42 = vld [vmem:[%s3765_s2 + $0x550] sm:$0xff] }
  0x6d   :  { %238 = vst [vmem:[#allocation4 + $0x78] sm:$0xff] %v237_v43  ;;  %v365_v43 = vld [vmem:[%s3765_s2 + $0x558] sm:$0xff] }
  0x6e   :  { %240 = vst [vmem:[#allocation4 + $0x870] sm:$0xff] %v239_v44  ;;  %v367_v44 = vld [vmem:[%s3765_s2 + $0x560] sm:$0xff] }
  0x6f   :  { %242 = vst [vmem:[#allocation4 + $0x5b8] sm:$0xff] %v241_v45  ;;  %v369_v45 = vld [vmem:[%s3765_s2 + $0x568] sm:$0xff] }
  0x70   :  { %244 = vst [vmem:[#allocation4 + $0x180] sm:$0xff] %v243_v46  ;;  %v371_v46 = vld [vmem:[%s3765_s2 + $0x570] sm:$0xff] }
  0x71   :  { %246 = vst [vmem:[#allocation4 + $0x1d8] sm:$0xff] %v245_v47  ;;  %v373_v47 = vld [vmem:[%s3765_s2 + $0x578] sm:$0xff] }
  0x72   :  { %248 = vst [vmem:[#allocation4 + $0x20] sm:$0xff] %v247_v48  ;;  %v375_v48 = vld [vmem:[%s3765_s2 + $0x580] sm:$0xff] }
  0x73   :  { %250 = vst [vmem:[#allocation4 + $0xd0] sm:$0xff] %v249_v49  ;;  %v377_v49 = vld [vmem:[%s3765_s2 + $0x588] sm:$0xff] }
  0x74   :  { %252 = vst [vmem:[#allocation4 + $0x240] sm:$0xff] %v251_v50  ;;  %v379_v50 = vld [vmem:[%s3765_s2 + $0x590] sm:$0xff] }
  0x75   :  { %254 = vst [vmem:[#allocation4 + $0x2c0] sm:$0xff] %v253_v51  ;;  %v381_v51 = vld [vmem:[%s3765_s2 + $0x598] sm:$0xff] }
  0x76   :  { %256 = vst [vmem:[#allocation4 + $0x828] sm:$0xff] %v255_v52  ;;  %v383_v52 = vld [vmem:[%s3765_s2 + $0x5a0] sm:$0xff] }
  0x77   :  { %258 = vst [vmem:[#allocation4 + $0x258] sm:$0xff] %v257_v53  ;;  %v385_v53 = vld [vmem:[%s3765_s2 + $0x5a8] sm:$0xff] }
  0x78   :  { %260 = vst [vmem:[#allocation4 + $0x6d8] sm:$0xff] %v259_v54  ;;  %v387_v54 = vld [vmem:[%s3765_s2 + $0x5b0] sm:$0xff] }
  0x79   :  { %262 = vst [vmem:[#allocation4 + $0x5d0] sm:$0xff] %v261_v55  ;;  %v389_v55 = vld [vmem:[%s3765_s2 + $0x5b8] sm:$0xff] }
  0x7a   :  { %264 = vst [vmem:[#allocation4 + $0x6d0] sm:$0xff] %v263_v56  ;;  %v391_v56 = vld [vmem:[%s3765_s2 + $0x5c0] sm:$0xff] }
  0x7b   :  { %266 = vst [vmem:[#allocation4 + $0x418] sm:$0xff] %v265_v57  ;;  %v393_v57 = vld [vmem:[%s3765_s2 + $0x5c8] sm:$0xff] }
  0x7c   :  { %268 = vst [vmem:[#allocation4 + $0x5c8] sm:$0xff] %v267_v58  ;;  %v395_v58 = vld [vmem:[%s3765_s2 + $0x5d0] sm:$0xff] }
  0x7d   :  { %270 = vst [vmem:[#allocation4 + $0x148] sm:$0xff] %v269_v59  ;;  %v397_v59 = vld [vmem:[%s3765_s2 + $0x5d8] sm:$0xff] }
  0x7e   :  { %272 = vst [vmem:[#allocation4 + $0x208] sm:$0xff] %v271_v60  ;;  %v399_v60 = vld [vmem:[%s3765_s2 + $0x5e0] sm:$0xff] }
  0x7f   :  { %274 = vst [vmem:[#allocation4 + $0x1a8] sm:$0xff] %v273_v61  ;;  %v401_v61 = vld [vmem:[%s3765_s2 + $0x5e8] sm:$0xff] }
  0x80   :  { %276 = vst [vmem:[#allocation4 + $0xa8] sm:$0xff] %v275_v62  ;;  %v403_v62 = vld [vmem:[%s3765_s2 + $0x5f0] sm:$0xff] }
  0x81   :  { %278 = vst [vmem:[#allocation4 + $0x610] sm:$0xff] %v277_v63  ;;  %v405_v63 = vld [vmem:[%s3765_s2 + $0x5f8] sm:$0xff] }
  0x82   :  { %280 = vst [vmem:[#allocation4 + $0x690] sm:$0xff] %v279_v0  ;;  %v407_v0 = vld [vmem:[%s3765_s2 + $0x600] sm:$0xff] }
  0x83   :  { %282 = vst [vmem:[#allocation4 + $0x710] sm:$0xff] %v281_v1  ;;  %v409_v1 = vld [vmem:[%s3765_s2 + $0x608] sm:$0xff] }
  0x84   :  { %284 = vst [vmem:[#allocation4 + $0x400] sm:$0xff] %v283_v2  ;;  %v411_v2 = vld [vmem:[%s3765_s2 + $0x610] sm:$0xff] }
  0x85   :  { %286 = vst [vmem:[#allocation4 + $0x1f0] sm:$0xff] %v285_v3  ;;  %v413_v3 = vld [vmem:[%s3765_s2 + $0x618] sm:$0xff] }
  0x86   :  { %288 = vst [vmem:[#allocation4 + $0x30] sm:$0xff] %v287_v4  ;;  %v415_v4 = vld [vmem:[%s3765_s2 + $0x620] sm:$0xff] }
  0x87   :  { %290 = vst [vmem:[#allocation4 + $0x450] sm:$0xff] %v289_v5  ;;  %v417_v5 = vld [vmem:[%s3765_s2 + $0x628] sm:$0xff] }
  0x88   :  { %292 = vst [vmem:[#allocation4 + $0x88] sm:$0xff] %v291_v6  ;;  %v419_v6 = vld [vmem:[%s3765_s2 + $0x630] sm:$0xff] }
  0x89   :  { %294 = vst [vmem:[#allocation4 + $0x3c0] sm:$0xff] %v293_v7  ;;  %v421_v7 = vld [vmem:[%s3765_s2 + $0x638] sm:$0xff] }
  0x8a   :  { %296 = vst [vmem:[#allocation4 + $0x498] sm:$0xff] %v295_v8  ;;  %v423_v8 = vld [vmem:[%s3765_s2 + $0x640] sm:$0xff] }
  0x8b   :  { %298 = vst [vmem:[#allocation4 + $0x198] sm:$0xff] %v297_v9  ;;  %v425_v9 = vld [vmem:[%s3765_s2 + $0x648] sm:$0xff] }
  0x8c   :  { %300 = vst [vmem:[#allocation4 + $0x28] sm:$0xff] %v299_v10  ;;  %v427_v10 = vld [vmem:[%s3765_s2 + $0x650] sm:$0xff] }
  0x8d   :  { %302 = vst [vmem:[#allocation4 + $0x728] sm:$0xff] %v301_v11  ;;  %v429_v11 = vld [vmem:[%s3765_s2 + $0x658] sm:$0xff] }
  0x8e   :  { %304 = vst [vmem:[#allocation4 + $0x1b0] sm:$0xff] %v303_v12  ;;  %v431_v12 = vld [vmem:[%s3765_s2 + $0x660] sm:$0xff] }
  0x8f   :  { %306 = vst [vmem:[#allocation4 + $0x500] sm:$0xff] %v305_v13  ;;  %v433_v13 = vld [vmem:[%s3765_s2 + $0x668] sm:$0xff] }
  0x90   :  { %308 = vst [vmem:[#allocation4 + $0x140] sm:$0xff] %v307_v14  ;;  %v435_v14 = vld [vmem:[%s3765_s2 + $0x670] sm:$0xff] }
  0x91   :  { %310 = vst [vmem:[#allocation4 + $0x420] sm:$0xff] %v309_v15  ;;  %v437_v15 = vld [vmem:[%s3765_s2 + $0x678] sm:$0xff] }
  0x92   :  { %312 = vst [vmem:[#allocation4 + $0x5a0] sm:$0xff] %v311_v16  ;;  %v439_v16 = vld [vmem:[%s3765_s2 + $0x680] sm:$0xff] }
  0x93   :  { %314 = vst [vmem:[#allocation4 + $0x760] sm:$0xff] %v313_v17  ;;  %v441_v17 = vld [vmem:[%s3765_s2 + $0x688] sm:$0xff] }
  0x94   :  { %316 = vst [vmem:[#allocation4 + $0x3d8] sm:$0xff] %v315_v18  ;;  %v443_v18 = vld [vmem:[%s3765_s2 + $0x690] sm:$0xff] }
  0x95   :  { %318 = vst [vmem:[#allocation4 + $0x4f0] sm:$0xff] %v317_v19  ;;  %v445_v19 = vld [vmem:[%s3765_s2 + $0x698] sm:$0xff] }
  0x96   :  { %320 = vst [vmem:[#allocation4 + $0x220] sm:$0xff] %v319_v20  ;;  %v447_v20 = vld [vmem:[%s3765_s2 + $0x6a0] sm:$0xff] }
  0x97   :  { %322 = vst [vmem:[#allocation4 + $0x620] sm:$0xff] %v321_v21  ;;  %v449_v21 = vld [vmem:[%s3765_s2 + $0x6a8] sm:$0xff] }
  0x98   :  { %324 = vst [vmem:[#allocation4 + $0x168] sm:$0xff] %v323_v22  ;;  %v451_v22 = vld [vmem:[%s3765_s2 + $0x6b0] sm:$0xff] }
  0x99   :  { %326 = vst [vmem:[#allocation4 + $0x3d0] sm:$0xff] %v325_v23  ;;  %v453_v23 = vld [vmem:[%s3765_s2 + $0x6b8] sm:$0xff] }
  0x9a   :  { %328 = vst [vmem:[#allocation4 + $0x6c8] sm:$0xff] %v327_v24  ;;  %v455_v24 = vld [vmem:[%s3765_s2 + $0x6c0] sm:$0xff] }
  0x9b   :  { %330 = vst [vmem:[#allocation4 + $0x1d0] sm:$0xff] %v329_v25  ;;  %v457_v25 = vld [vmem:[%s3765_s2 + $0x6c8] sm:$0xff] }
  0x9c   :  { %332 = vst [vmem:[#allocation4 + $0x68] sm:$0xff] %v331_v26  ;;  %v459_v26 = vld [vmem:[%s3765_s2 + $0x6d0] sm:$0xff] }
  0x9d   :  { %334 = vst [vmem:[#allocation4 + $0x720] sm:$0xff] %v333_v27  ;;  %v461_v27 = vld [vmem:[%s3765_s2 + $0x6d8] sm:$0xff] }
  0x9e   :  { %336 = vst [vmem:[#allocation4 + $0x288] sm:$0xff] %v335_v28  ;;  %v463_v28 = vld [vmem:[%s3765_s2 + $0x6e0] sm:$0xff] }
  0x9f   :  { %338 = vst [vmem:[#allocation4 + $0x528] sm:$0xff] %v337_v29  ;;  %v465_v29 = vld [vmem:[%s3765_s2 + $0x6e8] sm:$0xff] }
  0xa0   :  { %340 = vst [vmem:[#allocation4 + $0x98] sm:$0xff] %v339_v30  ;;  %v467_v30 = vld [vmem:[%s3765_s2 + $0x6f0] sm:$0xff] }
  0xa1   :  { %342 = vst [vmem:[#allocation4 + $0x100] sm:$0xff] %v341_v31  ;;  %v469_v31 = vld [vmem:[%s3765_s2 + $0x6f8] sm:$0xff] }
  0xa2   :  { %344 = vst [vmem:[#allocation4 + $0x468] sm:$0xff] %v343_v32  ;;  %v471_v32 = vld [vmem:[%s3765_s2 + $0x700] sm:$0xff] }
  0xa3   :  { %346 = vst [vmem:[#allocation4 + $0x4a8] sm:$0xff] %v345_v33  ;;  %v473_v33 = vld [vmem:[%s3765_s2 + $0x708] sm:$0xff] }
  0xa4   :  { %348 = vst [vmem:[#allocation4 + $0x128] sm:$0xff] %v347_v34  ;;  %v475_v34 = vld [vmem:[%s3765_s2 + $0x710] sm:$0xff] }
  0xa5   :  { %350 = vst [vmem:[#allocation4 + $0x370] sm:$0xff] %v349_v35  ;;  %v477_v35 = vld [vmem:[%s3765_s2 + $0x718] sm:$0xff] }
  0xa6   :  { %352 = vst [vmem:[#allocation4 + $0x2d0] sm:$0xff] %v351_v36  ;;  %v479_v36 = vld [vmem:[%s3765_s2 + $0x720] sm:$0xff] }
  0xa7   :  { %354 = vst [vmem:[#allocation4 + $0x398] sm:$0xff] %v353_v37  ;;  %v481_v37 = vld [vmem:[%s3765_s2 + $0x728] sm:$0xff] }
  0xa8   :  { %356 = vst [vmem:[#allocation4 + $0x80] sm:$0xff] %v355_v38  ;;  %v483_v38 = vld [vmem:[%s3765_s2 + $0x730] sm:$0xff] }
  0xa9   :  { %358 = vst [vmem:[#allocation4 + $0x4e8] sm:$0xff] %v357_v39  ;;  %v485_v39 = vld [vmem:[%s3765_s2 + $0x738] sm:$0xff] }
  0xaa   :  { %360 = vst [vmem:[#allocation4 + $0x70] sm:$0xff] %v359_v40  ;;  %v487_v40 = vld [vmem:[%s3765_s2 + $0x740] sm:$0xff] }
  0xab   :  { %362 = vst [vmem:[#allocation4 + $0x740] sm:$0xff] %v361_v41  ;;  %v489_v41 = vld [vmem:[%s3765_s2 + $0x748] sm:$0xff] }
  0xac   :  { %364 = vst [vmem:[#allocation4 + $0x1b8] sm:$0xff] %v363_v42  ;;  %v491_v42 = vld [vmem:[%s3765_s2 + $0x750] sm:$0xff] }
  0xad   :  { %366 = vst [vmem:[#allocation4 + $0x10] sm:$0xff] %v365_v43  ;;  %v493_v43 = vld [vmem:[%s3765_s2 + $0x758] sm:$0xff] }
  0xae   :  { %368 = vst [vmem:[#allocation4 + $0x278] sm:$0xff] %v367_v44  ;;  %v495_v44 = vld [vmem:[%s3765_s2 + $0x760] sm:$0xff] }
  0xaf   :  { %370 = vst [vmem:[#allocation4 + $0x350] sm:$0xff] %v369_v45  ;;  %v497_v45 = vld [vmem:[%s3765_s2 + $0x768] sm:$0xff] }
  0xb0   :  { %372 = vst [vmem:[#allocation4 + $0x830] sm:$0xff] %v371_v46  ;;  %v499_v46 = vld [vmem:[%s3765_s2 + $0x770] sm:$0xff] }
  0xb1   :  { %374 = vst [vmem:[#allocation4 + $0x410] sm:$0xff] %v373_v47  ;;  %v501_v47 = vld [vmem:[%s3765_s2 + $0x778] sm:$0xff] }
  0xb2   :  { %376 = vst [vmem:[#allocation4 + $0x680] sm:$0xff] %v375_v48  ;;  %v503_v48 = vld [vmem:[%s3765_s2 + $0x780] sm:$0xff] }
  0xb3   :  { %378 = vst [vmem:[#allocation4 + $0x818] sm:$0xff] %v377_v49  ;;  %v505_v49 = vld [vmem:[%s3765_s2 + $0x788] sm:$0xff] }
  0xb4   :  { %380 = vst [vmem:[#allocation4 + $0x790] sm:$0xff] %v379_v50  ;;  %v507_v50 = vld [vmem:[%s3765_s2 + $0x790] sm:$0xff] }
  0xb5   :  { %382 = vst [vmem:[#allocation4 + $0x270] sm:$0xff] %v381_v51  ;;  %v509_v51 = vld [vmem:[%s3765_s2 + $0x798] sm:$0xff] }
  0xb6   :  { %384 = vst [vmem:[#allocation4 + $0x850] sm:$0xff] %v383_v52  ;;  %v511_v52 = vld [vmem:[%s3765_s2 + $0x7a0] sm:$0xff] }
  0xb7   :  { %386 = vst [vmem:[#allocation4 + $0x38] sm:$0xff] %v385_v53  ;;  %v513_v53 = vld [vmem:[%s3765_s2 + $0x7a8] sm:$0xff] }
  0xb8   :  { %388 = vst [vmem:[#allocation4 + $0x188] sm:$0xff] %v387_v54  ;;  %v515_v54 = vld [vmem:[%s3765_s2 + $0x7b0] sm:$0xff] }
  0xb9   :  { %390 = vst [vmem:[#allocation4 + $0x268] sm:$0xff] %v389_v55  ;;  %v517_v55 = vld [vmem:[%s3765_s2 + $0x7b8] sm:$0xff] }
  0xba   :  { %392 = vst [vmem:[#allocation4 + $0x230] sm:$0xff] %v391_v56  ;;  %v519_v56 = vld [vmem:[%s3765_s2 + $0x7c0] sm:$0xff] }
  0xbb   :  { %394 = vst [vmem:[#allocation4 + $0x1c0] sm:$0xff] %v393_v57  ;;  %v521_v57 = vld [vmem:[%s3765_s2 + $0x7c8] sm:$0xff] }
  0xbc   :  { %396 = vst [vmem:[#allocation4 + $0x2a8] sm:$0xff] %v395_v58  ;;  %v523_v58 = vld [vmem:[%s3765_s2 + $0x7d0] sm:$0xff] }
  0xbd   :  { %398 = vst [vmem:[#allocation4 + $0x428] sm:$0xff] %v397_v59  ;;  %v525_v59 = vld [vmem:[%s3765_s2 + $0x7d8] sm:$0xff] }
  0xbe   :  { %400 = vst [vmem:[#allocation4 + $0x348] sm:$0xff] %v399_v60  ;;  %v527_v60 = vld [vmem:[%s3765_s2 + $0x7e0] sm:$0xff] }
  0xbf   :  { %402 = vst [vmem:[#allocation4 + $0x730] sm:$0xff] %v401_v61  ;;  %v529_v61 = vld [vmem:[%s3765_s2 + $0x7e8] sm:$0xff] }
  0xc0   :  { %404 = vst [vmem:[#allocation4 + $0x7b8] sm:$0xff] %v403_v62  ;;  %v531_v62 = vld [vmem:[%s3765_s2 + $0x7f0] sm:$0xff] }
  0xc1   :  { %406 = vst [vmem:[#allocation4 + $0x300] sm:$0xff] %v405_v63  ;;  %v533_v63 = vld [vmem:[%s3765_s2 + $0x7f8] sm:$0xff] }
  0xc2   :  { %408 = vst [vmem:[#allocation4 + $0x170] sm:$0xff] %v407_v0  ;;  %v535_v0 = vld [vmem:[%s3765_s2 + $0x800] sm:$0xff] }
  0xc3   :  { %410 = vst [vmem:[#allocation4 + $0x388] sm:$0xff] %v409_v1  ;;  %v537_v1 = vld [vmem:[%s3765_s2 + $0x808] sm:$0xff] }
  0xc4   :  { %412 = vst [vmem:[#allocation4 + $0x688] sm:$0xff] %v411_v2  ;;  %v539_v2 = vld [vmem:[%s3765_s2 + $0x810] sm:$0xff] }
  0xc5   :  { %414 = vst [vmem:[#allocation4 + $0x40] sm:$0xff] %v413_v3  ;;  %v541_v3 = vld [vmem:[%s3765_s2 + $0x818] sm:$0xff] }
  0xc6   :  { %416 = vst [vmem:[#allocation4 + $0x440] sm:$0xff] %v415_v4  ;;  %v543_v4 = vld [vmem:[%s3765_s2 + $0x820] sm:$0xff] }
  0xc7   :  { %418 = vst [vmem:[#allocation4 + $0x138] sm:$0xff] %v417_v5  ;;  %v545_v5 = vld [vmem:[%s3765_s2 + $0x828] sm:$0xff] }
  0xc8   :  { %420 = vst [vmem:[#allocation4 + $0x560] sm:$0xff] %v419_v6  ;;  %v547_v6 = vld [vmem:[%s3765_s2 + $0x830] sm:$0xff] }
  0xc9   :  { %422 = vst [vmem:[#allocation4 + $0x1f8] sm:$0xff] %v421_v7  ;;  %v549_v7 = vld [vmem:[%s3765_s2 + $0x838] sm:$0xff] }
  0xca   :  { %424 = vst [vmem:[#allocation4 + $0x478] sm:$0xff] %v423_v8  ;;  %v551_v8 = vld [vmem:[%s3765_s2 + $0x840] sm:$0xff] }
  0xcb   :  { %426 = vst [vmem:[#allocation4 + $0x2b0] sm:$0xff] %v425_v9  ;;  %v553_v9 = vld [vmem:[%s3765_s2 + $0x848] sm:$0xff] }
  0xcc   :  { %428 = vst [vmem:[#allocation4 + $0x290] sm:$0xff] %v427_v10  ;;  %v555_v10 = vld [vmem:[%s3765_s2 + $0x850] sm:$0xff] }
  0xcd   :  { %430 = vst [vmem:[#allocation4 + $0x518] sm:$0xff] %v429_v11  ;;  %v557_v11 = vld [vmem:[%s3765_s2 + $0x858] sm:$0xff] }
  0xce   :  { %432 = vst [vmem:[#allocation4 + $0x358] sm:$0xff] %v431_v12  ;;  %v559_v12 = vld [vmem:[%s3765_s2 + $0x860] sm:$0xff] }
  0xcf   :  { %434 = vst [vmem:[#allocation4 + $0x308] sm:$0xff] %v433_v13  ;;  %v561_v13 = vld [vmem:[%s3765_s2 + $0x868] sm:$0xff] }
  0xd0   :  { %436 = vst [vmem:[#allocation4 + $0x508] sm:$0xff] %v435_v14  ;;  %v563_v14 = vld [vmem:[%s3765_s2 + $0x870] sm:$0xff] }
  0xd1   :  { %438 = vst [vmem:[#allocation4 + $0x108] sm:$0xff] %v437_v15  ;;  %v565_v15 = vld [vmem:[%s3765_s2 + $0x878] sm:$0xff] }
  0xd2   :  { %440 = vst [vmem:[#allocation4 + $0x4f8] sm:$0xff] %v439_v16  ;;  %v567_v16 = vld [vmem:[%s3765_s2 + $0x880] sm:$0xff] }
  0xd3   :  { %442 = vst [vmem:[#allocation4 + $0x150] sm:$0xff] %v441_v17  ;;  %v569_v17 = vld [vmem:[%s3765_s2 + $0x888] sm:$0xff] }
  0xd4   :  { %444 = vst [vmem:[#allocation4 + $0xe8] sm:$0xff] %v443_v18 }
  0xd5   :  { %446 = vst [vmem:[#allocation4 + $0x60] sm:$0xff] %v445_v19 }
  0xd6   :  { %448 = vst [vmem:[#allocation4 + $0x120] sm:$0xff] %v447_v20 }
  0xd7   :  { %450 = vst [vmem:[#allocation4 + $0x618] sm:$0xff] %v449_v21 }
  0xd8   :  { %452 = vst [vmem:[#allocation4 + $0x3e0] sm:$0xff] %v451_v22 }
  0xd9   :  { %454 = vst [vmem:[#allocation4 + $0x218] sm:$0xff] %v453_v23 }
  0xda   :  { %456 = vst [vmem:[#allocation4 + $0x7d8] sm:$0xff] %v455_v24 }
  0xdb   :  { %458 = vst [vmem:[#allocation4 + $0x6a8] sm:$0xff] %v457_v25 }
  0xdc   :  { %460 = vst [vmem:[#allocation4 + $0x6f0] sm:$0xff] %v459_v26 }
  0xdd   :  { %462 = vst [vmem:[#allocation4 + $0x780] sm:$0xff] %v461_v27 }
  0xde   :  { %464 = vst [vmem:[#allocation4 + $0x640] sm:$0xff] %v463_v28 }
  0xdf   :  { %466 = vst [vmem:[#allocation4 + $0x678] sm:$0xff] %v465_v29 }
  0xe0   :  { %468 = vst [vmem:[#allocation4 + $0x5e0] sm:$0xff] %v467_v30 }
  0xe1   :  { %470 = vst [vmem:[#allocation4 + $0x238] sm:$0xff] %v469_v31 }
  0xe2   :  { %472 = vst [vmem:[#allocation4 + $0x750] sm:$0xff] %v471_v32 }
  0xe3   :  { %474 = vst [vmem:[#allocation4 + $0x4d0] sm:$0xff] %v473_v33 }
  0xe4   :  { %476 = vst [vmem:[#allocation4 + $0x7a8] sm:$0xff] %v475_v34 }
  0xe5   :  { %478 = vst [vmem:[#allocation4 + $0x1c8] sm:$0xff] %v477_v35 }
  0xe6   :  { %480 = vst [vmem:[#allocation4 + $0x90] sm:$0xff] %v479_v36 }
  0xe7   :  { %482 = vst [vmem:[#allocation4 + $0x768] sm:$0xff] %v481_v37 }
  0xe8   :  { %484 = vst [vmem:[#allocation4 + $0x598] sm:$0xff] %v483_v38 }
  0xe9   :  { %486 = vst [vmem:[#allocation4 + $0x540] sm:$0xff] %v485_v39 }
  0xea   :  { %488 = vst [vmem:[#allocation4 + $0x118] sm:$0xff] %v487_v40 }
  0xeb   :  { %490 = vst [vmem:[#allocation4 + $0x110] sm:$0xff] %v489_v41 }
  0xec   :  { %492 = vst [vmem:[#allocation4 + $0xf8] sm:$0xff] %v491_v42 }
  0xed   :  { %494 = vst [vmem:[#allocation4 + $0xf0] sm:$0xff] %v493_v43 }
  0xee   :  { %496 = vst [vmem:[#allocation4 + $0x868] sm:$0xff] %v495_v44 }
  0xef   :  { %498 = vst [vmem:[#allocation4 + $0x460] sm:$0xff] %v497_v45 }
  0xf0   :  { %500 = vst [vmem:[#allocation4 + $0x3b0] sm:$0xff] %v499_v46 }
  0xf1   :  { %502 = vst [vmem:[#allocation4 + $0x6f8] sm:$0xff] %v501_v47 }
  0xf2   :  { %504 = vst [vmem:[#allocation4 + $0x718] sm:$0xff] %v503_v48 }
  0xf3   :  { %506 = vst [vmem:[#allocation4 + $0x810] sm:$0xff] %v505_v49 }
  0xf4   :  { %508 = vst [vmem:[#allocation4 + $0x298] sm:$0xff] %v507_v50 }
  0xf5   :  { %510 = vst [vmem:[#allocation4 + $0x210] sm:$0xff] %v509_v51 }
  0xf6   :  { %512 = vst [vmem:[#allocation4 + $0x3c8] sm:$0xff] %v511_v52 }
  0xf7   :  { %514 = vst [vmem:[#allocation4 + $0x310] sm:$0xff] %v513_v53 }
  0xf8   :  { %516 = vst [vmem:[#allocation4 + $0x4d8] sm:$0xff] %v515_v54 }
  0xf9   :  { %518 = vst [vmem:[#allocation4 + $0x668] sm:$0xff] %v517_v55 }
  0xfa   :  { %520 = vst [vmem:[#allocation4 + $0x7b0] sm:$0xff] %v519_v56 }
  0xfb   :  { %522 = vst [vmem:[#allocation4 + $0x260] sm:$0xff] %v521_v57 }
  0xfc   :  { %524 = vst [vmem:[#allocation4 + $0x160] sm:$0xff] %v523_v58 }
  0xfd   :  { %526 = vst [vmem:[#allocation4 + $0x878] sm:$0xff] %v525_v59 }
  0xfe   :  { %528 = vst [vmem:[#allocation4 + $0x1a0] sm:$0xff] %v527_v60 }
  0xff   :  { %530 = vst [vmem:[#allocation4 + $0x2d8] sm:$0xff] %v529_v61 }
 0x100   :  { %532 = vst [vmem:[#allocation4 + $0x6c0] sm:$0xff] %v531_v62 }
 0x101   :  { %534 = vst [vmem:[#allocation4 + $0x470] sm:$0xff] %v533_v63 }
 0x102   :  { %536 = vst [vmem:[#allocation4 + $0x2c8] sm:$0xff] %v535_v0 }
 0x103   :  { %538 = vst [vmem:[#allocation4 + $0x4b0] sm:$0xff] %v537_v1 }
 0x104   :  { %540 = vst [vmem:[#allocation4 + $0x6b8] sm:$0xff] %v539_v2 }
 0x105   :  { %542 = vst [vmem:[#allocation4 + $0x4a0] sm:$0xff] %v541_v3 }
 0x106   :  { %544 = vst [vmem:[#allocation4 + $0x860] sm:$0xff] %v543_v4 }
 0x107   :  { %546 = vst [vmem:[#allocation4 + $0x330] sm:$0xff] %v545_v5 }
 0x108   :  { %548 = vst [vmem:[#allocation4 + $0x408] sm:$0xff] %v547_v6 }
 0x109   :  { %550 = vst [vmem:[#allocation4 + $0x1e0] sm:$0xff] %v549_v7 }
 0x10a   :  { %552 = vst [vmem:[#allocation4 + $0x530] sm:$0xff] %v551_v8 }
 0x10b   :  { %554 = vst [vmem:[#allocation4 + $0x3a8] sm:$0xff] %v553_v9 }
 0x10c   :  { %556 = vst [vmem:[#allocation4 + $0x770] sm:$0xff] %v555_v10 }
 0x10d   :  { %558 = vst [vmem:[#allocation4 + $0x788] sm:$0xff] %v557_v11 }
 0x10e   :  { %560 = vst [vmem:[#allocation4 + $0x2f0] sm:$0xff] %v559_v12 }
 0x10f   :  { %562 = vst [vmem:[#allocation4 + $0x250] sm:$0xff] %v561_v13 }
 0x110   :  { %564 = vst [vmem:[#allocation4 + $0x178] sm:$0xff] %v563_v14 }
 0x111   :  { %566 = vst [vmem:[#allocation4 + $0x448] sm:$0xff] %v565_v15 }
 0x112   :  { %568 = vst [vmem:[#allocation4 + $0x538] sm:$0xff] %v567_v16 }
 0x113   :  { %570 = vst [vmem:[#allocation4 + $0x5f0] sm:$0xff] %v569_v17 }
 0x114   :  { %576 = vsyncadd [#allocation5], 35072  ;;  %v3110_v18 = vld [vmem:[%s3763_s0 + $0xa8] sm:$0xff]  ;;  %v3115_v19 = vld [vmem:[%s3763_s0 + $0xb0] sm:$0xff]  ;;  %v2260_v26 = vmov 64   ;;  %vm612_vm0 = vcmask 523264  }
 0x115   :  { %625 = vmatpush.msra.mxu1 %v3110_v18  ;;  %695 = vmatpush.msra.mxu2 %v3115_v19  ;;  %v3122_v20 = vld [vmem:[%s3763_s0 + $0xb4] sm:$0xff]  ;;  %v3138_v23 = vld [vmem:[%s3763_s0 + $0x9c] sm:$0xff]  ;;  %v3155_v27 = vld [vmem:[%s3763_s0 + $0x84] sm:$0xff] }
 0x116   :  { %v3127_v21 = vld [vmem:[%s3763_s0 + $0x90] sm:$0xff]  ;;  %v3132_v22 = vld [vmem:[%s3763_s0 + $0x98] sm:$0xff]  ;;  %730 = vmatpush.msra.mxu3 %v3122_v20  ;;  %v3148_v25 = vld [vmem:[%s3763_s0 + $0x80] sm:$0xff]  ;;  %2217 = vset.pattern.permute.xlu0 %v2260_v26 }
 0x117   :  { %v3143_v24 = vld [vmem:[%s3763_s0 + $0x78] sm:$0xff]  ;;  %626 = vmatpush.msra.mxu1 %v3127_v21  ;;  %696 = vmatpush.msra.mxu2 %v3132_v22  ;;  %v3161_v28 = vld [vmem:[%s3763_s0 + $0x60] sm:$0xff]  ;;  %v3166_v29 = vld [vmem:[%s3763_s0 + $0x68] sm:$0xff] }
 0x118   :  { %731 = vmatpush.msra.mxu3 %v3138_v23  ;;  %v3173_v30 = vld [vmem:[%s3763_s0 + $0x6c] sm:$0xff]  ;;  %v2084_v33 = vld [vmem:[%s3763_s0 + $0x54] sm:$0xff]  ;;  %v2083_v36 = vld [vmem:[%s3763_s0 + $0x3c] sm:$0xff] }
 0x119   :  { %627 = vmatpush.msra.mxu1 %v3143_v24  ;;  %697 = vmatpush.msra.mxu2 %v3148_v25  ;;  %v2057_v31 = vld [vmem:[%s3763_s0 + $0x48] sm:$0xff]  ;;  %v2075_v32 = vld [vmem:[%s3763_s0 + $0x50] sm:$0xff]  ;;  %v2074_v35 = vld [vmem:[%s3763_s0 + $0x38] sm:$0xff] }
 0x11a   :  { %732 = vmatpush.msra.mxu3 %v3155_v27  ;;  %v2056_v34 = vld [vmem:[%s3763_s0 + $0x30] sm:$0xff]  ;;  %v3200_v37 = vld [vmem:[%s3763_s0 + $0x108] sm:$0xff]  ;;  %v2055_v38 = vld [vmem:[%s3763_s0 + $0x18] sm:$0xff] }
 0x11b   :  { %628 = vmatpush.msra.mxu1 %v3161_v28  ;;  %698 = vmatpush.msra.mxu2 %v3166_v29  ;;  %v2073_v39 = vld [vmem:[%s3763_s0 + $0x20] sm:$0xff]  ;;  %v3212_v40 = vld [vmem:[%s3763_s0 + $0xf0] sm:$0xff]  ;;  %v679_v44 = vld [vmem:[%s3763_s0 + $0x8] sm:$0xff] }
 0x11c   :  { %733 = vmatpush.msra.mxu3 %v3173_v30  ;;  %769 = vmatpush.msra.mxu0 %v3200_v37  ;;  %v2082_v41 = vld [vmem:[%s3763_s0 + $0x24] sm:$0xff]  ;;  %v3220_v42 = vld [vmem:[%s3764_s1 + $0x50] sm:$0xff]  ;;  %v3266_v51 = vld [vmem:[%s3763_s0 + $0xf8] sm:$0xff] }
 0x11d   :  { %629 = vmatpush.msra.mxu1 %v2057_v31  ;;  %699 = vmatpush.msra.mxu2 %v2075_v32  ;;  %v587_v43 = vld [vmem:[%s3763_s0] sm:$0xff]  ;;  %v714_v45 = vld [vmem:[%s3763_s0 + $0xc] sm:$0xff]  ;;  %v3253_v49 = vld [vmem:[%s3763_s0 + $0x114] sm:$0xff] }
 0x11e   :  { %734 = vmatpush.msra.mxu3 %v2084_v33  ;;  %770 = vmatpush.msra.mxu0 %v3212_v40  ;;  %v3235_v46 = vld [vmem:[%s3764_s1 + $0x40] sm:$0xff]  ;;  %v3240_v47 = vld [vmem:[%s3763_s0 + $0xac] sm:$0xff]  ;;  %v3258_v50 = vld [vmem:[%s3763_s0 + $0x94] sm:$0xff] }
 0x11f   :  { %630 = vmatpush.msra.mxu1 %v2056_v34  ;;  %700 = vmatpush.msra.mxu2 %v2074_v35  ;;  %v3246_v48 = vld [vmem:[%s3763_s0 + $0x110] sm:$0xff]  ;;  %v3271_v52 = vld [vmem:[%s3763_s0 + $0xd8] sm:$0xff]  ;;  %v3291_v55 = vld [vmem:[%s3763_s0 + $0xe0] sm:$0xff] }
 0x120   :  { %735 = vmatpush.msra.mxu3 %v2083_v36  ;;  %609 = vperm.xlu0 %2217, %v3220_v42   ;;  %v3279_v53 = vld [vmem:[%s3763_s0 + $0xfc] sm:$0xff]  ;;  %v3303_v57 = vld [vmem:[%s3763_s0 + $0xe4] sm:$0xff]  ;;  %v3322_v60 = vld [vmem:[%s3763_s0 + $0xcc] sm:$0xff] }
 0x121   :  { %631 = vmatpush.msra.mxu1 %v2055_v38  ;;  %701 = vmatpush.msra.mxu2 %v2073_v39  ;;  %v3284_v54 = vld [vmem:[%s3763_s0 + $0x7c] sm:$0xff]  ;;  %v3308_v58 = vld [vmem:[%s3763_s0 + $0x64] sm:$0xff]  ;;  %v2066_v61 = vld [vmem:[%s3763_s0 + $0x4c] sm:$0xff] }
 0x122   :  { %736 = vmatpush.msra.mxu3 %v2082_v41  ;;  %v3296_v56 = vld [vmem:[%s3763_s0 + $0xc0] sm:$0xff]  ;;  %771 = vmatpush.msra.mxu0 %v3271_v52  ;;  %v3315_v59 = vld [vmem:[%s3763_s0 + $0xc8] sm:$0xff]  ;;  %v2065_v62 = vld [vmem:[%s3763_s0 + $0x34] sm:$0xff] }
 0x123   :  { %632 = vmatpush.msra.mxu1 %v587_v43  ;;  %702 = vmatpush.msra.mxu2 %v679_v44  ;;  %v2064_v63 = vld [vmem:[%s3763_s0 + $0x1c] sm:$0xff]  ;;  %v644_v0 = vld [vmem:[%s3763_s0 + $0x4] sm:$0xff]  ;;  %v3360_v1 = vld [vmem:[%s3763_s0 + $0x10c] sm:$0xff] }
 0x124   :  { %737 = vmatpush.msra.mxu3 %v714_v45  ;;  %2062 = vmatmul.msk.f32.vlgmr.msra.gmra.mxu1 %vm612_vm0, %v3235_v46  ;;  %v3367_v2 = vld [vmem:[%s3763_s0 + $0x168] sm:$0xff]  ;;  %v3376_v3 = vld [vmem:[%s3763_s0 + $0x170] sm:$0xff]  ;;  %v3402_v7 = vld [vmem:[%s3763_s0 + $0x158] sm:$0xff] }
 0x125   :  { %660 = vmatpush.msrb.mxu1 %v3240_v47  ;;  %2080 = vmatmul.msk.f32.vlgmr.msra.gmra.mxu2 %vm612_vm0, %v3235_v46  ;;  %v3381_v4 = vld [vmem:[%s3763_s0 + $0x174] sm:$0xff]  ;;  %v3407_v8 = vld [vmem:[%s3763_s0 + $0x15c] sm:$0xff]  ;;  %v3431_v12 = vld [vmem:[%s3763_s0 + $0x144] sm:$0xff] }
 0x126   :  { %2089 = vmatmul.msk.f32.vlgmr.msra.gmra.mxu3 %vm612_vm0, %v3235_v46  ;;  %839 = vmatpush.msrb.mxu2 %v3246_v48  ;;  %v3389_v5 = vld [vmem:[%s3763_s0 + $0xf4] sm:$0xff]  ;;  %v3414_v9 = vld [vmem:[%s3763_s0 + $0xdc] sm:$0xff]  ;;  %v3438_v13 = vld [vmem:[%s3763_s0 + $0xc4] sm:$0xff] }
 0x127   :  { %874 = vmatpush.msrb.mxu3 %v3253_v49  ;;  %661 = vmatpush.msrb.mxu1 %v3258_v50  ;;  %v3394_v6 = vld [vmem:[%s3763_s0 + $0x150] sm:$0xff]  ;;  %v3419_v10 = vld [vmem:[%s3763_s0 + $0x138] sm:$0xff]  ;;  %v3426_v11 = vld [vmem:[%s3763_s0 + $0x140] sm:$0xff] }
 0x128   :  { %840 = vmatpush.msrb.mxu2 %v3266_v51  ;;  %772 = vmatpush.msra.mxu0 %v3296_v56  ;;  %v3443_v14 = vld [vmem:[%s3763_s0 + $0x120] sm:$0xff]  ;;  %v3450_v15 = vld [vmem:[%s3763_s0 + $0x128] sm:$0xff]  ;;  %v2176_v26 = vld [vmem:[%s3763_s0 + $0x198] sm:$0xff] }
 0x129   :  { %875 = vmatpush.msrb.mxu3 %v3279_v53  ;;  %662 = vmatpush.msrb.mxu1 %v3284_v54  ;;  %v3455_v16 = vld [vmem:[%s3763_s0 + $0x12c] sm:$0xff]  ;;  %v2187_v34 = vld [vmem:[%s3763_s0 + $0x1b4] sm:$0xff]  ;;  %v2186_v35 = vld [vmem:[%s3763_s0 + $0x19c] sm:$0xff] }
 0x12a   :  { %841 = vmatpush.msrb.mxu2 %v3291_v55  ;;  %773 = vmatpush.msra.mxu0 %v3110_v18  ;;  %v3488_v17 = vld [vmem:[%s3763_s0 + $0x16c] sm:$0xff]  ;;  %v2185_v36 = vld [vmem:[%s3763_s0 + $0x184] sm:$0xff] }
 0x12b   :  { %876 = vmatpush.msrb.mxu3 %v3303_v57  ;;  %663 = vmatpush.msrb.mxu1 %v3308_v58  ;;  %v2178_v18 = vld [vmem:[%s3763_s0 + $0x1c8] sm:$0xff] }
 0x12c   :  { %842 = vmatpush.msrb.mxu2 %v3315_v59  ;;  %2063 = vmatmul.msk.f32.gmra.mxu1 %vm612_vm0, %v3220_v42  ;;  %v2195_v31 = vld [vmem:[%s3763_s0 + $0x188] sm:$0xff] }
 0x12d   :  { %877 = vmatpush.msrb.mxu3 %v3322_v60  ;;  %664 = vmatpush.msrb.mxu1 %v2066_v61  ;;  %v2205_v32 = vld [vmem:[%s3763_s0 + $0x18c] sm:$0xff] }
 0x12e   :  { %2081 = vmatmul.msk.f32.gmra.mxu2 %vm612_vm0, %v3220_v42  ;;  %2090 = vmatmul.msk.f32.gmra.mxu3 %vm612_vm0, %v3220_v42  ;;  %v2188_v33 = vld [vmem:[%s3763_s0 + $0x1cc] sm:$0xff] }
 0x12f   :  { %843 = vmatpush.msrb.mxu2 %v3115_v19  ;;  %878 = vmatpush.msrb.mxu3 %v3122_v20  ;;  %v2198_v19 = vld [vmem:[%s3763_s0 + $0x1d0] sm:$0xff] }
 0x130   :  { %665 = vmatpush.msrb.mxu1 %v2065_v62  ;;  %774 = vmatpush.msra.mxu0 %v3127_v21  ;;  %v2208_v20 = vld [vmem:[%s3763_s0 + $0x1d4] sm:$0xff] }
 0x131   :  { %844 = vmatpush.msrb.mxu2 %v3132_v22  ;;  %879 = vmatpush.msrb.mxu3 %v3138_v23  ;;  %v3511_v21 = vld [vmem:[%s3763_s0 + $0x154] sm:$0xff] }
 0x132   :  { %604 = vperm.xlu0 %2217, %v3235_v46   ;;  %666 = vmatpush.msrb.mxu1 %v2064_v63  ;;  %v2177_v22 = vld [vmem:[%s3763_s0 + $0x1b0] sm:$0xff]  ;;  %v2197_v23 = vld [vmem:[%s3763_s0 + $0x1b8] sm:$0xff] }
 0x133   :  { %775 = vmatpush.msra.mxu0 %v3143_v24  ;;  %845 = vmatpush.msrb.mxu2 %v3148_v25  ;;  %v2207_v24 = vld [vmem:[%s3763_s0 + $0x1bc] sm:$0xff] }
 0x134   :  { %880 = vmatpush.msrb.mxu3 %v3155_v27  ;;  %667 = vmatpush.msrb.mxu1 %v644_v0  ;;  %v2146_v25 = vld [vmem:[%s3763_s0 + $0x13c] sm:$0xff] }
 0x135   :  { %776 = vmatpush.msra.mxu0 %v3161_v28  ;;  %846 = vmatpush.msrb.mxu2 %v3166_v29  ;;  %v2196_v27 = vld [vmem:[%s3763_s0 + $0x1a0] sm:$0xff] }
 0x136   :  { %881 = vmatpush.msrb.mxu3 %v3173_v30  ;;  %2071 = vmatmul.msk.f32.vlgmr.msrb.gmra.mxu1 %vm612_vm0, %v3235_v46  ;;  %v2206_v28 = vld [vmem:[%s3763_s0 + $0x1a4] sm:$0xff] }
 0x137   :  { %2099 = vmatmul.msk.f32.vlgmr.msra.gmra.mxu0 %vm612_vm0, %v3235_v46  ;;  %804 = vmatpush.msra.mxu1 %v3360_v1  ;;  %v2145_v29 = vld [vmem:[%s3763_s0 + $0x124] sm:$0xff] }
 0x138   :  { %2119 = vmatmul.msk.f32.vlgmr.msrb.gmra.mxu2 %vm612_vm0, %v3235_v46  ;;  %2129 = vmatmul.msk.f32.vlgmr.msrb.gmra.mxu3 %vm612_vm0, %v3235_v46  ;;  %v2175_v30 = vld [vmem:[%s3763_s0 + $0x180] sm:$0xff] }
 0x139   :  { %913 = vmatpush.msrb.mxu0 %v3367_v2  ;;  %983 = vmatpush.msra.mxu2 %v3376_v3 }
 0x13a   :  { %1018 = vmatpush.msra.mxu3 %v3381_v4  ;;  %805 = vmatpush.msra.mxu1 %v3389_v5 }
 0x13b   :  { %914 = vmatpush.msrb.mxu0 %v3394_v6  ;;  %984 = vmatpush.msra.mxu2 %v3402_v7 }
 0x13c   :  { %1019 = vmatpush.msra.mxu3 %v3407_v8  ;;  %806 = vmatpush.msra.mxu1 %v3414_v9 }
 0x13d   :  { %915 = vmatpush.msrb.mxu0 %v3419_v10  ;;  %985 = vmatpush.msra.mxu2 %v3426_v11 }
 0x13e   :  { %1020 = vmatpush.msra.mxu3 %v3431_v12  ;;  %807 = vmatpush.msra.mxu1 %v3438_v13 }
 0x13f   :  { %916 = vmatpush.msrb.mxu0 %v3443_v14  ;;  %986 = vmatpush.msra.mxu2 %v3450_v15 }
 0x140   :  { %1021 = vmatpush.msra.mxu3 %v3455_v16  ;;  %2072 = vmatmul.msk.f32.gmra.mxu1 %vm612_vm0, %v3220_v42 }
 0x141   :  { %2100 = vmatmul.msk.f32.gmra.mxu0 %vm612_vm0, %v3220_v42  ;;  %808 = vmatpush.msra.mxu1 %v3240_v47 }
 0x142   :  { %2120 = vmatmul.msk.f32.gmra.mxu2 %vm612_vm0, %v3220_v42  ;;  %2130 = vmatmul.msk.f32.gmra.mxu3 %vm612_vm0, %v3220_v42 }
 0x143   :  { %917 = vmatpush.msrb.mxu0 %v3200_v37  ;;  %987 = vmatpush.msra.mxu2 %v3246_v48 }
 0x144   :  { %1022 = vmatpush.msra.mxu3 %v3253_v49  ;;  %809 = vmatpush.msra.mxu1 %v3258_v50 }
 0x145   :  { %918 = vmatpush.msrb.mxu0 %v3212_v40  ;;  %988 = vmatpush.msra.mxu2 %v3266_v51 }
 0x146   :  { %1023 = vmatpush.msra.mxu3 %v3279_v53  ;;  %810 = vmatpush.msra.mxu1 %v3284_v54 }
 0x147   :  { %919 = vmatpush.msrb.mxu0 %v3271_v52  ;;  %989 = vmatpush.msra.mxu2 %v3291_v55 }
 0x148   :  { %1024 = vmatpush.msra.mxu3 %v3303_v57  ;;  %811 = vmatpush.msra.mxu1 %v3308_v58 }
 0x149   :  { %920 = vmatpush.msrb.mxu0 %v3296_v56  ;;  %990 = vmatpush.msra.mxu2 %v3315_v59 }
 0x14a   :  { %1025 = vmatpush.msra.mxu3 %v3322_v60  ;;  %2109 = vmatmul.msk.f32.vlgmr.msra.gmra.mxu1 %vm612_vm0, %v3235_v46 }
 0x14b   :  { %2139 = vmatmul.msk.f32.vlgmr.msrb.gmra.mxu0 %vm612_vm0, %v3235_v46  ;;  %948 = vmatpush.msrb.mxu1 %v3488_v17 }
 0x14c   :  { %2159 = vmatmul.msk.f32.vlgmr.msra.gmra.mxu2 %vm612_vm0, %v3235_v46  ;;  %2169 = vmatmul.msk.f32.vlgmr.msra.gmra.mxu3 %vm612_vm0, %v3235_v46 }
 0x14d   :  { %1057 = vmatpush.msra.mxu0 %v2178_v18  ;;  %1127 = vmatpush.msrb.mxu2 %v2198_v19 }
 0x14e   :  { %1162 = vmatpush.msrb.mxu3 %v2208_v20  ;;  %949 = vmatpush.msrb.mxu1 %v3511_v21 }
 0x14f   :  { %1058 = vmatpush.msra.mxu0 %v2177_v22  ;;  %1128 = vmatpush.msrb.mxu2 %v2197_v23 }
 0x150   :  { %1163 = vmatpush.msrb.mxu3 %v2207_v24  ;;  %950 = vmatpush.msrb.mxu1 %v2146_v25 }
 0x151   :  { %1059 = vmatpush.msra.mxu0 %v2176_v26  ;;  %1129 = vmatpush.msrb.mxu2 %v2196_v27 }
 0x152   :  { %1164 = vmatpush.msrb.mxu3 %v2206_v28  ;;  %951 = vmatpush.msrb.mxu1 %v2145_v29 }
 0x153   :  { %1060 = vmatpush.msra.mxu0 %v2175_v30  ;;  %1130 = vmatpush.msrb.mxu2 %v2195_v31 }
 0x154   :  { %1165 = vmatpush.msrb.mxu3 %v2205_v32  ;;  %2110 = vmatmul.msk.f32.gmra.mxu1 %vm612_vm0, %v3220_v42 }
 0x155   :  { %2140 = vmatmul.msk.f32.gmra.mxu0 %vm612_vm0, %v3220_v42  ;;  %952 = vmatpush.msrb.mxu1 %v3360_v1 }
 0x156   :  { %2160 = vmatmul.msk.f32.gmra.mxu2 %vm612_vm0, %v3220_v42  ;;  %2170 = vmatmul.msk.f32.gmra.mxu3 %vm612_vm0, %v3220_v42 }
 0x157   :  { %1061 = vmatpush.msra.mxu0 %v3367_v2  ;;  %1131 = vmatpush.msrb.mxu2 %v3376_v3 }
 0x158   :  { %1166 = vmatpush.msrb.mxu3 %v3381_v4  ;;  %953 = vmatpush.msrb.mxu1 %v3389_v5 }
 0x159   :  { %1062 = vmatpush.msra.mxu0 %v3394_v6  ;;  %1132 = vmatpush.msrb.mxu2 %v3402_v7 }
 0x15a   :  { %1167 = vmatpush.msrb.mxu3 %v3407_v8  ;;  %954 = vmatpush.msrb.mxu1 %v3414_v9 }
 0x15b   :  { %1063 = vmatpush.msra.mxu0 %v3419_v10  ;;  %1133 = vmatpush.msrb.mxu2 %v3426_v11 }
 0x15c   :  { %1168 = vmatpush.msrb.mxu3 %v3431_v12  ;;  %955 = vmatpush.msrb.mxu1 %v3438_v13 }
 0x15d   :  { %1064 = vmatpush.msra.mxu0 %v3443_v14  ;;  %1134 = vmatpush.msrb.mxu2 %v3450_v15 }
 0x15e   :  { %1169 = vmatpush.msrb.mxu3 %v3455_v16  ;;  %2149 = vmatmul.msk.f32.vlgmr.msrb.gmra.mxu1 %vm612_vm0, %v3235_v46 }
 0x15f   :  { %2179 = vmatmul.msk.f32.vlgmr.msra.gmra.mxu0 %vm612_vm0, %v3235_v46  ;;  %1092 = vmatpush.msra.mxu1 %v2188_v33 }
 0x160   :  { %2199 = vmatmul.msk.f32.vlgmr.msrb.gmra.mxu2 %vm612_vm0, %v3235_v46  ;;  %2209 = vmatmul.msk.f32.vlgmr.msrb.gmra.mxu3 %vm612_vm0, %v3235_v46 }
 0x161   :  { %1093 = vmatpush.msra.mxu1 %v2187_v34 }
 0x163   :  { %1094 = vmatpush.msra.mxu1 %v2186_v35 }
 0x165   :  { %1095 = vmatpush.msra.mxu1 %v2185_v36 }
 0x166   :  { %2150 = vmatmul.msk.f32.gmra.mxu1 %vm612_vm0, %v3220_v42 }
 0x167   :  { %2180 = vmatmul.msk.f32.gmra.mxu0 %vm612_vm0, %v3220_v42  ;;  %1096 = vmatpush.msra.mxu1 %v3488_v17 }
 0x168   :  { %2200 = vmatmul.msk.f32.gmra.mxu2 %vm612_vm0, %v3220_v42  ;;  %2210 = vmatmul.msk.f32.gmra.mxu3 %vm612_vm0, %v3220_v42 }
 0x169   :  { %1097 = vmatpush.msra.mxu1 %v3511_v21 }
 0x16b   :  { %1098 = vmatpush.msra.mxu1 %v2146_v25 }
 0x16d   :  { %1099 = vmatpush.msra.mxu1 %v2145_v29 }
 0x16e   :  { %2189 = vmatmul.msk.f32.vlgmr.msra.gmra.mxu1 %vm612_vm0, %v3235_v46 }
 0x176   :  { %2190 = vmatmul.msk.f32.gmra.mxu1 %vm612_vm0, %v3220_v42 }
 0x192   :  { %v3607_v37 = vpop.permute.xlu0 %609 }
 0x1a1   :  { %v634_v38 = vpop.f32.mrf.mxu1 }
 0x1a4   :  { %v3609_v39 = vpop.permute.xlu0 %604 }
 0x1a5   :  { %v635_v40 = vadd.f32 %v634_v38, %v3609_v39 }
 0x1a7   :  { %v640_v41 = vmax.f32 %v635_v40, 0.0 }
 0x1a8   :  { %v704_v43 = vpop.f32.mrf.mxu2 }
 0x1a9   :  { %642 = vst.msk [vmem:[#allocation2] sm:$0xff] %vm612_vm0, %v640_v41  ;;  %v705_v44 = vadd.f32 %v704_v43, %v3609_v39  ;;  %v739_v45 = vpop.f32.mrf.mxu3  ;;  %v637_v47 = vpop.f32.mrf.mxu1 }
 0x1aa   :  { %v740_v48 = vadd.f32 %v739_v45, %v3609_v39  ;;  %v638_v49 = vadd.f32 %v637_v47, %v3607_v37 }
 0x1ab   :  { %v710_v50 = vmax.f32 %v705_v44, 0.0 }
 0x1ac   :  { %v745_v51 = vmax.f32 %v740_v48, 0.0  ;;  %v641_v52 = vmax.f32 %v638_v49, 0.0 }
 0x1ad   :  { %712 = vst.msk [vmem:[#allocation2 + $0x20] sm:$0xff] %vm612_vm0, %v710_v50 }
 0x1ae   :  { %747 = vst.msk [vmem:[#allocation2 + $0x30] sm:$0xff] %vm612_vm0, %v745_v51 }
 0x1af   :  { %643 = vst.msk [vmem:[#allocation2 + $0x8] sm:$0xff] %vm612_vm0, %v641_v52 }
 0x1b1   :  { %v707_v53 = vpop.f32.mrf.mxu2  ;;  %v742_v54 = vpop.f32.mrf.mxu3 }
 0x1b2   :  { %v708_v55 = vadd.f32 %v707_v53, %v3607_v37  ;;  %v743_v56 = vadd.f32 %v742_v54, %v3607_v37 }
 0x1b3   :  { %v669_v59 = vpop.f32.mrf.mxu1 }
 0x1b4   :  { %v711_v57 = vmax.f32 %v708_v55, 0.0  ;;  %v746_v58 = vmax.f32 %v743_v56, 0.0  ;;  %v778_v60 = vpop.f32.mrf.mxu0  ;;  %v670_v61 = vadd.f32 %v669_v59, %v3609_v39 }
 0x1b5   :  { %v779_v62 = vadd.f32 %v778_v60, %v3609_v39 }
 0x1b6   :  { %713 = vst.msk [vmem:[#allocation2 + $0x28] sm:$0xff] %vm612_vm0, %v711_v57  ;;  %v675_v63 = vmax.f32 %v670_v61, 0.0 }
 0x1b7   :  { %748 = vst.msk [vmem:[#allocation2 + $0x38] sm:$0xff] %vm612_vm0, %v746_v58  ;;  %v784_v0 = vmax.f32 %v779_v62, 0.0 }
 0x1b8   :  { %677 = vst.msk [vmem:[#allocation2 + $0x10] sm:$0xff] %vm612_vm0, %v675_v63 }
 0x1b9   :  { %786 = vst.msk [vmem:[#allocation2 + $0x40] sm:$0xff] %vm612_vm0, %v784_v0 }
 0x1bb   :  { %v848_v1 = vpop.f32.mrf.mxu2  ;;  %v883_v3 = vpop.f32.mrf.mxu3 }
 0x1bc   :  { %v849_v2 = vadd.f32 %v848_v1, %v3609_v39  ;;  %v884_v4 = vadd.f32 %v883_v3, %v3609_v39 }
 0x1bd   :  { %v672_v6 = vpop.f32.mrf.mxu1 }
 0x1be   :  { %v854_v5 = vmax.f32 %v849_v2, 0.0  ;;  %v781_v7 = vpop.f32.mrf.mxu0  ;;  %v889_v8 = vmax.f32 %v884_v4, 0.0  ;;  %v673_v9 = vadd.f32 %v672_v6, %v3607_v37  ;;  %v1188_v6 = vld [vmem:[#allocation2 + $0x38] sm:$0xff] }
 0x1bf   :  { %v782_v10 = vadd.f32 %v781_v7, %v3607_v37 }
 0x1c0   :  { %856 = vst.msk [vmem:[#allocation2 + $0x60] sm:$0xff] %vm612_vm0, %v854_v5  ;;  %v676_v11 = vmax.f32 %v673_v9, 0.0  ;;  %v1189_v0 = vld [vmem:[#allocation2 + $0x40] sm:$0xff] }
 0x1c1   :  { %891 = vst.msk [vmem:[#allocation2 + $0x70] sm:$0xff] %vm612_vm0, %v889_v8  ;;  %v785_v12 = vmax.f32 %v782_v10, 0.0  ;;  %v1187_v10 = vld [vmem:[#allocation2 + $0x30] sm:$0xff] }
 0x1c2   :  { %678 = vst.msk [vmem:[#allocation2 + $0x18] sm:$0xff] %vm612_vm0, %v676_v11  ;;  %v1186_v11 = vld [vmem:[#allocation2 + $0x28] sm:$0xff] }
 0x1c3   :  { %787 = vst.msk [vmem:[#allocation2 + $0x48] sm:$0xff] %vm612_vm0, %v785_v12 }
 0x1c5   :  { %v851_v13 = vpop.f32.mrf.mxu2  ;;  %v886_v15 = vpop.f32.mrf.mxu3 }
 0x1c6   :  { %v852_v14 = vadd.f32 %v851_v13, %v3607_v37  ;;  %v887_v16 = vadd.f32 %v886_v15, %v3607_v37 }
 0x1c7   :  { %v813_v18 = vpop.f32.mrf.mxu1  ;;  %v1193_v43 = vld [vmem:[#allocation2 + $0x60] sm:$0xff] }
 0x1c8   :  { %v855_v17 = vmax.f32 %v852_v14, 0.0  ;;  %v922_v19 = vpop.f32.mrf.mxu0  ;;  %v890_v20 = vmax.f32 %v887_v16, 0.0  ;;  %v814_v21 = vadd.f32 %v813_v18, %v3609_v39  ;;  %v1195_v36 = vld [vmem:[#allocation2 + $0x70] sm:$0xff]  ;;  %v1185_v16 = vld [vmem:[#allocation2 + $0x20] sm:$0xff] }
 0x1c9   :  { %v923_v22 = vadd.f32 %v922_v19, %v3609_v39 }
 0x1ca   :  { %857 = vst.msk [vmem:[#allocation2 + $0x68] sm:$0xff] %vm612_vm0, %v855_v17  ;;  %v819_v23 = vmax.f32 %v814_v21, 0.0  ;;  %v1190_v59 = vld [vmem:[#allocation2 + $0x48] sm:$0xff] }
 0x1cb   :  { %892 = vst.msk [vmem:[#allocation2 + $0x78] sm:$0xff] %vm612_vm0, %v890_v20  ;;  %v928_v24 = vmax.f32 %v923_v22, 0.0  ;;  %v1184_v20 = vld [vmem:[#allocation2 + $0x18] sm:$0xff] }
 0x1cc   :  { %821 = vst.msk [vmem:[#allocation2 + $0x50] sm:$0xff] %vm612_vm0, %v819_v23  ;;  %v1183_v23 = vld [vmem:[#allocation2 + $0x10] sm:$0xff] }
 0x1cd   :  { %930 = vst.msk [vmem:[#allocation2 + $0x80] sm:$0xff] %vm612_vm0, %v928_v24  ;;  %v1182_v24 = vld [vmem:[#allocation2 + $0x8] sm:$0xff] }
 0x1cf   :  { %v992_v25 = vpop.f32.mrf.mxu2  ;;  %v1027_v27 = vpop.f32.mrf.mxu3 }
 0x1d0   :  { %v993_v26 = vadd.f32 %v992_v25, %v3609_v39  ;;  %v1028_v28 = vadd.f32 %v1027_v27, %v3609_v39 }
 0x1d1   :  { %v816_v30 = vpop.f32.mrf.mxu1  ;;  %v1194_v38 = vld [vmem:[#allocation2 + $0x68] sm:$0xff] }
 0x1d2   :  { %v998_v29 = vmax.f32 %v993_v26, 0.0  ;;  %v925_v31 = vpop.f32.mrf.mxu0  ;;  %v1196_v32 = vld [vmem:[#allocation2 + $0x78] sm:$0xff]  ;;  %v1033_v33 = vmax.f32 %v1028_v28, 0.0  ;;  %v817_v34 = vadd.f32 %v816_v30, %v3607_v37  ;;  %v1181_v26 = vld [vmem:[#allocation2] sm:$0xff] }
 0x1d3   :  { %v926_v35 = vadd.f32 %v925_v31, %v3607_v37  ;;  %1221 = vmatpush.msrb.mxu0 %v1196_v32  ;;  %1277 = vmatpush.msra.mxu2 %v1196_v32  ;;  %v1191_v58 = vld [vmem:[#allocation2 + $0x50] sm:$0xff]  ;;  %v2261_v31 = vmov 66  }
 0x1d4   :  { %1000 = vst.msk [vmem:[#allocation2 + $0xa0] sm:$0xff] %vm612_vm0, %v998_v29  ;;  %v820_v40 = vmax.f32 %v817_v34, 0.0  ;;  %2218 = vset.pattern.permute.xlu1 %v2261_v31  ;;  %2225 = vset.pattern.permute.xlu0 %v2261_v31  ;;  %v585_v32 = vld [vmem:[%s3764_s1 + $0x30] sm:$0xff] }
 0x1d5   :  { %1035 = vst.msk [vmem:[#allocation2 + $0xb0] sm:$0xff] %vm612_vm0, %v1033_v33  ;;  %v929_v41 = vmax.f32 %v926_v35, 0.0  ;;  %1222 = vmatpush.msrb.mxu0 %v1195_v36  ;;  %1278 = vmatpush.msra.mxu2 %v1195_v36  ;;  %v579_v35 = vld [vmem:[%s3764_s1] sm:$0xff] }
 0x1d6   :  { %822 = vst.msk [vmem:[#allocation2 + $0x58] sm:$0xff] %vm612_vm0, %v820_v40  ;;  %1270 = vperm.xlu1 %2218, %v3235_v46  }
 0x1d7   :  { %1223 = vmatpush.msrb.mxu0 %v1194_v38  ;;  %1279 = vmatpush.msra.mxu2 %v1194_v38  ;;  %931 = vst.msk [vmem:[#allocation2 + $0x88] sm:$0xff] %vm612_vm0, %v929_v41 }
 0x1d9   :  { %v995_v44 = vpop.f32.mrf.mxu2  ;;  %1224 = vmatpush.msrb.mxu0 %v1193_v43  ;;  %1280 = vmatpush.msra.mxu2 %v1193_v43  ;;  %v1030_v47 = vpop.f32.mrf.mxu3 }
 0x1da   :  { %v996_v45 = vadd.f32 %v995_v44, %v3607_v37  ;;  %v1031_v48 = vadd.f32 %v1030_v47, %v3607_v37 }
 0x1db   :  { %v957_v50 = vpop.f32.mrf.mxu1 }
 0x1dc   :  { %v999_v49 = vmax.f32 %v996_v45, 0.0  ;;  %v1066_v51 = vpop.f32.mrf.mxu0  ;;  %v1034_v52 = vmax.f32 %v1031_v48, 0.0  ;;  %v958_v53 = vadd.f32 %v957_v50, %v3609_v39  ;;  %v1203_v43 = vld [vmem:[#allocation2 + $0xb0] sm:$0xff]  ;;  %v1201_v45 = vld [vmem:[#allocation2 + $0xa0] sm:$0xff]  ;;  %v584_v50 = vld [vmem:[%s3764_s1 + $0x28] sm:$0xff] }
 0x1dd   :  { %v1067_v54 = vadd.f32 %v1066_v51, %v3609_v39  ;;  %v1192_v55 = vld [vmem:[#allocation2 + $0x58] sm:$0xff]  ;;  %v580_v51 = vld [vmem:[%s3764_s1 + $0x8] sm:$0xff] }
 0x1de   :  { %1001 = vst.msk [vmem:[#allocation2 + $0xa8] sm:$0xff] %vm612_vm0, %v999_v49  ;;  %v963_v56 = vmax.f32 %v958_v53, 0.0  ;;  %1225 = vmatpush.msrb.mxu0 %v1192_v55  ;;  %1281 = vmatpush.msra.mxu2 %v1192_v55  ;;  %v1198_v49 = vld [vmem:[#allocation2 + $0x88] sm:$0xff]  ;;  %v586_v53 = vld [vmem:[%s3764_s1 + $0x38] sm:$0xff] }
 0x1df   :  { %1036 = vst.msk [vmem:[#allocation2 + $0xb8] sm:$0xff] %vm612_vm0, %v1034_v52  ;;  %v1072_v57 = vmax.f32 %v1067_v54, 0.0  ;;  %1274 = vperm.xlu1 %2218, %v3220_v42   ;;  %v1197_v52 = vld [vmem:[#allocation2 + $0x80] sm:$0xff]  ;;  %v581_v54 = vld [vmem:[%s3764_s1 + $0x10] sm:$0xff]  ;;  %v582_v55 = vld [vmem:[%s3764_s1 + $0x18] sm:$0xff] }
 0x1e0   :  { %965 = vst.msk [vmem:[#allocation2 + $0x90] sm:$0xff] %vm612_vm0, %v963_v56  ;;  %1226 = vmatpush.msrb.mxu0 %v1191_v58  ;;  %1282 = vmatpush.msra.mxu2 %v1191_v58  ;;  %v2262_v56 = vmov 65  }
 0x1e1   :  { %1074 = vst.msk [vmem:[#allocation2 + $0xc0] sm:$0xff] %vm612_vm0, %v1072_v57  ;;  %2219 = vset.pattern.permute.xlu2 %v2262_v56 }
 0x1e2   :  { %1227 = vmatpush.msrb.mxu0 %v1190_v59  ;;  %1283 = vmatpush.msra.mxu2 %v1190_v59 }
 0x1e3   :  { %v1136_v60 = vpop.f32.mrf.mxu2  ;;  %v1171_v62 = vpop.f32.mrf.mxu3  ;;  %1214 = vperm.xlu2 %2219, %v3235_v46  }
 0x1e4   :  { %v1137_v61 = vadd.f32 %v1136_v60, %v3609_v39  ;;  %v960_v63 = vpop.f32.mrf.mxu1  ;;  %v1172_v1 = vadd.f32 %v1171_v62, %v3609_v39  ;;  %v1069_v3 = vpop.f32.mrf.mxu0  ;;  %1228 = vmatpush.msrb.mxu0 %v1189_v0  ;;  %1284 = vmatpush.msra.mxu2 %v1189_v0 }
 0x1e5   :  { %v961_v2 = vadd.f32 %v960_v63, %v3607_v37  ;;  %v1070_v5 = vadd.f32 %v1069_v3, %v3607_v37  ;;  %v1202_v44 = vld [vmem:[#allocation2 + $0xa8] sm:$0xff] }
 0x1e6   :  { %v1142_v4 = vmax.f32 %v1137_v61, 0.0  ;;  %v1177_v7 = vmax.f32 %v1172_v1, 0.0  ;;  %1229 = vmatpush.msrb.mxu0 %v1188_v6  ;;  %1285 = vmatpush.msra.mxu2 %v1188_v6  ;;  %v1204_v41 = vld [vmem:[#allocation2 + $0xb8] sm:$0xff] }
 0x1e7   :  { %v964_v8 = vmax.f32 %v961_v2, 0.0  ;;  %v1073_v9 = vmax.f32 %v1070_v5, 0.0  ;;  %v1199_v48 = vld [vmem:[#allocation2 + $0x90] sm:$0xff] }
 0x1e8   :  { %1144 = vst.msk [vmem:[#allocation2 + $0xe0] sm:$0xff] %vm612_vm0, %v1142_v4  ;;  %1230 = vmatpush.msrb.mxu0 %v1187_v10  ;;  %1286 = vmatpush.msra.mxu2 %v1187_v10  ;;  %v1205_v40 = vld [vmem:[#allocation2 + $0xc0] sm:$0xff] }
 0x1e9   :  { %1179 = vst.msk [vmem:[#allocation2 + $0xf0] sm:$0xff] %vm612_vm0, %v1177_v7 }
 0x1ea   :  { %966 = vst.msk [vmem:[#allocation2 + $0x98] sm:$0xff] %vm612_vm0, %v964_v8  ;;  %1231 = vmatpush.msrb.mxu0 %v1186_v11  ;;  %1287 = vmatpush.msra.mxu2 %v1186_v11 }
 0x1eb   :  { %1075 = vst.msk [vmem:[#allocation2 + $0xc8] sm:$0xff] %vm612_vm0, %v1073_v9  ;;  %v1139_v12 = vpop.f32.mrf.mxu2  ;;  %v1174_v14 = vpop.f32.mrf.mxu3  ;;  %1218 = vperm.xlu2 %2219, %v3220_v42  }
 0x1ec   :  { %v1140_v13 = vadd.f32 %v1139_v12, %v3607_v37  ;;  %v1101_v15 = vpop.f32.mrf.mxu1  ;;  %v1175_v17 = vadd.f32 %v1174_v14, %v3607_v37  ;;  %1232 = vmatpush.msrb.mxu0 %v1185_v16  ;;  %1288 = vmatpush.msra.mxu2 %v1185_v16 }
 0x1ed   :  { %v1102_v18 = vadd.f32 %v1101_v15, %v3609_v39  ;;  %v583_v39 = vld [vmem:[%s3764_s1 + $0x20] sm:$0xff]  ;;  %s2263_s1 = smov 64  }
 0x1ee   :  { %v1143_v19 = vmax.f32 %v1140_v13, 0.0  ;;  %v1178_v21 = vmax.f32 %v1175_v17, 0.0  ;;  %1233 = vmatpush.msrb.mxu0 %v1184_v20  ;;  %1289 = vmatpush.msra.mxu2 %v1184_v20 }
 0x1ef   :  { %v1107_v22 = vmax.f32 %v1102_v18, 0.0  ;;  %v1209_v33 = vld [vmem:[#allocation2 + $0xe0] sm:$0xff] }
 0x1f0   :  { %1145 = vst.msk [vmem:[#allocation2 + $0xe8] sm:$0xff] %vm612_vm0, %v1143_v19  ;;  %1234 = vmatpush.msrb.mxu0 %v1183_v23  ;;  %1290 = vmatpush.msra.mxu2 %v1183_v23  ;;  %v1211_v30 = vld [vmem:[#allocation2 + $0xf0] sm:$0xff] }
 0x1f1   :  { %1180 = vst.msk [vmem:[#allocation2 + $0xf8] sm:$0xff] %vm612_vm0, %v1178_v21  ;;  %v1200_v47 = vld [vmem:[#allocation2 + $0x98] sm:$0xff] }
 0x1f2   :  { %1109 = vst.msk [vmem:[#allocation2 + $0xd0] sm:$0xff] %vm612_vm0, %v1107_v22  ;;  %1235 = vmatpush.msrb.mxu0 %v1182_v24  ;;  %1291 = vmatpush.msra.mxu2 %v1182_v24  ;;  %v1206_v38 = vld [vmem:[#allocation2 + $0xc8] sm:$0xff] }
 0x1f4   :  { %v1104_v25 = vpop.f32.mrf.mxu1  ;;  %1236 = vmatpush.msrb.mxu0 %v1181_v26  ;;  %1292 = vmatpush.msra.mxu2 %v1181_v26 }
 0x1f5   :  { %v1105_v27 = vadd.f32 %v1104_v25, %v3607_v37  ;;  %1293 = vmatmul.f32.vlgmr.msra.gmra.mxu2 %v583_v39  ;;  %1237 = vmatmul.f32.vlgmr.msrb.gmra.mxu0 %v579_v35 }
 0x1f7   :  { %v1108_v28 = vmax.f32 %v1105_v27, 0.0  ;;  %v1210_v37 = vld [vmem:[#allocation2 + $0xe8] sm:$0xff] }
 0x1f8   :  { %v1212_v29 = vld [vmem:[#allocation2 + $0xf8] sm:$0xff] }
 0x1f9   :  { %1110 = vst.msk [vmem:[#allocation2 + $0xd8] sm:$0xff] %vm612_vm0, %v1108_v28  ;;  %1244 = vmatpush.msrb.mxu1 %v1212_v29  ;;  %1300 = vmatpush.msra.mxu3 %v1212_v29  ;;  %v1207_v36 = vld [vmem:[#allocation2 + $0xd0] sm:$0xff] }
 0x1fb   :  { %1245 = vmatpush.msrb.mxu1 %v1211_v30  ;;  %1301 = vmatpush.msra.mxu3 %v1211_v30 }
 0x1fd   :  { %1246 = vmatpush.msrb.mxu1 %v1210_v37  ;;  %1302 = vmatpush.msra.mxu3 %v1210_v37 }
 0x1fe   :  { %1296 = vmatmul.f32.gmra.mxu2 %v585_v32  ;;  %1240 = vmatmul.f32.gmra.mxu0 %v581_v54 }
 0x1ff   :  { %1247 = vmatpush.msrb.mxu1 %v1209_v33  ;;  %1303 = vmatpush.msra.mxu3 %v1209_v33 }
 0x200   :  { %v1208_v34 = vld [vmem:[#allocation2 + $0xd8] sm:$0xff] }
 0x201   :  { %1248 = vmatpush.msrb.mxu1 %v1208_v34  ;;  %1304 = vmatpush.msra.mxu3 %v1208_v34 }
 0x203   :  { %1249 = vmatpush.msrb.mxu1 %v1207_v36  ;;  %1305 = vmatpush.msra.mxu3 %v1207_v36 }
 0x205   :  { %1250 = vmatpush.msrb.mxu1 %v1206_v38  ;;  %1306 = vmatpush.msra.mxu3 %v1206_v38 }
 0x207   :  { %1251 = vmatpush.msrb.mxu1 %v1205_v40  ;;  %1307 = vmatpush.msra.mxu3 %v1205_v40 }
 0x209   :  { %1252 = vmatpush.msrb.mxu1 %v1204_v41  ;;  %1308 = vmatpush.msra.mxu3 %v1204_v41 }
 0x20b   :  { %1253 = vmatpush.msrb.mxu1 %v1203_v43  ;;  %1309 = vmatpush.msra.mxu3 %v1203_v43 }
 0x20d   :  { %1254 = vmatpush.msrb.mxu1 %v1202_v44  ;;  %1310 = vmatpush.msra.mxu3 %v1202_v44 }
 0x20f   :  { %1255 = vmatpush.msrb.mxu1 %v1201_v45  ;;  %1311 = vmatpush.msra.mxu3 %v1201_v45 }
 0x211   :  { %1256 = vmatpush.msrb.mxu1 %v1200_v47  ;;  %1312 = vmatpush.msra.mxu3 %v1200_v47 }
 0x213   :  { %1257 = vmatpush.msrb.mxu1 %v1199_v48  ;;  %1313 = vmatpush.msra.mxu3 %v1199_v48 }
 0x215   :  { %1258 = vmatpush.msrb.mxu1 %v1198_v49  ;;  %1314 = vmatpush.msra.mxu3 %v1198_v49 }
 0x217   :  { %1259 = vmatpush.msrb.mxu1 %v1197_v52  ;;  %1315 = vmatpush.msra.mxu3 %v1197_v52 }
 0x218   :  { %1316 = vmatmul.f32.vlgmr.msra.gmra.mxu3 %v584_v50  ;;  %1260 = vmatmul.f32.vlgmr.msrb.gmra.mxu1 %v580_v51 }
 0x220   :  { %1319 = vmatmul.f32.gmra.mxu3 %v586_v53  ;;  %1263 = vmatmul.f32.gmra.mxu1 %v582_v55 }
 0x23d   :  { %v1215_v6 = vpop.permute.xlu2 %1214 }
 0x245   :  { %v1219_v8 = vpop.permute.xlu2 %1218 }
 0x248   :  { %v1271_v57 = vpop.permute.xlu1 %1270 }
 0x251   :  { %v1275_v61 = vpop.permute.xlu1 %1274 }
 0x272   :  { %v1238_v7 = vpop.f32.mrf.mxu0 }
 0x273   :  { %v1239_v9 = vadd.f32 %v1238_v7, %v1215_v6 }
 0x278   :  { %v1294_v58 = vpop.f32.mrf.mxu2 }
 0x279   :  { %v1295_v60 = vadd.f32 %v1294_v58, %v1271_v57 }
 0x27b   :  { %v1241_v42 = vpop.f32.mrf.mxu0 }
 0x27c   :  { %v1242_v10 = vadd.f32 %v1241_v42, %v1219_v8 }
 0x281   :  { %v1297_v62 = vpop.f32.mrf.mxu2 }
 0x282   :  { %v1298_v63 = vadd.f32 %v1297_v62, %v1275_v61 }
 0x295   :  { %v1261_v46 = vpop.f32.mrf.mxu1 }
 0x296   :  { %v1262_v12 = vadd.f32 %v1261_v46, %v1239_v9 }
 0x298   :  { %v1267_v15 = vmax.f32 %v1262_v12, 0.0 }
 0x29b   :  { %v1317_v59 = vpop.f32.mrf.mxu3 }
 0x29c   :  { %v1318_v0 = vadd.f32 %v1317_v59, %v1295_v60 }
 0x29d   :  { %v1264_v11 = vpop.f32.mrf.mxu1 }
 0x29e   :  { %v1323_v3 = vmax.f32 %v1318_v0, 0.0  ;;  %v1265_v13 = vadd.f32 %v1264_v11, %v1242_v10 }
 0x2a0   :  { %v1268_v16 = vmax.f32 %v1265_v13, 0.0 }
 0x2a3   :  { %v1320_v1 = vpop.f32.mrf.mxu3 }
 0x2a4   :  { %v1321_v2 = vadd.f32 %v1320_v1, %v1298_v63 }
 0x2a6   :  { %v1324_v4 = vmax.f32 %v1321_v2, 0.0 }
 0x2a8   :  { %v2220_v5 = vpack.i.bf16 %v1324_v4, %v1323_v3 }
 0x2aa   :  { %2221 = vrot.lane.b32.xlu0 %v2220_v5, %s2263_s1 }
 0x31c   :  { %v2222_v14 = vpop.permute.xlu0 %2221 }
 0x31d   :  { %v2224_v17 = vunpack.i.h.bf16 %v2222_v14  ;;  %v2223_v18 = vunpack.i.l.bf16 %v2222_v14 }
 0x31f   :  { %v3704_v19 = vsel %vm612_vm0, %v1267_v15, %v2223_v18  ;;  %v3707_v20 = vsel %vm612_vm0, %v1268_v16, %v2224_v17 }
 0x320   :  { %v1335_v21 = vperm.slane %v3704_v19, 0  ;;  %v1337_v22 = vperm.slane %v3704_v19, 1  ;;  %v1339_v23 = vperm.slane %v3704_v19, 2  ;;  %v1341_v24 = vperm.slane %v3704_v19, 3 }
 0x321   :  { %v1343_v39 = vperm.slane %v3704_v19, 4  ;;  %v1345_v25 = vperm.slane %v3704_v19, 5  ;;  %v1347_v26 = vperm.slane %v3704_v19, 6  ;;  %v1349_v27 = vperm.slane %v3704_v19, 7 }
 0x322   :  { %v1351_v28 = vperm.slane %v3707_v20, 0  ;;  %v1353_v29 = vperm.slane %v3707_v20, 1  ;;  %v1355_v30 = vperm.slane %v3707_v20, 2  ;;  %v1357_v31 = vperm.slane %v3707_v20, 3 }
 0x323   :  { %v1359_v32 = vperm.slane %v3707_v20, 4  ;;  %v1361_v37 = vperm.slane %v3707_v20, 5  ;;  %v1363_v33 = vperm.slane %v3707_v20, 6  ;;  %v1365_v34 = vperm.slane %v3707_v20, 7 }
 0x324   :  { %2256 = dma.done.wait [#allocation5], 35072 }
 0x325   :  { %2257 = vsyncadd [#allocation5], 4294932224  ;;  %v1401_v35 = vld [vmem:[#allocation4 + $0x3a0] sm:$0xff]  ;;  %v1400_v38 = vld [vmem:[#allocation4 + $0x578] sm:$0xff]  ;;  %vm2003_vm1 = vcmask 40960   ;;  %s2264_s30 = smov [#allocation6]  }
 0x326   :  { %v1433_v36 = vld [vmem:[#allocation4 + $0xa0] sm:$0xff]  ;;  %1644 = vmatpush.msra.mxu0 %v1401_v35  ;;  %v1432_v41 = vld [vmem:[#allocation4 + $0xb0] sm:$0xff]  ;;  %v1449_v43 = vld [vmem:[#allocation4 + $0x58] sm:$0xff]  ;;  %s2034_s4 = sshll.u32 %s2264_s30, 4  ;;  %s2036_s7 = sshll.u32 %s3766_s3, 4  ;;  %s2035_s4 = int_to_ptr.vmem [resolvable:$true] %s2034_s4  ;;  %s2037_s7 = int_to_ptr.hbm [resolvable:$true] %s2036_s7 }
 0x327   :  { %1684 = vmatpush.msrb.mxu2 %v1433_v36  ;;  %v1417_v40 = vld [vmem:[#allocation4 + $0x660] sm:$0xff]  ;;  %1704 = vmatpush.msrb.mxu3 %v1449_v43  ;;  %v1399_v44 = vld [vmem:[#allocation4 + $0x568] sm:$0xff]  ;;  %v1415_v49 = vld [vmem:[#allocation4 + $0x858] sm:$0xff] }
 0x328   :  { %1664 = vmatpush.msra.mxu1 %v1417_v40  ;;  %v1416_v45 = vld [vmem:[#allocation4 + $0x280] sm:$0xff]  ;;  %1645 = vmatpush.msra.mxu0 %v1400_v38  ;;  %v1398_v50 = vld [vmem:[#allocation4 + $0x7e8] sm:$0xff]  ;;  %v1447_v52 = vld [vmem:[#allocation4 + $0x698] sm:$0xff] }
 0x329   :  { %v1431_v47 = vld [vmem:[#allocation4 + $0x340] sm:$0xff]  ;;  %1685 = vmatpush.msrb.mxu2 %v1432_v41  ;;  %v1430_v51 = vld [vmem:[#allocation4 + $0x648] sm:$0xff]  ;;  %v1445_v58 = vld [vmem:[#allocation4 + $0x638] sm:$0xff] }
 0x32a   :  { %v1448_v48 = vld [vmem:[#allocation4 + $0x2a0] sm:$0xff]  ;;  %1665 = vmatpush.msra.mxu1 %v1416_v45  ;;  %1646 = vmatpush.msra.mxu0 %v1399_v44  ;;  %v1414_v53 = vld [vmem:[#allocation4 + $0x8] sm:$0xff]  ;;  %v1396_v59 = vld [vmem:[#allocation4 + $0x2f8] sm:$0xff] }
 0x32b   :  { %1705 = vmatpush.msrb.mxu3 %v1448_v48  ;;  %1686 = vmatpush.msrb.mxu2 %v1431_v47  ;;  %v1446_v54 = vld [vmem:[#allocation4 + $0x328] sm:$0xff]  ;;  %v1397_v55 = vld [vmem:[#allocation4 + $0x700] sm:$0xff]  ;;  %v1428_v60 = vld [vmem:[#allocation4 + $0x18] sm:$0xff] }
 0x32c   :  { %1666 = vmatpush.msra.mxu1 %v1415_v49  ;;  %v1429_v56 = vld [vmem:[#allocation4 + $0x5c0] sm:$0xff]  ;;  %1647 = vmatpush.msra.mxu0 %v1398_v50  ;;  %v1412_v61 = vld [vmem:[#allocation4 + $0x378] sm:$0xff]  ;;  %v1395_v63 = vld [vmem:[#allocation4 + $0x748] sm:$0xff] }
 0x32d   :  { %1706 = vmatpush.msrb.mxu3 %v1447_v52  ;;  %1687 = vmatpush.msrb.mxu2 %v1430_v51  ;;  %v1413_v57 = vld [vmem:[#allocation4 + $0x840] sm:$0xff]  ;;  %v1444_v62 = vld [vmem:[#allocation4 + $0x158] sm:$0xff]  ;;  %v1411_v1 = vld [vmem:[#allocation4 + $0x628] sm:$0xff] }
 0x32e   :  { %1667 = vmatpush.msra.mxu1 %v1414_v53  ;;  %1648 = vmatpush.msra.mxu0 %v1397_v55  ;;  %v1427_v0 = vld [vmem:[#allocation4 + $0x838] sm:$0xff]  ;;  %v1443_v2 = vld [vmem:[#allocation4 + $0x510] sm:$0xff]  ;;  %v1394_v3 = vld [vmem:[#allocation4 + $0x6a0] sm:$0xff] }
 0x32f   :  { %1707 = vmatpush.msrb.mxu3 %v1446_v54  ;;  %1688 = vmatpush.msrb.mxu2 %v1429_v56  ;;  %v1426_v4 = vld [vmem:[#allocation4 + $0x3b8] sm:$0xff]  ;;  %v1410_v5 = vld [vmem:[#allocation4 + $0x380] sm:$0xff]  ;;  %v1442_v6 = vld [vmem:[#allocation4 + $0xc8] sm:$0xff] }
 0x330   :  { %1668 = vmatpush.msra.mxu1 %v1413_v57  ;;  %1649 = vmatpush.msra.mxu0 %v1396_v59  ;;  %v1393_v7 = vld [vmem:[#allocation4 + $0x6e0] sm:$0xff]  ;;  %v1409_v8 = vld [vmem:[#allocation4 + $0x738] sm:$0xff]  ;;  %v1424_v10 = vld [vmem:[#allocation4 + $0x1e8] sm:$0xff] }
 0x331   :  { %1708 = vmatpush.msrb.mxu3 %v1445_v58  ;;  %1689 = vmatpush.msrb.mxu2 %v1428_v60  ;;  %v1425_v46 = vld [vmem:[#allocation4 + $0x2e0] sm:$0xff]  ;;  %v1441_v42 = vld [vmem:[#allocation4 + $0xb8] sm:$0xff]  ;;  %v1408_v11 = vld [vmem:[#allocation4 + $0x488] sm:$0xff] }
 0x332   :  { %1669 = vmatpush.msra.mxu1 %v1412_v61  ;;  %1650 = vmatpush.msra.mxu0 %v1395_v63  ;;  %v1392_v9 = vld [vmem:[#allocation4] sm:$0xff]  ;;  %v1440_v12 = vld [vmem:[#allocation4 + $0x650] sm:$0xff]  ;;  %v1391_v13 = vld [vmem:[#allocation4 + $0x438] sm:$0xff] }
 0x333   :  { %1709 = vmatpush.msrb.mxu3 %v1444_v62  ;;  %1690 = vmatpush.msrb.mxu2 %v1427_v0  ;;  %v1423_v14 = vld [vmem:[#allocation4 + $0x5d8] sm:$0xff]  ;;  %v1439_v16 = vld [vmem:[#allocation4 + $0x4e0] sm:$0xff]  ;;  %v1421_v40 = vld [vmem:[#allocation4 + $0x708] sm:$0xff] }
 0x334   :  { %1670 = vmatpush.msra.mxu1 %v1411_v1  ;;  %1651 = vmatpush.msra.mxu0 %v1394_v3  ;;  %v1407_v15 = vld [vmem:[#allocation4 + $0x778] sm:$0xff]  ;;  %v1390_v17 = vld [vmem:[#allocation4 + $0x320] sm:$0xff]  ;;  %v1405_v41 = vld [vmem:[#allocation4 + $0x430] sm:$0xff] }
 0x335   :  { %1710 = vmatpush.msrb.mxu3 %v1443_v2  ;;  %1691 = vmatpush.msrb.mxu2 %v1426_v4  ;;  %v1422_v18 = vld [vmem:[#allocation4 + $0x4b8] sm:$0xff]  ;;  %v1406_v35 = vld [vmem:[#allocation4 + $0x800] sm:$0xff]  ;;  %v1420_v45 = vld [vmem:[#allocation4 + $0x590] sm:$0xff] }
 0x336   :  { %1671 = vmatpush.msra.mxu1 %v1410_v5  ;;  %1652 = vmatpush.msra.mxu0 %v1393_v7  ;;  %v1438_v36 = vld [vmem:[#allocation4 + $0x338] sm:$0xff]  ;;  %v1437_v43 = vld [vmem:[#allocation4 + $0x4c0] sm:$0xff]  ;;  %v1404_v47 = vld [vmem:[#allocation4 + $0x588] sm:$0xff] }
 0x337   :  { %1711 = vmatpush.msrb.mxu3 %v1442_v6  ;;  %1692 = vmatpush.msrb.mxu2 %v1425_v46  ;;  %v1389_v38 = vld [vmem:[#allocation4 + $0x758] sm:$0xff]  ;;  %v1436_v48 = vld [vmem:[#allocation4 + $0x3e8] sm:$0xff]  ;;  %v1419_v50 = vld [vmem:[#allocation4 + $0x580] sm:$0xff] }
 0x338   :  { %1672 = vmatpush.msra.mxu1 %v1409_v8  ;;  %1653 = vmatpush.msra.mxu0 %v1392_v9  ;;  %v1388_v44 = vld [vmem:[#allocation4 + $0x7f8] sm:$0xff]  ;;  %v1387_v49 = vld [vmem:[#allocation4 + $0x808] sm:$0xff]  ;;  %v1403_v51 = vld [vmem:[#allocation4 + $0x7c0] sm:$0xff] }
 0x339   :  { %1712 = vmatpush.msrb.mxu3 %v1441_v42  ;;  %1693 = vmatpush.msrb.mxu2 %v1424_v10  ;;  %v1435_v52 = vld [vmem:[#allocation4 + $0x3f0] sm:$0xff]  ;;  %v1386_v53 = vld [vmem:[#allocation4 + $0x4c8] sm:$0xff]  ;;  %v1418_v54 = vld [vmem:[#allocation4 + $0x558] sm:$0xff] }
 0x33a   :  { %1673 = vmatpush.msra.mxu1 %v1408_v11  ;;  %1654 = vmatpush.msra.mxu0 %v1391_v13  ;;  %v1465_v55 = vld [vmem:[#allocation4 + $0x5b0] sm:$0xff]  ;;  %v1497_v56 = vld [vmem:[#allocation4 + $0x1d8] sm:$0xff]  ;;  %v1402_v57 = vld [vmem:[#allocation4 + $0x880] sm:$0xff] }
 0x33b   :  { %1713 = vmatpush.msrb.mxu3 %v1440_v12  ;;  %1694 = vmatpush.msrb.mxu2 %v1423_v14  ;;  %v1434_v58 = vld [vmem:[#allocation4 + $0x2b8] sm:$0xff]  ;;  %v1464_v59 = vld [vmem:[#allocation4 + $0x390] sm:$0xff]  ;;  %v1496_v61 = vld [vmem:[#allocation4 + $0x180] sm:$0xff] }
 0x33c   :  { %1674 = vmatpush.msra.mxu1 %v1407_v15  ;;  %1655 = vmatpush.msra.mxu0 %v1390_v17  ;;  %v1481_v60 = vld [vmem:[#allocation4 + $0x50] sm:$0xff]  ;;  %v1495_v1 = vld [vmem:[#allocation4 + $0x5b8] sm:$0xff]  ;;  %v1512_v2 = vld [vmem:[#allocation4 + $0xa8] sm:$0xff] }
 0x33d   :  { %1714 = vmatpush.msrb.mxu3 %v1439_v16  ;;  %1695 = vmatpush.msrb.mxu2 %v1422_v18  ;;  %v1513_v62 = vld [vmem:[#allocation4 + $0x610] sm:$0xff]  ;;  %v1462_v3 = vld [vmem:[#allocation4 + $0x848] sm:$0xff]  ;;  %v1478_v46 = vld [vmem:[#allocation4 + $0x3f8] sm:$0xff] }
 0x33e   :  { %1675 = vmatpush.msra.mxu1 %v1406_v35  ;;  %1656 = vmatpush.msra.mxu0 %v1389_v38  ;;  %v1463_v63 = vld [vmem:[#allocation4 + $0x670] sm:$0xff]  ;;  %v1511_v6 = vld [vmem:[#allocation4 + $0x1a8] sm:$0xff]  ;;  %v1493_v8 = vld [vmem:[#allocation4 + $0x78] sm:$0xff] }
 0x33f   :  { %1715 = vmatpush.msrb.mxu3 %v1438_v36  ;;  %1696 = vmatpush.msrb.mxu2 %v1421_v40  ;;  %v1480_v0 = vld [vmem:[#allocation4 + $0x490] sm:$0xff]  ;;  %v1461_v7 = vld [vmem:[#allocation4 + $0x7c8] sm:$0xff]  ;;  %v1477_v10 = vld [vmem:[#allocation4 + $0x7a0] sm:$0xff] }
 0x340   :  { %1676 = vmatpush.msra.mxu1 %v1405_v41  ;;  %1657 = vmatpush.msra.mxu0 %v1388_v44  ;;  %v1479_v4 = vld [vmem:[#allocation4 + $0x7d0] sm:$0xff]  ;;  %v1510_v42 = vld [vmem:[#allocation4 + $0x208] sm:$0xff]  ;;  %v1492_v11 = vld [vmem:[#allocation4 + $0x5f8] sm:$0xff] }
 0x341   :  { %1716 = vmatpush.msrb.mxu3 %v1437_v43  ;;  %1697 = vmatpush.msrb.mxu2 %v1420_v45  ;;  %v1494_v5 = vld [vmem:[#allocation4 + $0x870] sm:$0xff]  ;;  %v1509_v12 = vld [vmem:[#allocation4 + $0x148] sm:$0xff]  ;;  %v1459_v13 = vld [vmem:[#allocation4 + $0x360] sm:$0xff] }
 0x342   :  { %1677 = vmatpush.msra.mxu1 %v1404_v47  ;;  %1658 = vmatpush.msra.mxu0 %v1387_v49  ;;  %v1460_v9 = vld [vmem:[#allocation4 + $0x190] sm:$0xff]  ;;  %v1476_v14 = vld [vmem:[#allocation4 + $0xc0] sm:$0xff]  ;;  %v1491_v15 = vld [vmem:[#allocation4 + $0x548] sm:$0xff] }
 0x343   :  { %1717 = vmatpush.msrb.mxu3 %v1436_v48  ;;  %1698 = vmatpush.msrb.mxu2 %v1419_v50  ;;  %v1508_v16 = vld [vmem:[#allocation4 + $0x5c8] sm:$0xff]  ;;  %v1490_v35 = vld [vmem:[#allocation4 + $0x7f0] sm:$0xff]  ;;  %v1507_v36 = vld [vmem:[#allocation4 + $0x418] sm:$0xff] }
 0x344   :  { %1678 = vmatpush.msra.mxu1 %v1403_v51  ;;  %1659 = vmatpush.msra.mxu0 %v1386_v53  ;;  %v1458_v17 = vld [vmem:[#allocation4 + $0x228] sm:$0xff]  ;;  %v1457_v38 = vld [vmem:[#allocation4 + $0x130] sm:$0xff]  ;;  %v1474_v40 = vld [vmem:[#allocation4 + $0x458] sm:$0xff] }
 0x345   :  { %1718 = vmatpush.msrb.mxu3 %v1435_v52  ;;  %1699 = vmatpush.msrb.mxu2 %v1418_v54  ;;  %v1475_v18 = vld [vmem:[#allocation4 + $0x608] sm:$0xff]  ;;  %v1506_v43 = vld [vmem:[#allocation4 + $0x6d0] sm:$0xff]  ;;  %v1456_v44 = vld [vmem:[#allocation4 + $0x798] sm:$0xff] }
 0x346   :  { %1724 = vmatpush.msrb.mxu0 %v1465_v55  ;;  %1679 = vmatpush.msra.mxu1 %v1402_v57  ;;  %v1489_v41 = vld [vmem:[#allocation4 + $0x48] sm:$0xff]  ;;  %v1473_v45 = vld [vmem:[#allocation4 + $0x200] sm:$0xff]  ;;  %v1505_v48 = vld [vmem:[#allocation4 + $0x5d0] sm:$0xff] }
 0x347   :  { %1764 = vmatpush.msra.mxu2 %v1497_v56  ;;  %1719 = vmatpush.msrb.mxu3 %v1434_v58  ;;  %v1488_v47 = vld [vmem:[#allocation4 + $0x820] sm:$0xff]  ;;  %v1455_v49 = vld [vmem:[#allocation4 + $0xd8] sm:$0xff]  ;;  %v1472_v50 = vld [vmem:[#allocation4 + $0x6b0] sm:$0xff] }
 0x348   :  { %1725 = vmatpush.msrb.mxu0 %v1464_v59  ;;  %1744 = vmatpush.msrb.mxu1 %v1481_v60  ;;  %v1487_v51 = vld [vmem:[#allocation4 + $0x480] sm:$0xff]  ;;  %v1504_v52 = vld [vmem:[#allocation4 + $0x6d8] sm:$0xff]  ;;  %v1454_v53 = vld [vmem:[#allocation4 + $0x550] sm:$0xff] }
 0x349   :  { %1765 = vmatpush.msra.mxu2 %v1496_v61  ;;  %1784 = vmatpush.msra.mxu3 %v1513_v62  ;;  %v1471_v54 = vld [vmem:[#allocation4 + $0x248] sm:$0xff]  ;;  %v1486_v55 = vld [vmem:[#allocation4 + $0x630] sm:$0xff]  ;;  %v1503_v56 = vld [vmem:[#allocation4 + $0x258] sm:$0xff] }
 0x34a   :  { %1726 = vmatpush.msrb.mxu0 %v1463_v63  ;;  %1745 = vmatpush.msrb.mxu1 %v1480_v0  ;;  %v1453_v57 = vld [vmem:[#allocation4 + $0x7e0] sm:$0xff]  ;;  %v1470_v58 = vld [vmem:[#allocation4 + $0x368] sm:$0xff]  ;;  %v1485_v59 = vld [vmem:[#allocation4 + $0x570] sm:$0xff] }
 0x34b   :  { %1766 = vmatpush.msra.mxu2 %v1495_v1  ;;  %1785 = vmatpush.msra.mxu3 %v1512_v2  ;;  %v1502_v60 = vld [vmem:[#allocation4 + $0x828] sm:$0xff]  ;;  %v1469_v62 = vld [vmem:[#allocation4 + $0x600] sm:$0xff] }
 0x34c   :  { %1727 = vmatpush.msrb.mxu0 %v1462_v3  ;;  %1746 = vmatpush.msrb.mxu1 %v1479_v4  ;;  %v1452_v61 = vld [vmem:[#allocation4 + $0x6e8] sm:$0xff]  ;;  %v1501_v0 = vld [vmem:[#allocation4 + $0x2c0] sm:$0xff] }
 0x34d   :  { %1767 = vmatpush.msra.mxu2 %v1494_v5  ;;  %1786 = vmatpush.msra.mxu3 %v1511_v6  ;;  %v1484_v63 = vld [vmem:[#allocation4 + $0x888] sm:$0xff]  ;;  %v1483_v3 = vld [vmem:[#allocation4 + $0x520] sm:$0xff]  ;;  %v1467_v6 = vld [vmem:[#allocation4 + $0x658] sm:$0xff] }
 0x34e   :  { %1728 = vmatpush.msrb.mxu0 %v1461_v7  ;;  %1747 = vmatpush.msrb.mxu1 %v1478_v46  ;;  %v1451_v1 = vld [vmem:[#allocation4 + $0x5a8] sm:$0xff]  ;;  %v1500_v4 = vld [vmem:[#allocation4 + $0x240] sm:$0xff]  ;;  %v1482_v7 = vld [vmem:[#allocation4 + $0x318] sm:$0xff] }
 0x34f   :  { %1768 = vmatpush.msra.mxu2 %v1493_v8  ;;  %1787 = vmatpush.msra.mxu3 %v1510_v42  ;;  %v1468_v2 = vld [vmem:[#allocation4 + $0x2e8] sm:$0xff]  ;;  %v1450_v5 = vld [vmem:[#allocation4 + $0xe0] sm:$0xff]  ;;  %v1499_v46 = vld [vmem:[#allocation4 + $0xd0] sm:$0xff] }
 0x350   :  { %1729 = vmatpush.msrb.mxu0 %v1460_v9  ;;  %1748 = vmatpush.msrb.mxu1 %v1477_v10  ;;  %v1529_v8 = vld [vmem:[#allocation4 + $0x420] sm:$0xff]  ;;  %v1561_v42 = vld [vmem:[#allocation4 + $0x410] sm:$0xff]  ;;  %v1466_v9 = vld [vmem:[#allocation4 + $0x5e8] sm:$0xff] }
 0x351   :  { %1769 = vmatpush.msra.mxu2 %v1492_v11  ;;  %1788 = vmatpush.msra.mxu3 %v1509_v12  ;;  %v1498_v10 = vld [vmem:[#allocation4 + $0x20] sm:$0xff] }
 0x352   :  { %1730 = vmatpush.msrb.mxu0 %v1459_v13  ;;  %1749 = vmatpush.msrb.mxu1 %v1476_v14  ;;  %v1528_v11 = vld [vmem:[#allocation4 + $0x140] sm:$0xff]  ;;  %v1560_v13 = vld [vmem:[#allocation4 + $0x830] sm:$0xff] }
 0x353   :  { %1770 = vmatpush.msra.mxu2 %v1491_v15  ;;  %1789 = vmatpush.msra.mxu3 %v1508_v16  ;;  %v1545_v12 = vld [vmem:[#allocation4 + $0x100] sm:$0xff]  ;;  %v1544_v16 = vld [vmem:[#allocation4 + $0x98] sm:$0xff] }
 0x354   :  { %1731 = vmatpush.msrb.mxu0 %v1458_v17  ;;  %1750 = vmatpush.msrb.mxu1 %v1475_v18  ;;  %v1577_v14 = vld [vmem:[#allocation4 + $0x300] sm:$0xff]  ;;  %v1526_v17 = vld [vmem:[#allocation4 + $0x1b0] sm:$0xff]  ;;  %v1543_v18 = vld [vmem:[#allocation4 + $0x528] sm:$0xff] }
 0x355   :  { %1771 = vmatpush.msra.mxu2 %v1490_v35  ;;  %1790 = vmatpush.msra.mxu3 %v1507_v36  ;;  %v1527_v15 = vld [vmem:[#allocation4 + $0x500] sm:$0xff]  ;;  %v1558_v35 = vld [vmem:[#allocation4 + $0x278] sm:$0xff]  ;;  %v1575_v36 = vld [vmem:[#allocation4 + $0x730] sm:$0xff] }
 0x356   :  { %1732 = vmatpush.msrb.mxu0 %v1457_v38  ;;  %1751 = vmatpush.msrb.mxu1 %v1474_v40  ;;  %v1557_v38 = vld [vmem:[#allocation4 + $0x10] sm:$0xff]  ;;  %v1574_v40 = vld [vmem:[#allocation4 + $0x348] sm:$0xff]  ;;  %v1552_v19 = vld [vmem:[#allocation4 + $0x80] sm:$0xff] }
 0x357   :  { %1772 = vmatpush.msra.mxu2 %v1489_v41  ;;  %1791 = vmatpush.msra.mxu3 %v1506_v43  ;;  %v1524_v41 = vld [vmem:[#allocation4 + $0x28] sm:$0xff]  ;;  %v1541_v43 = vld [vmem:[#allocation4 + $0x720] sm:$0xff] }
 0x358   :  { %1733 = vmatpush.msrb.mxu0 %v1456_v44  ;;  %1752 = vmatpush.msrb.mxu1 %v1473_v45  ;;  %v1556_v44 = vld [vmem:[#allocation4 + $0x1b8] sm:$0xff]  ;;  %v1573_v45 = vld [vmem:[#allocation4 + $0x428] sm:$0xff] }
 0x359   :  { %1773 = vmatpush.msra.mxu2 %v1488_v47  ;;  %1792 = vmatpush.msra.mxu3 %v1505_v48  ;;  %v1523_v47 = vld [vmem:[#allocation4 + $0x198] sm:$0xff]  ;;  %v1540_v48 = vld [vmem:[#allocation4 + $0x68] sm:$0xff] }
 0x35a   :  { %1734 = vmatpush.msrb.mxu0 %v1455_v49  ;;  %1753 = vmatpush.msrb.mxu1 %v1472_v50  ;;  %v1572_v49 = vld [vmem:[#allocation4 + $0x2a8] sm:$0xff]  ;;  %v1522_v50 = vld [vmem:[#allocation4 + $0x498] sm:$0xff] }
 0x35b   :  { %1774 = vmatpush.msra.mxu2 %v1487_v51  ;;  %1793 = vmatpush.msra.mxu3 %v1504_v52  ;;  %v1539_v51 = vld [vmem:[#allocation4 + $0x1d0] sm:$0xff]  ;;  %v1571_v52 = vld [vmem:[#allocation4 + $0x1c0] sm:$0xff] }
 0x35c   :  { %1735 = vmatpush.msrb.mxu0 %v1454_v53  ;;  %1754 = vmatpush.msrb.mxu1 %v1471_v54  ;;  %v1538_v53 = vld [vmem:[#allocation4 + $0x6c8] sm:$0xff] }
 0x35d   :  { %1775 = vmatpush.msra.mxu2 %v1486_v55  ;;  %1794 = vmatpush.msra.mxu3 %v1503_v56  ;;  %v1553_v54 = vld [vmem:[#allocation4 + $0x4e8] sm:$0xff]  ;;  %v1570_v55 = vld [vmem:[#allocation4 + $0x230] sm:$0xff] }
 0x35e   :  { %1736 = vmatpush.msrb.mxu0 %v1453_v57  ;;  %1755 = vmatpush.msrb.mxu1 %v1470_v58  ;;  %v1520_v56 = vld [vmem:[#allocation4 + $0x88] sm:$0xff]  ;;  %v1537_v57 = vld [vmem:[#allocation4 + $0x3d0] sm:$0xff] }
 0x35f   :  { %1776 = vmatpush.msra.mxu2 %v1485_v59  ;;  %1795 = vmatpush.msra.mxu3 %v1502_v60  ;;  %v1519_v58 = vld [vmem:[#allocation4 + $0x450] sm:$0xff]  ;;  %v1536_v59 = vld [vmem:[#allocation4 + $0x168] sm:$0xff]  ;;  %v1551_v60 = vld [vmem:[#allocation4 + $0x398] sm:$0xff] }
 0x360   :  { %1737 = vmatpush.msrb.mxu0 %v1452_v61  ;;  %1756 = vmatpush.msrb.mxu1 %v1469_v62  ;;  %v1568_v61 = vld [vmem:[#allocation4 + $0x188] sm:$0xff]  ;;  %v1518_v62 = vld [vmem:[#allocation4 + $0x30] sm:$0xff] }
 0x361   :  { %1777 = vmatpush.msra.mxu2 %v1484_v63  ;;  %1796 = vmatpush.msra.mxu3 %v1501_v0  ;;  %v1535_v63 = vld [vmem:[#allocation4 + $0x620] sm:$0xff]  ;;  %v1550_v0 = vld [vmem:[#allocation4 + $0x2d0] sm:$0xff] }
 0x362   :  { %1738 = vmatpush.msrb.mxu0 %v1451_v1  ;;  %1757 = vmatpush.msrb.mxu1 %v1468_v2  ;;  %v1567_v1 = vld [vmem:[#allocation4 + $0x38] sm:$0xff]  ;;  %v1517_v2 = vld [vmem:[#allocation4 + $0x1f0] sm:$0xff] }
 0x363   :  { %1778 = vmatpush.msra.mxu2 %v1483_v3  ;;  %1797 = vmatpush.msra.mxu3 %v1500_v4  ;;  %v1534_v3 = vld [vmem:[#allocation4 + $0x220] sm:$0xff]  ;;  %v1549_v4 = vld [vmem:[#allocation4 + $0x370] sm:$0xff] }
 0x364   :  { %1739 = vmatpush.msrb.mxu0 %v1450_v5  ;;  %1758 = vmatpush.msrb.mxu1 %v1467_v6  ;;  %v1566_v5 = vld [vmem:[#allocation4 + $0x850] sm:$0xff]  ;;  %v1516_v6 = vld [vmem:[#allocation4 + $0x400] sm:$0xff] }
 0x365   :  { %1779 = vmatpush.msra.mxu2 %v1482_v7  ;;  %1798 = vmatpush.msra.mxu3 %v1499_v46  ;;  %v1533_v7 = vld [vmem:[#allocation4 + $0x4f0] sm:$0xff]  ;;  %v1548_v46 = vld [vmem:[#allocation4 + $0x128] sm:$0xff] }
 0x366   :  { %1660 = vmatmul.f32.vlgmr.msra.gmra.mxu0 %v1335_v21  ;;  %1700 = vmatmul.f32.vlgmr.msrb.gmra.mxu2 %v1339_v23  ;;  %v1559_v21 = vld [vmem:[#allocation4 + $0x350] sm:$0xff]  ;;  %v1576_v23 = vld [vmem:[#allocation4 + $0x7b8] sm:$0xff] }
 0x367   :  { %1804 = vmatpush.msra.mxu0 %v1529_v8  ;;  %1844 = vmatpush.msrb.mxu2 %v1561_v42  ;;  %v1565_v8 = vld [vmem:[#allocation4 + $0x270] sm:$0xff] }
 0x368   :  { %1759 = vmatpush.msrb.mxu1 %v1466_v9  ;;  %1799 = vmatpush.msra.mxu3 %v1498_v10  ;;  %v1515_v42 = vld [vmem:[#allocation4 + $0x710] sm:$0xff]  ;;  %v1532_v9 = vld [vmem:[#allocation4 + $0x3d8] sm:$0xff]  ;;  %v1547_v10 = vld [vmem:[#allocation4 + $0x4a8] sm:$0xff] }
 0x369   :  { %1680 = vmatmul.f32.vlgmr.msra.gmra.mxu1 %v1337_v22  ;;  %1720 = vmatmul.f32.vlgmr.msrb.gmra.mxu3 %v1341_v24  ;;  %v1525_v22 = vld [vmem:[#allocation4 + $0x728] sm:$0xff] }
 0x36a   :  { %1805 = vmatpush.msra.mxu0 %v1528_v11  ;;  %1824 = vmatpush.msra.mxu1 %v1545_v12  ;;  %v1542_v24 = vld [vmem:[#allocation4 + $0x288] sm:$0xff]  ;;  %v1564_v11 = vld [vmem:[#allocation4 + $0x790] sm:$0xff] }
 0x36b   :  { %1845 = vmatpush.msrb.mxu2 %v1560_v13  ;;  %1864 = vmatpush.msrb.mxu3 %v1577_v14  ;;  %v1514_v12 = vld [vmem:[#allocation4 + $0x690] sm:$0xff]  ;;  %v1531_v13 = vld [vmem:[#allocation4 + $0x760] sm:$0xff]  ;;  %v1546_v14 = vld [vmem:[#allocation4 + $0x468] sm:$0xff] }
 0x36c   :  { %1806 = vmatpush.msra.mxu0 %v1527_v15  ;;  %1825 = vmatpush.msra.mxu1 %v1544_v16  ;;  %v1563_v15 = vld [vmem:[#allocation4 + $0x818] sm:$0xff]  ;;  %v1593_v16 = vld [vmem:[#allocation4 + $0x108] sm:$0xff] }
 0x36d   :  { %1846 = vmatpush.msrb.mxu2 %v1559_v21  ;;  %1865 = vmatpush.msrb.mxu3 %v1576_v23  ;;  %v1625_v21 = vld [vmem:[#allocation4 + $0x6f8] sm:$0xff]  ;;  %v1530_v23 = vld [vmem:[#allocation4 + $0x5a0] sm:$0xff] }
 0x36e   :  { %1807 = vmatpush.msra.mxu0 %v1526_v17  ;;  %1826 = vmatpush.msra.mxu1 %v1543_v18  ;;  %v1562_v17 = vld [vmem:[#allocation4 + $0x680] sm:$0xff]  ;;  %v1592_v18 = vld [vmem:[#allocation4 + $0x508] sm:$0xff] }
 0x36f   :  { %1847 = vmatpush.msrb.mxu2 %v1558_v35  ;;  %1866 = vmatpush.msrb.mxu3 %v1575_v36  ;;  %v1609_v35 = vld [vmem:[#allocation4 + $0x238] sm:$0xff]  ;;  %v1624_v36 = vld [vmem:[#allocation4 + $0x3b0] sm:$0xff] }
 0x370   :  { %1780 = vmatmul.f32.vlgmr.msra.gmra.mxu2 %v1347_v26  ;;  %1808 = vmatpush.msra.mxu0 %v1525_v22  ;;  %v1555_v26 = vld [vmem:[#allocation4 + $0x740] sm:$0xff]  ;;  %v1641_v22 = vld [vmem:[#allocation4 + $0x470] sm:$0xff] }
 0x371   :  { %1827 = vmatpush.msra.mxu1 %v1542_v24  ;;  %1848 = vmatpush.msrb.mxu2 %v1557_v38  ;;  %v1591_v24 = vld [vmem:[#allocation4 + $0x308] sm:$0xff]  ;;  %v1608_v38 = vld [vmem:[#allocation4 + $0x5e0] sm:$0xff] }
 0x372   :  { %1867 = vmatpush.msrb.mxu3 %v1574_v40  ;;  %1740 = vmatmul.f32.vlgmr.msrb.gmra.mxu0 %v1343_v39  ;;  %v1554_v39 = vld [vmem:[#allocation4 + $0x70] sm:$0xff]  ;;  %v1590_v40 = vld [vmem:[#allocation4 + $0x358] sm:$0xff] }
 0x373   :  { %1800 = vmatmul.f32.vlgmr.msra.gmra.mxu3 %v1349_v27  ;;  %1809 = vmatpush.msra.mxu0 %v1524_v41  ;;  %v1521_v27 = vld [vmem:[#allocation4 + $0x3c0] sm:$0xff]  ;;  %v1607_v41 = vld [vmem:[#allocation4 + $0x678] sm:$0xff] }
 0x374   :  { %1828 = vmatpush.msra.mxu1 %v1541_v43  ;;  %1849 = vmatpush.msrb.mxu2 %v1556_v44  ;;  %v1622_v43 = vld [vmem:[#allocation4 + $0x868] sm:$0xff]  ;;  %v1639_v44 = vld [vmem:[#allocation4 + $0x2d8] sm:$0xff] }
 0x375   :  { %1868 = vmatpush.msrb.mxu3 %v1573_v45  ;;  %1760 = vmatmul.f32.vlgmr.msrb.gmra.mxu1 %v1345_v25  ;;  %v1569_v25 = vld [vmem:[#allocation4 + $0x268] sm:$0xff]  ;;  %v1606_v45 = vld [vmem:[#allocation4 + $0x640] sm:$0xff] }
 0x376   :  { %1810 = vmatpush.msra.mxu0 %v1523_v47  ;;  %1829 = vmatpush.msra.mxu1 %v1540_v48  ;;  %v1638_v47 = vld [vmem:[#allocation4 + $0x1a0] sm:$0xff]  ;;  %v1588_v48 = vld [vmem:[#allocation4 + $0x290] sm:$0xff] }
 0x377   :  { %1850 = vmatpush.msrb.mxu2 %v1555_v26  ;;  %1869 = vmatpush.msrb.mxu3 %v1572_v49  ;;  %v1605_v26 = vld [vmem:[#allocation4 + $0x780] sm:$0xff]  ;;  %v1620_v49 = vld [vmem:[#allocation4 + $0xf8] sm:$0xff] }
 0x378   :  { %1811 = vmatpush.msra.mxu0 %v1522_v50  ;;  %1830 = vmatpush.msra.mxu1 %v1539_v51  ;;  %v1637_v50 = vld [vmem:[#allocation4 + $0x878] sm:$0xff]  ;;  %v1587_v51 = vld [vmem:[#allocation4 + $0x2b0] sm:$0xff] }
 0x379   :  { %1851 = vmatpush.msrb.mxu2 %v1554_v39  ;;  %1870 = vmatpush.msrb.mxu3 %v1571_v52  ;;  %v1604_v39 = vld [vmem:[#allocation4 + $0x6f0] sm:$0xff] }
 0x37a   :  { %1812 = vmatpush.msra.mxu0 %v1521_v27  ;;  %1831 = vmatpush.msra.mxu1 %v1538_v53  ;;  %v1619_v52 = vld [vmem:[#allocation4 + $0x110] sm:$0xff]  ;;  %v1636_v27 = vld [vmem:[#allocation4 + $0x160] sm:$0xff]  ;;  %v1586_v53 = vld [vmem:[#allocation4 + $0x478] sm:$0xff] }
 0x37b   :  { %1852 = vmatpush.msrb.mxu2 %v1553_v54  ;;  %1871 = vmatpush.msrb.mxu3 %v1570_v55  ;;  %v1603_v54 = vld [vmem:[#allocation4 + $0x6a8] sm:$0xff]  ;;  %v1618_v55 = vld [vmem:[#allocation4 + $0x118] sm:$0xff] }
 0x37c   :  { %1813 = vmatpush.msra.mxu0 %v1520_v56  ;;  %1832 = vmatpush.msra.mxu1 %v1537_v57  ;;  %v1635_v56 = vld [vmem:[#allocation4 + $0x260] sm:$0xff]  ;;  %v1585_v57 = vld [vmem:[#allocation4 + $0x1f8] sm:$0xff] }
 0x37d   :  { %1853 = vmatpush.msrb.mxu2 %v1552_v19  ;;  %1872 = vmatpush.msrb.mxu3 %v1569_v25  ;;  %v1602_v19 = vld [vmem:[#allocation4 + $0x7d8] sm:$0xff]  ;;  %v1617_v25 = vld [vmem:[#allocation4 + $0x540] sm:$0xff] }
 0x37e   :  { %1814 = vmatpush.msra.mxu0 %v1519_v58  ;;  %1833 = vmatpush.msra.mxu1 %v1536_v59  ;;  %v1634_v58 = vld [vmem:[#allocation4 + $0x7b0] sm:$0xff]  ;;  %v1584_v59 = vld [vmem:[#allocation4 + $0x560] sm:$0xff] }
 0x37f   :  { %1854 = vmatpush.msrb.mxu2 %v1551_v60  ;;  %1873 = vmatpush.msrb.mxu3 %v1568_v61  ;;  %v1601_v60 = vld [vmem:[#allocation4 + $0x218] sm:$0xff] }
 0x380   :  { %1815 = vmatpush.msra.mxu0 %v1518_v62  ;;  %1834 = vmatpush.msra.mxu1 %v1535_v63  ;;  %v1616_v61 = vld [vmem:[#allocation4 + $0x598] sm:$0xff]  ;;  %v1633_v62 = vld [vmem:[#allocation4 + $0x668] sm:$0xff] }
 0x381   :  { %1855 = vmatpush.msrb.mxu2 %v1550_v0  ;;  %1874 = vmatpush.msrb.mxu3 %v1567_v1  ;;  %v1583_v63 = vld [vmem:[#allocation4 + $0x138] sm:$0xff]  ;;  %v1600_v0 = vld [vmem:[#allocation4 + $0x3e0] sm:$0xff]  ;;  %v1615_v1 = vld [vmem:[#allocation4 + $0x768] sm:$0xff] }
 0x382   :  { %1816 = vmatpush.msra.mxu0 %v1517_v2  ;;  %1835 = vmatpush.msra.mxu1 %v1534_v3  ;;  %v1632_v2 = vld [vmem:[#allocation4 + $0x4d8] sm:$0xff]  ;;  %v1582_v3 = vld [vmem:[#allocation4 + $0x440] sm:$0xff] }
 0x383   :  { %1856 = vmatpush.msrb.mxu2 %v1549_v4  ;;  %1875 = vmatpush.msrb.mxu3 %v1566_v5  ;;  %v1599_v4 = vld [vmem:[#allocation4 + $0x618] sm:$0xff]  ;;  %v1614_v5 = vld [vmem:[#allocation4 + $0x90] sm:$0xff] }
 0x384   :  { %1817 = vmatpush.msra.mxu0 %v1516_v6  ;;  %1836 = vmatpush.msra.mxu1 %v1533_v7  ;;  %v1631_v6 = vld [vmem:[#allocation4 + $0x310] sm:$0xff]  ;;  %v1581_v7 = vld [vmem:[#allocation4 + $0x40] sm:$0xff] }
 0x385   :  { %1857 = vmatpush.msrb.mxu2 %v1548_v46  ;;  %1876 = vmatpush.msrb.mxu3 %v1565_v8  ;;  %v1598_v46 = vld [vmem:[#allocation4 + $0x120] sm:$0xff]  ;;  %v1613_v8 = vld [vmem:[#allocation4 + $0x1c8] sm:$0xff] }
 0x386   :  { %1818 = vmatpush.msra.mxu0 %v1515_v42  ;;  %1837 = vmatpush.msra.mxu1 %v1532_v9  ;;  %v1630_v42 = vld [vmem:[#allocation4 + $0x3c8] sm:$0xff] }
 0x387   :  { %1858 = vmatpush.msrb.mxu2 %v1547_v10  ;;  %1877 = vmatpush.msrb.mxu3 %v1564_v11  ;;  %v1580_v9 = vld [vmem:[#allocation4 + $0x688] sm:$0xff]  ;;  %v1597_v10 = vld [vmem:[#allocation4 + $0x60] sm:$0xff] }
 0x388   :  { %1819 = vmatpush.msra.mxu0 %v1514_v12  ;;  %1838 = vmatpush.msra.mxu1 %v1531_v13  ;;  %v1612_v11 = vld [vmem:[#allocation4 + $0x7a8] sm:$0xff]  ;;  %v1629_v12 = vld [vmem:[#allocation4 + $0x210] sm:$0xff] }
 0x389   :  { %1859 = vmatpush.msrb.mxu2 %v1546_v14  ;;  %1878 = vmatpush.msrb.mxu3 %v1563_v15  ;;  %v1579_v13 = vld [vmem:[#allocation4 + $0x388] sm:$0xff]  ;;  %v1611_v15 = vld [vmem:[#allocation4 + $0x4d0] sm:$0xff] }
 0x38a   :  { %1820 = vmatmul.f32.vlgmr.msra.gmra.mxu0 %v1351_v28  ;;  %1860 = vmatmul.f32.vlgmr.msrb.gmra.mxu2 %v1355_v30  ;;  %v1623_v28 = vld [vmem:[#allocation4 + $0x460] sm:$0xff]  ;;  %v1596_v14 = vld [vmem:[#allocation4 + $0xe8] sm:$0xff] }
 0x38b   :  { %1884 = vmatpush.msrb.mxu0 %v1593_v16  ;;  %1924 = vmatpush.msra.mxu2 %v1625_v21  ;;  %v1640_v30 = vld [vmem:[#allocation4 + $0x6c0] sm:$0xff]  ;;  %v1628_v16 = vld [vmem:[#allocation4 + $0x298] sm:$0xff]  ;;  %v1578_v21 = vld [vmem:[#allocation4 + $0x170] sm:$0xff] }
 0x38c   :  { %1839 = vmatpush.msra.mxu1 %v1530_v23  ;;  %1879 = vmatpush.msrb.mxu3 %v1562_v17  ;;  %v1595_v23 = vld [vmem:[#allocation4 + $0x150] sm:$0xff] }
 0x38d   :  { %1840 = vmatmul.f32.vlgmr.msra.gmra.mxu1 %v1353_v29  ;;  %1880 = vmatmul.f32.vlgmr.msrb.gmra.mxu3 %v1357_v31  ;;  %v1589_v29 = vld [vmem:[#allocation4 + $0x518] sm:$0xff]  ;;  %v1621_v31 = vld [vmem:[#allocation4 + $0xf0] sm:$0xff] }
 0x38e   :  { %1885 = vmatpush.msrb.mxu0 %v1592_v18  ;;  %1904 = vmatpush.msrb.mxu1 %v1609_v35  ;;  %v1610_v17 = vld [vmem:[#allocation4 + $0x750] sm:$0xff]  ;;  %v1594_v35 = vld [vmem:[#allocation4 + $0x4f8] sm:$0xff] }
 0x38f   :  { %1925 = vmatpush.msra.mxu2 %v1624_v36  ;;  %1944 = vmatpush.msra.mxu3 %v1641_v22  ;;  %v1627_v18 = vld [vmem:[#allocation4 + $0x810] sm:$0xff]  ;;  %v1626_v36 = vld [vmem:[#allocation4 + $0x718] sm:$0xff] }
 0x390   :  { %1886 = vmatpush.msrb.mxu0 %v1591_v24  ;;  %1905 = vmatpush.msrb.mxu1 %v1608_v38  ;;  %v1980_v22 = vld [vmem:[#allocation4 + $0x538] sm:$0xff]  ;;  %v1979_v24 = vld [vmem:[#allocation4 + $0x448] sm:$0xff] }
 0x391   :  { %1926 = vmatpush.msra.mxu2 %v1623_v28  ;;  %1945 = vmatpush.msra.mxu3 %v1640_v30  ;;  %v1978_v38 = vld [vmem:[#allocation4 + $0x178] sm:$0xff]  ;;  %v1977_v28 = vld [vmem:[#allocation4 + $0x250] sm:$0xff] }
 0x392   :  { %1887 = vmatpush.msrb.mxu0 %v1590_v40  ;;  %1906 = vmatpush.msrb.mxu1 %v1607_v41  ;;  %v1976_v30 = vld [vmem:[#allocation4 + $0x2f0] sm:$0xff]  ;;  %v2226_v40 = vld [vmem:[#allocation4 + $0x2c8] ss:$0 sm:$0xff] }
 0x393   :  { %1927 = vmatpush.msra.mxu2 %v1622_v43  ;;  %1946 = vmatpush.msra.mxu3 %v1639_v44  ;;  %v1973_v43 = vld [vmem:[#allocation4 + $0x3a8] sm:$0xff] }
 0x394   :  { %1888 = vmatpush.msrb.mxu0 %v1589_v29  ;;  %1907 = vmatpush.msrb.mxu1 %v1606_v45 }
 0x395   :  { %1928 = vmatpush.msra.mxu2 %v1621_v31  ;;  %1947 = vmatpush.msra.mxu3 %v1638_v47  ;;  %v1971_v31 = vld [vmem:[#allocation4 + $0x1e0] sm:$0xff] }
 0x396   :  { %1889 = vmatpush.msrb.mxu0 %v1588_v48  ;;  %1908 = vmatpush.msrb.mxu1 %v1605_v26  ;;  %v1970_v48 = vld [vmem:[#allocation4 + $0x408] sm:$0xff] }
 0x397   :  { %1929 = vmatpush.msra.mxu2 %v1620_v49  ;;  %1948 = vmatpush.msra.mxu3 %v1637_v50  ;;  %v1969_v49 = vld [vmem:[#allocation4 + $0x330] sm:$0xff] }
 0x398   :  { %1890 = vmatpush.msrb.mxu0 %v1587_v51  ;;  %1909 = vmatpush.msrb.mxu1 %v1604_v39  ;;  %v1968_v51 = vld [vmem:[#allocation4 + $0x860] sm:$0xff] }
 0x399   :  { %1930 = vmatpush.msra.mxu2 %v1619_v52  ;;  %1949 = vmatpush.msra.mxu3 %v1636_v27  ;;  %v1967_v52 = vld [vmem:[#allocation4 + $0x4a0] sm:$0xff] }
 0x39a   :  { %1891 = vmatpush.msrb.mxu0 %v1586_v53  ;;  %1910 = vmatpush.msrb.mxu1 %v1603_v54  ;;  %v1966_v53 = vld [vmem:[#allocation4 + $0x6b8] sm:$0xff] }
 0x39b   :  { %1931 = vmatpush.msra.mxu2 %v1618_v55  ;;  %1950 = vmatpush.msra.mxu3 %v1635_v56  ;;  %v1965_v55 = vld [vmem:[#allocation4 + $0x4b0] sm:$0xff] }
 0x39c   :  { %1892 = vmatpush.msrb.mxu0 %v1585_v57  ;;  %1911 = vmatpush.msrb.mxu1 %v1602_v19 }
 0x39d   :  { %1932 = vmatpush.msra.mxu2 %v1617_v25  ;;  %1951 = vmatpush.msra.mxu3 %v1634_v58 }
 0x39e   :  { %1893 = vmatpush.msrb.mxu0 %v1584_v59  ;;  %1912 = vmatpush.msrb.mxu1 %v1601_v60 }
 0x39f   :  { %1933 = vmatpush.msra.mxu2 %v1616_v61  ;;  %1952 = vmatpush.msra.mxu3 %v1633_v62 }
 0x3a0   :  { %1894 = vmatpush.msrb.mxu0 %v1583_v63  ;;  %1913 = vmatpush.msrb.mxu1 %v1600_v0 }
 0x3a1   :  { %1934 = vmatpush.msra.mxu2 %v1615_v1  ;;  %1953 = vmatpush.msra.mxu3 %v1632_v2 }
 0x3a2   :  { %1895 = vmatpush.msrb.mxu0 %v1582_v3  ;;  %1914 = vmatpush.msrb.mxu1 %v1599_v4 }
 0x3a3   :  { %1935 = vmatpush.msra.mxu2 %v1614_v5  ;;  %1954 = vmatpush.msra.mxu3 %v1631_v6 }
 0x3a4   :  { %1896 = vmatpush.msrb.mxu0 %v1581_v7  ;;  %1915 = vmatpush.msrb.mxu1 %v1598_v46 }
 0x3a5   :  { %1936 = vmatpush.msra.mxu2 %v1613_v8  ;;  %1955 = vmatpush.msra.mxu3 %v1630_v42 }
 0x3a6   :  { %1897 = vmatpush.msrb.mxu0 %v1580_v9  ;;  %1916 = vmatpush.msrb.mxu1 %v1597_v10  ;;  %v2227_v9 = vld [vmem:[#allocation4 + $0x5f0] ss:$0 sm:$0xff] }
 0x3a7   :  { %1937 = vmatpush.msra.mxu2 %v1612_v11  ;;  %1956 = vmatpush.msra.mxu3 %v1629_v12 }
 0x3a8   :  { %1898 = vmatpush.msrb.mxu0 %v1579_v13  ;;  %1917 = vmatpush.msrb.mxu1 %v1596_v14 }
 0x3a9   :  { %1938 = vmatpush.msra.mxu2 %v1611_v15  ;;  %1957 = vmatpush.msra.mxu3 %v1628_v16 }
 0x3aa   :  { %1899 = vmatpush.msrb.mxu0 %v1578_v21  ;;  %1918 = vmatpush.msrb.mxu1 %v1595_v23 }
 0x3ab   :  { %1939 = vmatpush.msra.mxu2 %v1610_v17  ;;  %1958 = vmatpush.msra.mxu3 %v1627_v18 }
 0x3ac   :  { %1900 = vmatmul.f32.vlgmr.msrb.gmra.mxu0 %v1359_v32  ;;  %1940 = vmatmul.f32.vlgmr.msra.gmra.mxu2 %v1363_v33  ;;  %v1975_v32 = vld [vmem:[#allocation4 + $0x788] sm:$0xff]  ;;  %v1974_v33 = vld [vmem:[#allocation4 + $0x770] sm:$0xff] }
 0x3ad   :  { %1919 = vmatpush.msrb.mxu1 %v1594_v35  ;;  %1959 = vmatpush.msra.mxu3 %v1626_v36 }
 0x3ae   :  { %1920 = vmatmul.f32.vlgmr.msrb.gmra.mxu1 %v1361_v37  ;;  %1960 = vmatmul.f32.vlgmr.msra.gmra.mxu3 %v1365_v34  ;;  %v1972_v37 = vld [vmem:[#allocation4 + $0x530] sm:$0xff] }
 0x3af   :  { %1983 = vmatpush.msra.mxu0 %v1980_v22 }
 0x3b1   :  { %1984 = vmatpush.msra.mxu0 %v1979_v24 }
 0x3b3   :  { %1985 = vmatpush.msra.mxu0 %v1978_v38 }
 0x3b5   :  { %1986 = vmatpush.msra.mxu0 %v1977_v28 }
 0x3b7   :  { %1987 = vmatpush.msra.mxu0 %v1976_v30 }
 0x3b9   :  { %1988 = vmatpush.msra.mxu0 %v1975_v32 }
 0x3bb   :  { %1989 = vmatpush.msra.mxu0 %v1974_v33 }
 0x3bd   :  { %1990 = vmatpush.msra.mxu0 %v1973_v43 }
 0x3bf   :  { %1991 = vmatpush.msra.mxu0 %v1972_v37 }
 0x3c1   :  { %1992 = vmatpush.msra.mxu0 %v1971_v31 }
 0x3c3   :  { %1993 = vmatpush.msra.mxu0 %v1970_v48 }
 0x3c5   :  { %1994 = vmatpush.msra.mxu0 %v1969_v49 }
 0x3c7   :  { %1995 = vmatpush.msra.mxu0 %v1968_v51 }
 0x3c9   :  { %1996 = vmatpush.msra.mxu0 %v1967_v52 }
 0x3cb   :  { %1997 = vmatpush.msra.mxu0 %v1966_v53 }
 0x3cd   :  { %1998 = vmatpush.msra.mxu0 %v1965_v55 }
 0x3e3   :  { %v1661_v41 = vpop.f32.mrf.mxu0 }
 0x3e4   :  { %v1662_v20 = vadd.f32 %v2226_v40, %v1661_v41 }
 0x3e6   :  { %v1681_v34 = vpop.f32.mrf.mxu1 }
 0x3e7   :  { %v1682_v44 = vadd.f32 %v1681_v34, %v1662_v20 }
 0x3e9   :  { %v1701_v29 = vpop.f32.mrf.mxu2 }
 0x3ea   :  { %v1702_v45 = vadd.f32 %v1701_v29, %v1682_v44 }
 0x3ec   :  { %v1721_v47 = vpop.f32.mrf.mxu3 }
 0x3ed   :  { %v1722_v26 = vadd.f32 %v1721_v47, %v1702_v45 }
 0x3ef   :  { %v1741_v50 = vpop.f32.mrf.mxu0 }
 0x3f0   :  { %v1742_v39 = vadd.f32 %v1741_v50, %v1722_v26 }
 0x3f2   :  { %v1761_v27 = vpop.f32.mrf.mxu1 }
 0x3f3   :  { %v1762_v54 = vadd.f32 %v1761_v27, %v1742_v39  ;;  %v1781_v56 = vpop.f32.mrf.mxu2 }
 0x3f5   :  { %v1782_v57 = vadd.f32 %v1781_v56, %v1762_v54 }
 0x3f6   :  { %v1801_v19 = vpop.f32.mrf.mxu3 }
 0x3f7   :  { %v1802_v58 = vadd.f32 %v1801_v19, %v1782_v57 }
 0x407   :  { %v1821_v25 = vpop.f32.mrf.mxu0 }
 0x408   :  { %v1822_v59 = vadd.f32 %v1821_v25, %v1802_v58 }
 0x40a   :  { %v1841_v60 = vpop.f32.mrf.mxu1 }
 0x40b   :  { %v1842_v62 = vadd.f32 %v1841_v60, %v1822_v59 }
 0x40d   :  { %v1861_v61 = vpop.f32.mrf.mxu2 }
 0x40e   :  { %v1862_v63 = vadd.f32 %v1861_v61, %v1842_v62 }
 0x410   :  { %v1881_v0 = vpop.f32.mrf.mxu3 }
 0x411   :  { %v1882_v1 = vadd.f32 %v1881_v0, %v1862_v63 }
 0x429   :  { %v1901_v2 = vpop.f32.mrf.mxu0 }
 0x42a   :  { %v1902_v3 = vadd.f32 %v1901_v2, %v1882_v1 }
 0x42b   :  { %v1921_v4 = vpop.f32.mrf.mxu1 }
 0x42c   :  { %v1922_v5 = vadd.f32 %v1921_v4, %v1902_v3 }
 0x42f   :  { %v1941_v6 = vpop.f32.mrf.mxu2 }
 0x430   :  { %v1942_v7 = vadd.f32 %v1941_v6, %v1922_v5 }
 0x431   :  { %v1961_v46 = vpop.f32.mrf.mxu3 }
 0x432   :  { %v1962_v8 = vadd.f32 %v1961_v46, %v1942_v7 }
 0x434   :  { %v1964_v42 = vmax.f32 %v1962_v8, 0.0 }
 0x436   :  { %1999 = vmatmul.f32.vlgmr.msra.gmra.mxu0 %v1964_v42 }
 0x4b3   :  { %v2000_v10 = vpop.f32.mrf.mxu0 }
 0x4b4   :  { %v2001_v11 = vadd.f32 %v2227_v9, %v2000_v10 }
 0x4b6   :  { %v2004_v12 = vsel %vm2003_vm1, %v2001_v11, -inf }
 0x4b7   :  { %2005 = vmax.xlane.f32.xlu0 %v2004_v12 }
 0x52a   :  { %v2006_v13 = vpop.xlane.xlu0 %2005 }
 0x52b   :  { %v2007_v14 = vsub.f32 %v2001_v11, %v2006_v13 }
 0x52d   :  { %v2008_v15 = vmul.f32 1.442695, %v2007_v14 }
 0x52f   :  { %2228 = vpow2.f32 %v2008_v15 }
 0x535   :  { %v2229_v16 = vpop.eup %2228 }
 0x536   :  { %v2010_v21 = vsel %vm2003_vm1, %v2229_v16, 0.0 }
 0x537   :  { %2011 = vadd.xlane.f32.xlu0 %v2010_v21 }
 0x5aa   :  { %v2012_v23 = vpop.xlane.xlu0 %2011 }
 0x5ab   :  { %2230 = vrcp.f32 %v2012_v23  ;;  %v2024_v36 = vand.u32 2147483648, %v2012_v23  ;;  %v2022_v24 = vand.u32 2147483647, %v2012_v23  ;;  %vm2018_vm3 = vweird.f32 %v2012_v23 }
 0x5ad   :  { %v2025_v28 = vor.u32 1.1754944e-38, %v2024_v36  ;;  %vm2023_vm5 = vcmp.eq.f32.partialorder %v2022_v24, 8.507059e+37 }
 0x5b1   :  { %v2231_v17 = vpop.eup %2230 }
 0x5b2   :  { %v2014_v18 = vmul.f32 %v2231_v17, %v2012_v23  ;;  %vm2019_vm2 = vweird.f32 %v2231_v17 }
 0x5b3   :  { %vm2020_vm4 = vmor %vm2018_vm3, %vm2019_vm2 }
 0x5b4   :  { %v2015_v35 = vsub.f32 1.0, %v2014_v18 }
 0x5b6   :  { %v2016_v22 = vmul.f32 %v2231_v17, %v2015_v35 }
 0x5b8   :  { %v2017_v38 = vadd.f32 %v2231_v17, %v2016_v22 }
 0x5ba   :  { %v2021_v30 = vsel %vm2020_vm4, %v2231_v17, %v2017_v38 }
 0x5bb   :  { %v2026_v32 = vsel %vm2023_vm5, %v2025_v28, %v2021_v30 }
 0x5bc   :  { %v2027_v33 = vmul.f32 %v2229_v16, %v2026_v32 }
 0x5be   :  { %2028 = vst.msk [vmem:[#allocation6] sm:$0x1] %vm2003_vm1, %v2027_v33 }
 0x5bf   :  { %2039 = dma.vmem_to_hbm [thread:$0]  %s2035_s4, 16, %s2037_s7, [#allocation7]  }
 0x5c0   :  { %2258 = dma.done.wait [#allocation7], 16  }
 0x5c1   :  { %2259 = vsyncadd [#allocation7], 4294967280 }
 0x5c2   :  { %2044 = vsyncpa [#allocation7], 1 }
 0x5c3   :  { %2045 = vsyncmov [#allocation5] }
 0x5c6   :  { %s2046_s8 = vpop.sfrf %2045 }
 0x5c7   :  { %p2211_p0 = scmp.ne.s32.totalorder %s2046_s8, 0 }
 0x5c9   :  { %2050 = shalt.err (%p2211_p0)  }

</bundles_post_ra>
